<compile_context>
chip_gen: v7x
topology: tpu7x:2x2x1
jax: 0.10.0
libtpu: 0.0.40
codegen_flags: <defaults>
</compile_context>

<pallas_src>
import jax
import jax.numpy as jnp
from jax.experimental import pallas as pl
from jax.experimental.pallas import tpu as pltpu


OUT_PAD = 128   # lane-dense width of the kernel's HBM output (sliced to 1 outside)
LN_EPS = 1e-5


# ----------------------------------------------------------------------------
# Fused kernel: conv1 -> conv2 -> flatten+fc -> LayerNorm -> tanh -> Q-MLP
# ----------------------------------------------------------------------------

def _make_fused_kernel(has_action, oh1, ow1, oh2, ow2, nf, lat, bm):
    """Fused forward for one batch block of `bm` rows.

    Activation row layout: row = spatial_position * bm + b_local (position
    major, batch minor), so every slice the kernel needs is a static,
    16-row-aligned contiguous range (no gathers, no in-kernel transposes).
    """
    p1 = oh1 * ow1                       # conv1 spatial positions
    q_ext = (oh2 - 1) * ow1 + ow2        # "wrapped" conv2 positions (incl. invalid cols)

    def kernel(*refs):
        if has_action:
            (cols_ref, act_ref, w1_ref, b1_ref, w2_ref, b2_ref,
             fcw_ref, fcb_ref, g_ref, bt_ref,
             qw1z_ref, qw1a_ref, qb1_ref, qw2_ref, qb2_ref, qw3_ref, qb3_ref,
             out_ref, h1_ref, a2_ref) = refs
        else:
            (cols_ref, w1_ref, b1_ref, w2_ref, b2_ref,
             fcw_ref, fcb_ref, g_ref, bt_ref,
             qw1z_ref, qb1_ref, qw2_ref, qb2_ref, qw3_ref, qb3_ref,
             out_ref, h1_ref, a2_ref) = refs
            act_ref = qw1a_ref = None

        f32 = jnp.float32
        bf16 = jnp.bfloat16

        # ---- conv1: ONE im2col GEMM over every position of the block -------
        h1 = jnp.dot(cols_ref[...], w1_ref[...], preferred_element_type=f32)
        h1_ref[...] = jnp.maximum(h1 + b1_ref[...], 0.0).astype(bf16)

        # ---- conv2: ONE K=9*nf GEMM over a "wrapped" row strip -------------
        # Tap (ti, tj) needs conv1 positions q + ti*ow1 + tj for q=0..q_ext-1,
        # which is one contiguous, 16-row-aligned slice of h1.  Rows whose
        # wrapped column index >= ow2 are garbage and are never read below.
        strip = jnp.concatenate(
            [h1_ref[(ti * ow1 + tj) * bm:(ti * ow1 + tj + q_ext) * bm, :]
             for ti in range(3) for tj in range(3)],
            axis=-1)                                         # [q_ext*bm, 9*nf]
        a2 = jnp.dot(strip, w2_ref[...], preferred_element_type=f32)
        a2_ref[...] = jnp.maximum(a2 + b2_ref[...], 0.0).astype(bf16)

        # ---- flatten (position-major -> batch-major lane concat) + fc as ---
        # ---- ONE K = oh2*ow2*nf contraction ---------------------------------
        flat = jnp.concatenate(
            [a2_ref[(oi * ow1 + oj) * bm:(oi * ow1 + oj + 1) * bm, :]
             for oi in range(oh2) for oj in range(ow2)],
            axis=-1)                                         # [bm, flat_dim]
        hz = jnp.dot(flat, fcw_ref[...], preferred_element_type=f32) + fcb_ref[...]

        # ---- LayerNorm + tanh (f32 elementwise on every generation) --------
        mu = jnp.mean(hz, axis=-1, keepdims=True)
        var = jnp.mean((hz - mu) ** 2, axis=-1, keepdims=True)
        z = jnp.tanh((hz - mu) * jax.lax.rsqrt(var + LN_EPS) * g_ref[...]
                     + bt_ref[...])

        # ---- Q-MLP: concat(z, action) handled as a split first layer -------
        x = jnp.dot(z.astype(bf16), qw1z_ref[...], preferred_element_type=f32)
        if has_action:
            x = x + jnp.dot(act_ref[...], qw1a_ref[...],
                            preferred_element_type=f32)
        x = jnp.maximum(x + qb1_ref[...], 0.0)
        x = jnp.dot(x.astype(bf16), qw2_ref[...], preferred_element_type=f32)
        x = jnp.maximum(x + qb2_ref[...], 0.0)
        q = jnp.dot(x.astype(bf16), qw3_ref[...], preferred_element_type=f32)
        out_ref[...] = (q + qb3_ref[...]).astype(out_ref.dtype)

    return kernel


# ----------------------------------------------------------------------------
# Host-side glue (layout plumbing only)
# ----------------------------------------------------------------------------

def _const_index_map(ndim):
    return lambda i: (0,) * ndim


def _round_up(x, m):
    return ((x + m - 1) // m) * m


def _choose_bm(batch):
    """Batch rows per grid step.

    Multiple of 16 (bf16 sublane packing), capped at 128, and for batches that
    allow it at least 2 grid steps so the 'parallel' axis can shard across the
    two v7x TensorCores.
    """
    if batch <= 16:
        return 16
    bm = _round_up(-(-batch // 2), 16)       # ceil(batch/2), rounded up to 16
    return min(bm, 128)


def _im2col_nhwc(x, k, stride):
    """[B,H,W,C] -> ([B, OH*OW, k*k*C], OH, OW); taps ordered (ki, kj, c)."""
    B, H, W, C = x.shape
    OH = (H - k) // stride + 1
    OW = (W - k) // stride + 1
    taps = []
    for i in range(k):
        for j in range(k):
            taps.append(x[:, i:i + stride * OH:stride,
                          j:j + stride * OW:stride, :])
    cols = jnp.concatenate(taps, axis=-1)
    return cols.reshape(B, OH * OW, k * k * C), OH, OW


def _pack_params(p):
    """Cast weights to bf16 (MXU-native) and reshape for the fused kernel."""
    bf16 = jnp.bfloat16
    nf = p["conv1_w"].shape[1]
    lat = p["fc_w"].shape[1]
    hid = p["q_w1"].shape[1]
    return {
        "w1": p["conv1_w"].astype(bf16),                        # [9*Cin, nf]
        "b1": p["conv1_b"].reshape(1, nf),
        "w2": p["conv2_w"].astype(bf16),                        # [9*nf, nf] tap-major
        "b2": p["conv2_b"].reshape(1, nf),
        "fcw": p["fc_w"].astype(bf16),                          # [flat_dim, lat]
        "fcb": p["fc_b"].reshape(1, lat),
        "g": p["ln_gamma"].reshape(1, lat),
        "bt": p["ln_beta"].reshape(1, lat),
        "qw1z": p["q_w1"][:lat].astype(bf16),                   # [lat, hid]
        "qw1a": p["q_w1"][lat:].astype(bf16),                   # [A, hid]
        "qb1": p["q_b1"].reshape(1, hid),
        "qw2": p["q_w2"].astype(bf16),                          # [hid, hid]
        "qb2": p["q_b2"].reshape(1, hid),
        # last layer padded to 128 output lanes -> dense HBM store
        "qw3": jnp.pad(p["q_w3"], ((0, 0), (0, OUT_PAD - 1))).astype(bf16),
        "qb3": jnp.pad(p["q_b3"].reshape(1, 1), ((0, 0), (0, OUT_PAD - 1))),
    }


def encoder_wrapper_forward(p, obs, action=None, detach_encoder=False):
    """Mirrors EncoderWrapper.forward(obs, action=None, detach_encoder=False).

    detach_encoder only changes gradients (z.detach()); forward values are
    identical, and this implementation is forward-only.
    """
    # TODO(synk): training needs a custom VJP around the fused kernel;
    # detach_encoder would gate the encoder cotangent there. Forward is exact.
    del detach_encoder
    has_action = action is not None

    nf = p["conv1_w"].shape[1]
    lat = p["fc_w"].shape[1]

    # NCHW -> NHWC + conv1 im2col on the host (layout plumbing only).
    # TODO(synk): fold the im2col / block re-pack into the kernel (strided
    # pl.ds loads on a raw obs block) to drop the extra HBM round trip.
    x = jnp.transpose(obs, (0, 2, 3, 1)).astype(jnp.float32)
    B = x.shape[0]
    cols, oh1, ow1 = _im2col_nhwc(x, k=3, stride=2)     # [B, P1, K1]
    P1, K1 = cols.shape[1], cols.shape[2]
    oh2, ow2 = oh1 - 2, ow1 - 2

    bm = _choose_bm(B)
    nblk = pl.cdiv(B, bm)
    b_pad = nblk * bm
    if b_pad != B:
        cols = jnp.pad(cols, ((0, b_pad - B), (0, 0), (0, 0)))
    # Position-major row order inside each batch block: row = pos*bm + b_local,
    # so every in-kernel slice is a static 16-row-aligned contiguous range.
    cols = (cols.reshape(nblk, bm, P1, K1)
                .transpose(0, 2, 1, 3)
                .reshape(nblk, P1 * bm, K1)
                .astype(jnp.bfloat16))

    inputs = [cols]
    in_specs = [pl.BlockSpec((None, P1 * bm, K1), lambda i: (i, 0, 0))]

    if has_action:
        act = action.astype(jnp.float32)
        if b_pad != B:
            act = jnp.pad(act, ((0, b_pad - B), (0, 0)))
        act = act.astype(jnp.bfloat16)
        inputs.append(act)
        in_specs.append(pl.BlockSpec((bm, act.shape[1]), lambda i: (i, 0)))

    kp = _pack_params(p)
    weight_names = (["w1", "b1", "w2", "b2", "fcw", "fcb", "g", "bt", "qw1z"]
                    + (["qw1a"] if has_action else [])
                    + ["qb1", "qw2", "qb2", "qw3", "qb3"])
    for name in weight_names:
        w = kp[name]
        inputs.append(w)
        # constant index_map -> weights stay VMEM-resident across grid steps
        in_specs.append(pl.BlockSpec(w.shape, _const_index_map(w.ndim)))

    q_ext = (oh2 - 1) * ow1 + ow2
    kernel = _make_fused_kernel(has_action, oh1, ow1, oh2, ow2, nf, lat, bm)

    out = pl.pallas_call(
        kernel,
        out_shape=jax.ShapeDtypeStruct((b_pad, OUT_PAD), jnp.float32),
        grid=(nblk,),
        in_specs=in_specs,
        out_specs=pl.BlockSpec((bm, OUT_PAD), lambda i: (i, 0)),
        scratch_shapes=[
            pltpu.VMEM((P1 * bm, nf), jnp.bfloat16),     # conv1 feature map
            pltpu.VMEM((q_ext * bm, nf), jnp.bfloat16),  # conv2 feature map
        ],
        compiler_params=pltpu.CompilerParams(
            dimension_semantics=("parallel",),
            vmem_limit_bytes=32 * 1024 * 1024),
    )(*inputs)

    return out[:B, :1]


# ----------------------------------------------------------------------------
# Synthetic parameters (deterministic) and a plain-JAX f32 reference
# ----------------------------------------------------------------------------

def make_params(key, in_channels=4, num_filters=32, latent_dim=32,
                action_dim=4, hidden_dim=32, img_hw=16):
    ks = jax.random.split(key, 6)

    def init(k, shape, fan_in):
        return jax.random.normal(k, shape, jnp.float32) / jnp.sqrt(fan_in)

    k1_in = 3 * 3 * in_channels
    k2_in = 3 * 3 * num_filters
    oh1 = (img_hw - 3) // 2 + 1
    oh2 = oh1 - 2
    flat_dim = oh2 * oh2 * num_filters

    # NOTE: conv weights are stored as [kh*kw*Cin, Cout] with (kh, kw, cin)
    # row order (channels fastest) and fc_w rows are (oh, ow, c) ordered,
    # matching the im2col / NHWC flatten used here.  Real PyTorch conv weights
    # [Cout, Cin, kh, kw] (and the NCHW-flatten fc) must be permuted first.
    return {
        "conv1_w": init(ks[0], (k1_in, num_filters), k1_in),
        "conv1_b": jnp.zeros((num_filters,), jnp.float32),
        "conv2_w": init(ks[1], (k2_in, num_filters), k2_in),
        "conv2_b": jnp.zeros((num_filters,), jnp.float32),
        "fc_w": init(ks[2], (flat_dim, latent_dim), flat_dim),
        "fc_b": jnp.zeros((latent_dim,), jnp.float32),
        "ln_gamma": jnp.ones((latent_dim,), jnp.float32),
        "ln_beta": jnp.zeros((latent_dim,), jnp.float32),
        "q_w1": init(ks[3], (latent_dim + action_dim, hidden_dim),
                     latent_dim + action_dim),
        "q_b1": jnp.zeros((hidden_dim,), jnp.float32),
        "q_w2": init(ks[4], (hidden_dim, hidden_dim), hidden_dim),
        "q_b2": jnp.zeros((hidden_dim,), jnp.float32),
        "q_w3": init(ks[5], (hidden_dim, 1), hidden_dim),
        "q_b3": jnp.zeros((1,), jnp.float32),
    }


def reference_forward(p, obs, action=None):
    x = jnp.transpose(obs, (0, 2, 3, 1)).astype(jnp.float32)
    B = x.shape[0]
    lat = p["fc_w"].shape[1]
    cols1, oh1, ow1 = _im2col_nhwc(x, 3, 2)
    h1 = jnp.maximum(cols1.reshape(-1, cols1.shape[-1]) @ p["conv1_w"]
                     + p["conv1_b"], 0.0).reshape(B, oh1, ow1, -1)
    cols2, _, _ = _im2col_nhwc(h1, 3, 1)
    h2 = jnp.maximum(cols2.reshape(-1, cols2.shape[-1]) @ p["conv2_w"]
                     + p["conv2_b"], 0.0).reshape(B, -1)
    h = h2 @ p["fc_w"] + p["fc_b"]
    mu = h.mean(-1, keepdims=True)
    var = ((h - mu) ** 2).mean(-1, keepdims=True)
    z = jnp.tanh((h - mu) * jax.lax.rsqrt(var + LN_EPS) * p["ln_gamma"]
                 + p["ln_beta"])
    if action is not None:
        xq = jnp.concatenate([z, action.astype(jnp.float32)], axis=-1)
        w1 = p["q_w1"]
    else:
        xq = z
        w1 = p["q_w1"][:lat]
    a1 = jnp.maximum(xq @ w1 + p["q_b1"], 0.0)
    a2 = jnp.maximum(a1 @ p["q_w2"] + p["q_b2"], 0.0)
    return a2 @ p["q_w3"] + p["q_b3"]


# ----------------------------------------------------------------------------
# main
# ----------------------------------------------------------------------------

if __name__ == "__main__":
    key = jax.random.PRNGKey(0)
    k_param, k_obs, k_act = jax.random.split(key, 3)

    B, C, H, W = 2, 4, 16, 16
    ACTION_DIM = 4

    params = make_params(k_param, in_channels=C, action_dim=ACTION_DIM,
                         img_hw=H)
    obs = jax.random.normal(k_obs, (B, C, H, W), jnp.float32)       # NCHW
    action = jax.random.normal(k_act, (B, ACTION_DIM), jnp.float32)

    fwd = jax.jit(encoder_wrapper_forward,
                  static_argnames=("detach_encoder",))

    # Q(z, a) with detach flag (detach affects only gradients -> same forward)
    q = fwd(params, obs, action, detach_encoder=True)
    jax.block_until_ready(q)
    assert q.shape == (B, 1)

    # function(z) without action
    v = fwd(params, obs, None)
    jax.block_until_ready(v)
    assert v.shape == (B, 1)

    # numerical sanity check vs. a plain-JAX f32 reference (kernel matmuls run
    # in bf16 with f32 accumulation, hence the loose tolerance)
    q_ref = reference_forward(params, obs, action)
    v_ref = reference_forward(params, obs, None)
    assert jnp.allclose(q, q_ref, atol=1e-1, rtol=1e-1)
    assert jnp.allclose(v, v_ref, atol=1e-1, rtol=1e-1)

    print("KERNEL_OK")
</pallas_src>

<mosaic_0001>
module attributes {stable_mosaic.version = 11 : i64} {
  func.func @kernel(%arg0: i32, %arg1: memref<1x784x36xbf16, #tpu.memory_space<vmem>>, %arg2: memref<16x4xbf16, #tpu.memory_space<vmem>>, %arg3: memref<36x32xbf16, #tpu.memory_space<vmem>>, %arg4: memref<1x32xf32, #tpu.memory_space<vmem>>, %arg5: memref<288x32xbf16, #tpu.memory_space<vmem>>, %arg6: memref<1x32xf32, #tpu.memory_space<vmem>>, %arg7: memref<800x32xbf16, #tpu.memory_space<vmem>>, %arg8: memref<1x32xf32, #tpu.memory_space<vmem>>, %arg9: memref<1x32xf32, #tpu.memory_space<vmem>>, %arg10: memref<1x32xf32, #tpu.memory_space<vmem>>, %arg11: memref<32x32xbf16, #tpu.memory_space<vmem>>, %arg12: memref<4x32xbf16, #tpu.memory_space<vmem>>, %arg13: memref<1x32xf32, #tpu.memory_space<vmem>>, %arg14: memref<32x32xbf16, #tpu.memory_space<vmem>>, %arg15: memref<1x32xf32, #tpu.memory_space<vmem>>, %arg16: memref<32x128xbf16, #tpu.memory_space<vmem>>, %arg17: memref<1x128xf32, #tpu.memory_space<vmem>>, %arg18: memref<16x128xf32, #tpu.memory_space<vmem>>, %arg19: memref<784x32xbf16, #tpu.memory_space<vmem>>, %arg20: memref<528x32xbf16, #tpu.memory_space<vmem>>) attributes {dimension_semantics = [#tpu.dimension_semantics<parallel>], iteration_bounds = array<i64: 1>, scalar_prefetch = 0 : i64, scratch_operands = 2 : i64, tpu.core_type = #tpu.core_type<tc>, window_params = [{transform_indices = @transform_0, window_bounds = array<i64: 1, 784, 36>}, {transform_indices = @transform_1, window_bounds = array<i64: 16, 4>}, {pipeline_mode = #tpu.pipeline_mode<synchronous>, transform_indices = @transform_2, window_bounds = array<i64: 36, 32>}, {pipeline_mode = #tpu.pipeline_mode<synchronous>, transform_indices = @transform_3, window_bounds = array<i64: 1, 32>}, {pipeline_mode = #tpu.pipeline_mode<synchronous>, transform_indices = @transform_4, window_bounds = array<i64: 288, 32>}, {pipeline_mode = #tpu.pipeline_mode<synchronous>, transform_indices = @transform_5, window_bounds = array<i64: 1, 32>}, {pipeline_mode = #tpu.pipeline_mode<synchronous>, transform_indices = @transform_6, window_bounds = array<i64: 800, 32>}, {pipeline_mode = #tpu.pipeline_mode<synchronous>, transform_indices = @transform_7, window_bounds = array<i64: 1, 32>}, {pipeline_mode = #tpu.pipeline_mode<synchronous>, transform_indices = @transform_8, window_bounds = array<i64: 1, 32>}, {pipeline_mode = #tpu.pipeline_mode<synchronous>, transform_indices = @transform_9, window_bounds = array<i64: 1, 32>}, {pipeline_mode = #tpu.pipeline_mode<synchronous>, transform_indices = @transform_10, window_bounds = array<i64: 32, 32>}, {pipeline_mode = #tpu.pipeline_mode<synchronous>, transform_indices = @transform_11, window_bounds = array<i64: 4, 32>}, {pipeline_mode = #tpu.pipeline_mode<synchronous>, transform_indices = @transform_12, window_bounds = array<i64: 1, 32>}, {pipeline_mode = #tpu.pipeline_mode<synchronous>, transform_indices = @transform_13, window_bounds = array<i64: 32, 32>}, {pipeline_mode = #tpu.pipeline_mode<synchronous>, transform_indices = @transform_14, window_bounds = array<i64: 1, 32>}, {pipeline_mode = #tpu.pipeline_mode<synchronous>, transform_indices = @transform_15, window_bounds = array<i64: 32, 128>}, {pipeline_mode = #tpu.pipeline_mode<synchronous>, transform_indices = @transform_16, window_bounds = array<i64: 1, 128>}, {transform_indices = @transform_17, window_bounds = array<i64: 16, 128>}]} {
    %c0 = arith.constant 0 : index
    %c0_0 = arith.constant 0 : index
    %c0_1 = arith.constant 0 : index
    %0 = vector.load %arg1[%c0, %c0_0, %c0_1] : memref<1x784x36xbf16, #tpu.memory_space<vmem>>, vector<1x784x36xbf16>
    %1 = vector.shape_cast %0 : vector<1x784x36xbf16> to vector<784x36xbf16>
    %c0_2 = arith.constant 0 : index
    %c0_3 = arith.constant 0 : index
    %2 = vector.load %arg3[%c0_2, %c0_3] : memref<36x32xbf16, #tpu.memory_space<vmem>>, vector<36x32xbf16>
    %cst = arith.constant dense<0.000000e+00> : vector<784x32xf32>
    %3 = tpu.matmul %1, %2, %cst {dimension_numbers = #tpu.dot_dimension_numbers<[1], [0], [0], [1], [0, 0, 1, 1], [], []>} : vector<784x36xbf16>, vector<36x32xbf16>, vector<784x32xf32> -> vector<784x32xf32>
    %c0_4 = arith.constant 0 : index
    %c0_5 = arith.constant 0 : index
    %4 = vector.load %arg4[%c0_4, %c0_5] : memref<1x32xf32, #tpu.memory_space<vmem>>, vector<1x32xf32>
    %5 = vector.broadcast %4 : vector<1x32xf32> to vector<784x32xf32>
    %6 = arith.addf %3, %5 : vector<784x32xf32>
    %cst_6 = arith.constant 0.000000e+00 : f32
    %7 = vector.broadcast %cst_6 : f32 to vector<784x32xf32>
    %8 = arith.maximumf %6, %7 : vector<784x32xf32>
    %9 = arith.truncf %8 : vector<784x32xf32> to vector<784x32xbf16>
    %c0_7 = arith.constant 0 : index
    %c0_8 = arith.constant 0 : index
    %10 = vector.load %arg19[%c0_7, %c0_8] : memref<784x32xbf16, #tpu.memory_space<vmem>>, vector<784x32xbf16>
    tpu.vector_store %arg19[%c0_7, %c0_8], %9 {strides = array<i32>} : memref<784x32xbf16, #tpu.memory_space<vmem>>, vector<784x32xbf16>,
    %c0_9 = arith.constant 0 : index
    %c0_10 = arith.constant 0 : index
    %11 = vector.load %arg19[%c0_9, %c0_10] : memref<784x32xbf16, #tpu.memory_space<vmem>>, vector<528x32xbf16>
    %c16 = arith.constant 16 : index
    %c0_11 = arith.constant 0 : index
    %12 = vector.load %arg19[%c16, %c0_11] : memref<784x32xbf16, #tpu.memory_space<vmem>>, vector<528x32xbf16>
    %c32 = arith.constant 32 : index
    %c0_12 = arith.constant 0 : index
    %13 = vector.load %arg19[%c32, %c0_12] : memref<784x32xbf16, #tpu.memory_space<vmem>>, vector<528x32xbf16>
    %c112 = arith.constant 112 : index
    %c0_13 = arith.constant 0 : index
    %14 = vector.load %arg19[%c112, %c0_13] : memref<784x32xbf16, #tpu.memory_space<vmem>>, vector<528x32xbf16>
    %c128 = arith.constant 128 : index
    %c0_14 = arith.constant 0 : index
    %15 = vector.load %arg19[%c128, %c0_14] : memref<784x32xbf16, #tpu.memory_space<vmem>>, vector<528x32xbf16>
    %c144 = arith.constant 144 : index
    %c0_15 = arith.constant 0 : index
    %16 = vector.load %arg19[%c144, %c0_15] : memref<784x32xbf16, #tpu.memory_space<vmem>>, vector<528x32xbf16>
    %c224 = arith.constant 224 : index
    %c0_16 = arith.constant 0 : index
    %17 = vector.load %arg19[%c224, %c0_16] : memref<784x32xbf16, #tpu.memory_space<vmem>>, vector<528x32xbf16>
    %c240 = arith.constant 240 : index
    %c0_17 = arith.constant 0 : index
    %18 = vector.load %arg19[%c240, %c0_17] : memref<784x32xbf16, #tpu.memory_space<vmem>>, vector<528x32xbf16>
    %c256 = arith.constant 256 : index
    %c0_18 = arith.constant 0 : index
    %19 = vector.load %arg19[%c256, %c0_18] : memref<784x32xbf16, #tpu.memory_space<vmem>>, vector<528x32xbf16>
    %20 = tpu.concatenate %11, %12, %13, %14, %15, %16, %17, %18, %19 in 1 : vector<528x32xbf16>, vector<528x32xbf16>, vector<528x32xbf16>, vector<528x32xbf16>, vector<528x32xbf16>, vector<528x32xbf16>, vector<528x32xbf16>, vector<528x32xbf16>, vector<528x32xbf16> -> vector<528x288xbf16>
    %c0_19 = arith.constant 0 : index
    %c0_20 = arith.constant 0 : index
    %21 = vector.load %arg5[%c0_19, %c0_20] : memref<288x32xbf16, #tpu.memory_space<vmem>>, vector<288x32xbf16>
    %cst_21 = arith.constant dense<0.000000e+00> : vector<528x32xf32>
    %22 = tpu.matmul %20, %21, %cst_21 {dimension_numbers = #tpu.dot_dimension_numbers<[1], [0], [0], [1], [0, 0, 1, 1], [], []>} : vector<528x288xbf16>, vector<288x32xbf16>, vector<528x32xf32> -> vector<528x32xf32>
    %c0_22 = arith.constant 0 : index
    %c0_23 = arith.constant 0 : index
    %23 = vector.load %arg6[%c0_22, %c0_23] : memref<1x32xf32, #tpu.memory_space<vmem>>, vector<1x32xf32>
    %24 = vector.broadcast %23 : vector<1x32xf32> to vector<528x32xf32>
    %25 = arith.addf %22, %24 : vector<528x32xf32>
    %cst_24 = arith.constant 0.000000e+00 : f32
    %26 = vector.broadcast %cst_24 : f32 to vector<528x32xf32>
    %27 = arith.maximumf %25, %26 : vector<528x32xf32>
    %28 = arith.truncf %27 : vector<528x32xf32> to vector<528x32xbf16>
    %c0_25 = arith.constant 0 : index
    %c0_26 = arith.constant 0 : index
    %29 = vector.load %arg20[%c0_25, %c0_26] : memref<528x32xbf16, #tpu.memory_space<vmem>>, vector<528x32xbf16>
    tpu.vector_store %arg20[%c0_25, %c0_26], %28 {strides = array<i32>} : memref<528x32xbf16, #tpu.memory_space<vmem>>, vector<528x32xbf16>,
    %c0_27 = arith.constant 0 : index
    %c0_28 = arith.constant 0 : index
    %30 = vector.load %arg20[%c0_27, %c0_28] : memref<528x32xbf16, #tpu.memory_space<vmem>>, vector<16x32xbf16>
    %c16_29 = arith.constant 16 : index
    %c0_30 = arith.constant 0 : index
    %31 = vector.load %arg20[%c16_29, %c0_30] : memref<528x32xbf16, #tpu.memory_space<vmem>>, vector<16x32xbf16>
    %c32_31 = arith.constant 32 : index
    %c0_32 = arith.constant 0 : index
    %32 = vector.load %arg20[%c32_31, %c0_32] : memref<528x32xbf16, #tpu.memory_space<vmem>>, vector<16x32xbf16>
    %c48 = arith.constant 48 : index
    %c0_33 = arith.constant 0 : index
    %33 = vector.load %arg20[%c48, %c0_33] : memref<528x32xbf16, #tpu.memory_space<vmem>>, vector<16x32xbf16>
    %c64 = arith.constant 64 : index
    %c0_34 = arith.constant 0 : index
    %34 = vector.load %arg20[%c64, %c0_34] : memref<528x32xbf16, #tpu.memory_space<vmem>>, vector<16x32xbf16>
    %c112_35 = arith.constant 112 : index
    %c0_36 = arith.constant 0 : index
    %35 = vector.load %arg20[%c112_35, %c0_36] : memref<528x32xbf16, #tpu.memory_space<vmem>>, vector<16x32xbf16>
    %c128_37 = arith.constant 128 : index
    %c0_38 = arith.constant 0 : index
    %36 = vector.load %arg20[%c128_37, %c0_38] : memref<528x32xbf16, #tpu.memory_space<vmem>>, vector<16x32xbf16>
    %c144_39 = arith.constant 144 : index
    %c0_40 = arith.constant 0 : index
    %37 = vector.load %arg20[%c144_39, %c0_40] : memref<528x32xbf16, #tpu.memory_space<vmem>>, vector<16x32xbf16>
    %c160 = arith.constant 160 : index
    %c0_41 = arith.constant 0 : index
    %38 = vector.load %arg20[%c160, %c0_41] : memref<528x32xbf16, #tpu.memory_space<vmem>>, vector<16x32xbf16>
    %c176 = arith.constant 176 : index
    %c0_42 = arith.constant 0 : index
    %39 = vector.load %arg20[%c176, %c0_42] : memref<528x32xbf16, #tpu.memory_space<vmem>>, vector<16x32xbf16>
    %c224_43 = arith.constant 224 : index
    %c0_44 = arith.constant 0 : index
    %40 = vector.load %arg20[%c224_43, %c0_44] : memref<528x32xbf16, #tpu.memory_space<vmem>>, vector<16x32xbf16>
    %c240_45 = arith.constant 240 : index
    %c0_46 = arith.constant 0 : index
    %41 = vector.load %arg20[%c240_45, %c0_46] : memref<528x32xbf16, #tpu.memory_space<vmem>>, vector<16x32xbf16>
    %c256_47 = arith.constant 256 : index
    %c0_48 = arith.constant 0 : index
    %42 = vector.load %arg20[%c256_47, %c0_48] : memref<528x32xbf16, #tpu.memory_space<vmem>>, vector<16x32xbf16>
    %c272 = arith.constant 272 : index
    %c0_49 = arith.constant 0 : index
    %43 = vector.load %arg20[%c272, %c0_49] : memref<528x32xbf16, #tpu.memory_space<vmem>>, vector<16x32xbf16>
    %c288 = arith.constant 288 : index
    %c0_50 = arith.constant 0 : index
    %44 = vector.load %arg20[%c288, %c0_50] : memref<528x32xbf16, #tpu.memory_space<vmem>>, vector<16x32xbf16>
    %c336 = arith.constant 336 : index
    %c0_51 = arith.constant 0 : index
    %45 = vector.load %arg20[%c336, %c0_51] : memref<528x32xbf16, #tpu.memory_space<vmem>>, vector<16x32xbf16>
    %c352 = arith.constant 352 : index
    %c0_52 = arith.constant 0 : index
    %46 = vector.load %arg20[%c352, %c0_52] : memref<528x32xbf16, #tpu.memory_space<vmem>>, vector<16x32xbf16>
    %c368 = arith.constant 368 : index
    %c0_53 = arith.constant 0 : index
    %47 = vector.load %arg20[%c368, %c0_53] : memref<528x32xbf16, #tpu.memory_space<vmem>>, vector<16x32xbf16>
    %c384 = arith.constant 384 : index
    %c0_54 = arith.constant 0 : index
    %48 = vector.load %arg20[%c384, %c0_54] : memref<528x32xbf16, #tpu.memory_space<vmem>>, vector<16x32xbf16>
    %c400 = arith.constant 400 : index
    %c0_55 = arith.constant 0 : index
    %49 = vector.load %arg20[%c400, %c0_55] : memref<528x32xbf16, #tpu.memory_space<vmem>>, vector<16x32xbf16>
    %c448 = arith.constant 448 : index
    %c0_56 = arith.constant 0 : index
    %50 = vector.load %arg20[%c448, %c0_56] : memref<528x32xbf16, #tpu.memory_space<vmem>>, vector<16x32xbf16>
    %c464 = arith.constant 464 : index
    %c0_57 = arith.constant 0 : index
    %51 = vector.load %arg20[%c464, %c0_57] : memref<528x32xbf16, #tpu.memory_space<vmem>>, vector<16x32xbf16>
    %c480 = arith.constant 480 : index
    %c0_58 = arith.constant 0 : index
    %52 = vector.load %arg20[%c480, %c0_58] : memref<528x32xbf16, #tpu.memory_space<vmem>>, vector<16x32xbf16>
    %c496 = arith.constant 496 : index
    %c0_59 = arith.constant 0 : index
    %53 = vector.load %arg20[%c496, %c0_59] : memref<528x32xbf16, #tpu.memory_space<vmem>>, vector<16x32xbf16>
    %c512 = arith.constant 512 : index
    %c0_60 = arith.constant 0 : index
    %54 = vector.load %arg20[%c512, %c0_60] : memref<528x32xbf16, #tpu.memory_space<vmem>>, vector<16x32xbf16>
    %55 = tpu.concatenate %30, %31, %32, %33, %34, %35, %36, %37, %38, %39, %40, %41, %42, %43, %44, %45 in 1 : vector<16x32xbf16>, vector<16x32xbf16>, vector<16x32xbf16>, vector<16x32xbf16>, vector<16x32xbf16>, vector<16x32xbf16>, vector<16x32xbf16>, vector<16x32xbf16>, vector<16x32xbf16>, vector<16x32xbf16>, vector<16x32xbf16>, vector<16x32xbf16>, vector<16x32xbf16>, vector<16x32xbf16>, vector<16x32xbf16>, vector<16x32xbf16> -> vector<16x512xbf16>
    %56 = tpu.concatenate %46, %47, %48, %49, %50, %51, %52, %53, %54 in 1 : vector<16x32xbf16>, vector<16x32xbf16>, vector<16x32xbf16>, vector<16x32xbf16>, vector<16x32xbf16>, vector<16x32xbf16>, vector<16x32xbf16>, vector<16x32xbf16>, vector<16x32xbf16> -> vector<16x288xbf16>
    %57 = tpu.concatenate %55, %56 in 1 : vector<16x512xbf16>, vector<16x288xbf16> -> vector<16x800xbf16>
    %c0_61 = arith.constant 0 : index
    %c0_62 = arith.constant 0 : index
    %58 = vector.load %arg7[%c0_61, %c0_62] : memref<800x32xbf16, #tpu.memory_space<vmem>>, vector<800x32xbf16>
    %cst_63 = arith.constant dense<0.000000e+00> : vector<16x32xf32>
    %59 = tpu.matmul %57, %58, %cst_63 {dimension_numbers = #tpu.dot_dimension_numbers<[1], [0], [0], [1], [0, 0, 1, 1], [], []>} : vector<16x800xbf16>, vector<800x32xbf16>, vector<16x32xf32> -> vector<16x32xf32>
    %c0_64 = arith.constant 0 : index
    %c0_65 = arith.constant 0 : index
    %60 = vector.load %arg8[%c0_64, %c0_65] : memref<1x32xf32, #tpu.memory_space<vmem>>, vector<1x32xf32>
    %61 = vector.broadcast %60 : vector<1x32xf32> to vector<16x32xf32>
    %62 = arith.addf %59, %61 : vector<16x32xf32>
    %cst_66 = arith.constant dense<0.000000e+00> : vector<16xf32>
    %63 = vector.multi_reduction <add>, %62, %cst_66 [1] : vector<16x32xf32> to vector<16xf32>
    %64 = vector.shape_cast %63 : vector<16xf32> to vector<16x1xf32>
    %cst_67 = arith.constant 3.200000e+01 : f32
    %65 = vector.broadcast %cst_67 : f32 to vector<16x1xf32>
    %66 = arith.divf %64, %65 : vector<16x1xf32>
    %67 = vector.broadcast %66 : vector<16x1xf32> to vector<16x32xf32>
    %68 = arith.subf %62, %67 : vector<16x32xf32>
    %69 = arith.mulf %68, %68 : vector<16x32xf32>
    %cst_68 = arith.constant dense<0.000000e+00> : vector<16xf32>
    %70 = vector.multi_reduction <add>, %69, %cst_68 [1] : vector<16x32xf32> to vector<16xf32>
    %71 = vector.shape_cast %70 : vector<16xf32> to vector<16x1xf32>
    %cst_69 = arith.constant 3.200000e+01 : f32
    %72 = vector.broadcast %cst_69 : f32 to vector<16x1xf32>
    %73 = arith.divf %71, %72 : vector<16x1xf32>
    %74 = vector.broadcast %66 : vector<16x1xf32> to vector<16x32xf32>
    %75 = arith.subf %62, %74 : vector<16x32xf32>
    %cst_70 = arith.constant 9.99999974E-6 : f32
    %76 = vector.broadcast %cst_70 : f32 to vector<16x1xf32>
    %77 = arith.addf %73, %76 : vector<16x1xf32>
    %78 = math.rsqrt %77 : vector<16x1xf32>
    %79 = vector.broadcast %78 : vector<16x1xf32> to vector<16x32xf32>
    %80 = arith.mulf %75, %79 : vector<16x32xf32>
    %c0_71 = arith.constant 0 : index
    %c0_72 = arith.constant 0 : index
    %81 = vector.load %arg9[%c0_71, %c0_72] : memref<1x32xf32, #tpu.memory_space<vmem>>, vector<1x32xf32>
    %82 = vector.broadcast %81 : vector<1x32xf32> to vector<16x32xf32>
    %83 = arith.mulf %80, %82 : vector<16x32xf32>
    %c0_73 = arith.constant 0 : index
    %c0_74 = arith.constant 0 : index
    %84 = vector.load %arg10[%c0_73, %c0_74] : memref<1x32xf32, #tpu.memory_space<vmem>>, vector<1x32xf32>
    %85 = vector.broadcast %84 : vector<1x32xf32> to vector<16x32xf32>
    %86 = arith.addf %83, %85 : vector<16x32xf32>
    %87 = math.tanh %86 : vector<16x32xf32>
    %88 = arith.truncf %87 : vector<16x32xf32> to vector<16x32xbf16>
    %c0_75 = arith.constant 0 : index
    %c0_76 = arith.constant 0 : index
    %89 = vector.load %arg11[%c0_75, %c0_76] : memref<32x32xbf16, #tpu.memory_space<vmem>>, vector<32x32xbf16>
    %cst_77 = arith.constant dense<0.000000e+00> : vector<16x32xf32>
    %90 = tpu.matmul %88, %89, %cst_77 {dimension_numbers = #tpu.dot_dimension_numbers<[1], [0], [0], [1], [0, 0, 1, 1], [], []>} : vector<16x32xbf16>, vector<32x32xbf16>, vector<16x32xf32> -> vector<16x32xf32>
    %c0_78 = arith.constant 0 : index
    %c0_79 = arith.constant 0 : index
    %91 = vector.load %arg2[%c0_78, %c0_79] : memref<16x4xbf16, #tpu.memory_space<vmem>>, vector<16x4xbf16>
    %c0_80 = arith.constant 0 : index
    %c0_81 = arith.constant 0 : index
    %92 = vector.load %arg12[%c0_80, %c0_81] : memref<4x32xbf16, #tpu.memory_space<vmem>>, vector<4x32xbf16>
    %cst_82 = arith.constant dense<0.000000e+00> : vector<16x32xf32>
    %93 = tpu.matmul %91, %92, %cst_82 {dimension_numbers = #tpu.dot_dimension_numbers<[1], [0], [0], [1], [0, 0, 1, 1], [], []>} : vector<16x4xbf16>, vector<4x32xbf16>, vector<16x32xf32> -> vector<16x32xf32>
    %94 = arith.addf %90, %93 : vector<16x32xf32>
    %c0_83 = arith.constant 0 : index
    %c0_84 = arith.constant 0 : index
    %95 = vector.load %arg13[%c0_83, %c0_84] : memref<1x32xf32, #tpu.memory_space<vmem>>, vector<1x32xf32>
    %96 = vector.broadcast %95 : vector<1x32xf32> to vector<16x32xf32>
    %97 = arith.addf %94, %96 : vector<16x32xf32>
    %cst_85 = arith.constant 0.000000e+00 : f32
    %98 = vector.broadcast %cst_85 : f32 to vector<16x32xf32>
    %99 = arith.maximumf %97, %98 : vector<16x32xf32>
    %100 = arith.truncf %99 : vector<16x32xf32> to vector<16x32xbf16>
    %c0_86 = arith.constant 0 : index
    %c0_87 = arith.constant 0 : index
    %101 = vector.load %arg14[%c0_86, %c0_87] : memref<32x32xbf16, #tpu.memory_space<vmem>>, vector<32x32xbf16>
    %cst_88 = arith.constant dense<0.000000e+00> : vector<16x32xf32>
    %102 = tpu.matmul %100, %101, %cst_88 {dimension_numbers = #tpu.dot_dimension_numbers<[1], [0], [0], [1], [0, 0, 1, 1], [], []>} : vector<16x32xbf16>, vector<32x32xbf16>, vector<16x32xf32> -> vector<16x32xf32>
    %c0_89 = arith.constant 0 : index
    %c0_90 = arith.constant 0 : index
    %103 = vector.load %arg15[%c0_89, %c0_90] : memref<1x32xf32, #tpu.memory_space<vmem>>, vector<1x32xf32>
    %104 = vector.broadcast %103 : vector<1x32xf32> to vector<16x32xf32>
    %105 = arith.addf %102, %104 : vector<16x32xf32>
    %cst_91 = arith.constant 0.000000e+00 : f32
    %106 = vector.broadcast %cst_91 : f32 to vector<16x32xf32>
    %107 = arith.maximumf %105, %106 : vector<16x32xf32>
    %108 = arith.truncf %107 : vector<16x32xf32> to vector<16x32xbf16>
    %c0_92 = arith.constant 0 : index
    %c0_93 = arith.constant 0 : index
    %109 = vector.load %arg16[%c0_92, %c0_93] : memref<32x128xbf16, #tpu.memory_space<vmem>>, vector<32x128xbf16>
    %cst_94 = arith.constant dense<0.000000e+00> : vector<16x128xf32>
    %110 = tpu.matmul %108, %109, %cst_94 {dimension_numbers = #tpu.dot_dimension_numbers<[1], [0], [0], [1], [0, 0, 1, 1], [], []>} : vector<16x32xbf16>, vector<32x128xbf16>, vector<16x128xf32> -> vector<16x128xf32>
    %c0_95 = arith.constant 0 : index
    %c0_96 = arith.constant 0 : index
    %111 = vector.load %arg17[%c0_95, %c0_96] : memref<1x128xf32, #tpu.memory_space<vmem>>, vector<1x128xf32>
    %112 = vector.broadcast %111 : vector<1x128xf32> to vector<16x128xf32>
    %113 = arith.addf %110, %112 : vector<16x128xf32>
    %c0_97 = arith.constant 0 : index
    %c0_98 = arith.constant 0 : index
    %114 = vector.load %arg18[%c0_97, %c0_98] : memref<16x128xf32, #tpu.memory_space<vmem>>, vector<16x128xf32>
    tpu.vector_store %arg18[%c0_97, %c0_98], %113 {strides = array<i32>} : memref<16x128xf32, #tpu.memory_space<vmem>>, vector<16x128xf32>,
    return
  }
  func.func @transform_0(%arg0: i32) -> (i32, i32, i32) {
    %c0_i32 = arith.constant 0 : i32
    %c0_i32_0 = arith.constant 0 : i32
    %c0_i32_1 = arith.constant 0 : i32
    return %arg0, %c0_i32, %c0_i32_0 : i32, i32, i32
  }
  func.func @transform_1(%arg0: i32) -> (i32, i32) {
    %c0_i32 = arith.constant 0 : i32
    %c0_i32_0 = arith.constant 0 : i32
    return %arg0, %c0_i32 : i32, i32
  }
  func.func @transform_2(%arg0: i32) -> (i32, i32) {
    %c0_i32 = arith.constant 0 : i32
    %c0_i32_0 = arith.constant 0 : i32
    %c0_i32_1 = arith.constant 0 : i32
    return %c0_i32, %c0_i32_0 : i32, i32
  }
  func.func @transform_3(%arg0: i32) -> (i32, i32) {
    %c0_i32 = arith.constant 0 : i32
    %c0_i32_0 = arith.constant 0 : i32
    %c0_i32_1 = arith.constant 0 : i32
    return %c0_i32, %c0_i32_0 : i32, i32
  }
  func.func @transform_4(%arg0: i32) -> (i32, i32) {
    %c0_i32 = arith.constant 0 : i32
    %c0_i32_0 = arith.constant 0 : i32
    %c0_i32_1 = arith.constant 0 : i32
    return %c0_i32, %c0_i32_0 : i32, i32
  }
  func.func @transform_5(%arg0: i32) -> (i32, i32) {
    %c0_i32 = arith.constant 0 : i32
    %c0_i32_0 = arith.constant 0 : i32
    %c0_i32_1 = arith.constant 0 : i32
    return %c0_i32, %c0_i32_0 : i32, i32
  }
  func.func @transform_6(%arg0: i32) -> (i32, i32) {
    %c0_i32 = arith.constant 0 : i32
    %c0_i32_0 = arith.constant 0 : i32
    %c0_i32_1 = arith.constant 0 : i32
    return %c0_i32, %c0_i32_0 : i32, i32
  }
  func.func @transform_7(%arg0: i32) -> (i32, i32) {
    %c0_i32 = arith.constant 0 : i32
    %c0_i32_0 = arith.constant 0 : i32
    %c0_i32_1 = arith.constant 0 : i32
    return %c0_i32, %c0_i32_0 : i32, i32
  }
  func.func @transform_8(%arg0: i32) -> (i32, i32) {
    %c0_i32 = arith.constant 0 : i32
    %c0_i32_0 = arith.constant 0 : i32
    %c0_i32_1 = arith.constant 0 : i32
    return %c0_i32, %c0_i32_0 : i32, i32
  }
  func.func @transform_9(%arg0: i32) -> (i32, i32) {
    %c0_i32 = arith.constant 0 : i32
    %c0_i32_0 = arith.constant 0 : i32
    %c0_i32_1 = arith.constant 0 : i32
    return %c0_i32, %c0_i32_0 : i32, i32
  }
  func.func @transform_10(%arg0: i32) -> (i32, i32) {
    %c0_i32 = arith.constant 0 : i32
    %c0_i32_0 = arith.constant 0 : i32
    %c0_i32_1 = arith.constant 0 : i32
    return %c0_i32, %c0_i32_0 : i32, i32
  }
  func.func @transform_11(%arg0: i32) -> (i32, i32) {
    %c0_i32 = arith.constant 0 : i32
    %c0_i32_0 = arith.constant 0 : i32
    %c0_i32_1 = arith.constant 0 : i32
    return %c0_i32, %c0_i32_0 : i32, i32
  }
  func.func @transform_12(%arg0: i32) -> (i32, i32) {
    %c0_i32 = arith.constant 0 : i32
    %c0_i32_0 = arith.constant 0 : i32
    %c0_i32_1 = arith.constant 0 : i32
    return %c0_i32, %c0_i32_0 : i32, i32
  }
  func.func @transform_13(%arg0: i32) -> (i32, i32) {
    %c0_i32 = arith.constant 0 : i32
    %c0_i32_0 = arith.constant 0 : i32
    %c0_i32_1 = arith.constant 0 : i32
    return %c0_i32, %c0_i32_0 : i32, i32
  }
  func.func @transform_14(%arg0: i32) -> (i32, i32) {
    %c0_i32 = arith.constant 0 : i32
    %c0_i32_0 = arith.constant 0 : i32
    %c0_i32_1 = arith.constant 0 : i32
    return %c0_i32, %c0_i32_0 : i32, i32
  }
  func.func @transform_15(%arg0: i32) -> (i32, i32) {
    %c0_i32 = arith.constant 0 : i32
    %c0_i32_0 = arith.constant 0 : i32
    %c0_i32_1 = arith.constant 0 : i32
    return %c0_i32, %c0_i32_0 : i32, i32
  }
  func.func @transform_16(%arg0: i32) -> (i32, i32) {
    %c0_i32 = arith.constant 0 : i32
    %c0_i32_0 = arith.constant 0 : i32
    %c0_i32_1 = arith.constant 0 : i32
    return %c0_i32, %c0_i32_0 : i32, i32
  }
  func.func @transform_17(%arg0: i32) -> (i32, i32) {
    %c0_i32 = arith.constant 0 : i32
    %c0_i32_0 = arith.constant 0 : i32
    return %arg0, %c0_i32 : i32, i32
  }
}

</mosaic_0001>

<bundles_post_ra>
// kernel: encoder_wrapper_forward.1
= control target key start
LH: loop header
LB: loop body
LE: loop exit
PB: predicated region body
PF: predicated region fallthrough
CT: control target
= control target key end

     0   :  { %v7034_v0 = vmov 0.0   ;;  %vm5091_vm0 = vmmov 0   ;;  %vm575_vm1 = vcmask 1041408   ;;  %vm427_vm2 = vcmask 293888   ;;  %s5092_s30 = smov 32   ;;  %s5093_s20 = smov 64   ;;  %s7014_s2 = inlined_call_operand.vmem [shape: bf16[36,32], index: 2, kind: input, shape index: {}]   ;;  %s7015_s0 = inlined_call_operand.vmem [shape: bf16[1,784,36], index: 0, kind: input, shape index: {}]   ;;  %s7016_s3 = inlined_call_operand.vmem [shape: f32[1,32], index: 3, kind: input, shape index: {}]   ;;  %s7017_s4 = inlined_call_operand.vmem [shape: bf16[288,32], index: 4, kind: input, shape index: {}]   ;;  %s7018_s5 = inlined_call_operand.vmem [shape: f32[1,32], index: 5, kind: input, shape index: {}]   ;;  %s7019_s6 = inlined_call_operand.vmem [shape: bf16[800,32], index: 6, kind: input, shape index: {}]   ;;  %s7020_s7 = inlined_call_operand.vmem [shape: f32[1,32], index: 7, kind: input, shape index: {}]   ;;  %s7021_s11 = inlined_call_operand.vmem [shape: bf16[4,32], index: 11, kind: input, shape index: {}]   ;;  %s7022_s1 = inlined_call_operand.vmem [shape: bf16[16,4], index: 1, kind: input, shape index: {}]   ;;  %s7023_s10 = inlined_call_operand.vmem [shape: bf16[32,32], index: 10, kind: input, shape index: {}]   ;;  %s7024_s8 = inlined_call_operand.vmem [shape: f32[1,32], index: 8, kind: input, shape index: {}]   ;;  %s7025_s9 = inlined_call_operand.vmem [shape: f32[1,32], index: 9, kind: input, shape index: {}]   ;;  %s7026_s13 = inlined_call_operand.vmem [shape: bf16[32,32], index: 13, kind: input, shape index: {}]   ;;  %s7027_s12 = inlined_call_operand.vmem [shape: f32[1,32], index: 12, kind: input, shape index: {}]   ;;  %s7028_s15 = inlined_call_operand.vmem [shape: bf16[32,128], index: 15, kind: input, shape index: {}]   ;;  %s7029_s14 = inlined_call_operand.vmem [shape: f32[1,32], index: 14, kind: input, shape index: {}]   ;;  %s7030_s16 = inlined_call_operand.vmem [shape: f32[1,128], index: 16, kind: input, shape index: {}]   ;;  %s7031_s17 = inlined_call_operand.vmem [shape: f32[16,128], index: 17, kind: output, shape index: {}]  }
   0x1   :  { %7048 = sst [smem:[#allocation16_spill]] %s7014_s2  ;;  %4320 = vmatprep.subr.bf16.mxu0 %v7034_v0  ;;  %4326 = vmatprep.mubr.msk.bf16.mxu0 %vm5091_vm0, %v7034_v0  ;;  %v5364_v32 = vld [vmem:[%s7016_s3] ss:$0 sm:$0xff]  ;;  %vm1151_vm3 = vcmask 261120   ;;  %s5095_s27 = smov 96   ;;  %vm1650_vm4 = vcmask 523264  }
   0x2   :  { %7049 = sst [smem:[#allocation17_spill]] %s7015_s0  ;;  %s7050_s26 = sld [smem:[#allocation16_spill]]  ;;  %vm1717_vm5 = vcmask 785408   ;;  %vm3672_vm6 = vcmask 31744  }
   0x3   :  { %s7051_s19 = sld [smem:[#allocation17_spill]] }
   0x8   :  { %v4924_v1 = vld [vmem:[%s7050_s26] sm:$0xff]   ;;  %v4925_v2 = vld [vmem:[%s7050_s26 + $0x8] sm:$0xff]   ;;  %v4926_v3 = vld [vmem:[%s7050_s26 + $0x10] ss:$0 sps:$4 sm:$0x33]  }
   0x9   :  { %4321 = vmatpush3.bf16.msra.mxu0 %v4924_v1  ;;  %v577_v4 = vsel %vm575_vm1, %v4926_v3, 0  ;;  %v4927_v5 = vld [vmem:[%s7051_s19] sm:$0xff]   ;;  %v4928_v6 = vld [vmem:[%s7051_s19 + $0x8] sm:$0xff]   ;;  %v4929_v7 = vld [vmem:[%s7051_s19 + $0x10] sm:$0xff]  }
   0xa   :  { %4322 = vmatprep.subr.bf16.mxu0 %v7034_v0  ;;  %v4930_v8 = vld [vmem:[%s7051_s19 + $0x18] sm:$0xff]   ;;  %v4931_v9 = vld [vmem:[%s7051_s19 + $0x20] sm:$0xff]   ;;  %v4932_v10 = vld [vmem:[%s7051_s19 + $0x28] sm:$0xff]  }
   0xb   :  { %v4933_v11 = vld [vmem:[%s7051_s19 + $0x30] sm:$0xff]   ;;  %v4934_v12 = vld [vmem:[%s7051_s19 + $0x38] sm:$0xff]   ;;  %v4935_v13 = vld [vmem:[%s7051_s19 + $0x40] sm:$0xff]  }
   0xc   :  { %v4936_v14 = vld [vmem:[%s7051_s19 + $0x48] sm:$0xff]   ;;  %v4937_v15 = vld [vmem:[%s7051_s19 + $0x50] sm:$0xff]   ;;  %v4938_v16 = vld [vmem:[%s7051_s19 + $0x58] sm:$0xff]  }
   0xd   :  { %4323 = vmatpush3.bf16.msra.mxu0 %v4925_v2  ;;  %v4939_v17 = vld [vmem:[%s7051_s19 + $0x60] sm:$0xff]   ;;  %v4940_v18 = vld [vmem:[%s7051_s19 + $0x68] sm:$0xff]   ;;  %v4941_v19 = vld [vmem:[%s7051_s19 + $0x70] sm:$0xff]  }
   0xe   :  { %4324 = vmatprep.subr.bf16.mxu0 %v7034_v0  ;;  %v4942_v20 = vld [vmem:[%s7051_s19 + $0x78] sm:$0xff]   ;;  %v4943_v21 = vld [vmem:[%s7051_s19 + $0x80] sm:$0xff]   ;;  %v4944_v22 = vld [vmem:[%s7051_s19 + $0x88] sm:$0xff]  }
   0xf   :  { %v4945_v23 = vld [vmem:[%s7051_s19 + $0x90] sm:$0xff]   ;;  %v4946_v24 = vld [vmem:[%s7051_s19 + $0x98] sm:$0xff]   ;;  %v4947_v25 = vld [vmem:[%s7051_s19 + $0xa0] sm:$0xff]  }
  0x10   :  { %v4948_v26 = vld [vmem:[%s7051_s19 + $0xa8] sm:$0xff]   ;;  %v4949_v27 = vld [vmem:[%s7051_s19 + $0xb0] sm:$0xff]   ;;  %v4950_v28 = vld [vmem:[%s7051_s19 + $0xb8] sm:$0xff]  }
  0x11   :  { %4325 = vmatpush3.bf16.msra.mxu0 %v577_v4  ;;  %v4951_v29 = vld [vmem:[%s7051_s19 + $0xc0] sm:$0xff]   ;;  %v4952_v30 = vld [vmem:[%s7051_s19 + $0xc8] sm:$0xff]   ;;  %v4953_v31 = vld [vmem:[%s7051_s19 + $0xd0] sm:$0xff]  }
  0x12   :  { %v4954_v36 = vld [vmem:[%s7051_s19 + $0xd8] sm:$0xff]   ;;  %v4955_v46 = vld [vmem:[%s7051_s19 + $0xe0] sm:$0xff]   ;;  %v4956_v56 = vld [vmem:[%s7051_s19 + $0xe8] sm:$0xff]  }
  0x13   :  { %v4957_v3 = vld [vmem:[%s7051_s19 + $0xf0] sm:$0xff]  }
  0x14   :  { %4327 = vmatmul.mubr.msk.bf16.vlgmr.msra.gmra.mrb[0].mxu0 %vm427_vm2, %v4927_v5 }
  0x15   :  { %4330 = vmatprep.mubr.msk.bf16.mxu0 %vm5091_vm0, %v7034_v0 }
  0x1c   :  { %4331 = vmatmul.mubr.msk.bf16.gmra.mrb[4].mxu0 %vm427_vm2, %v4928_v6 }
  0x1d   :  { %4334 = vmatprep.mubr.msk.bf16.mxu0 %vm5091_vm0, %v7034_v0 }
  0x24   :  { %4335 = vmatmul.mubr.msk.bf16.gmra.mrb[8].mxu0 %vm427_vm2, %v4929_v7 }
  0x25   :  { %4338 = vmatprep.mubr.msk.bf16.mxu0 %vm5091_vm0, %v7034_v0 }
  0x2c   :  { %4339 = vmatmul.mubr.msk.bf16.gmra.mrb[12].mxu0 %vm427_vm2, %v4930_v8 }
  0x2d   :  { %4342 = vmatprep.mubr.msk.bf16.mxu0 %vm5091_vm0, %v7034_v0 }
  0x34   :  { %4343 = vmatmul.mubr.msk.bf16.gmra.mrb[16].mxu0 %vm427_vm2, %v4931_v9 }
  0x35   :  { %4346 = vmatprep.mubr.msk.bf16.mxu0 %vm5091_vm0, %v7034_v0 }
  0x3c   :  { %4347 = vmatmul.mubr.msk.bf16.gmra.mrb[20].mxu0 %vm427_vm2, %v4932_v10 }
  0x3d   :  { %4350 = vmatprep.mubr.msk.bf16.mxu0 %vm5091_vm0, %v7034_v0 }
  0x44   :  { %4351 = vmatmul.mubr.msk.bf16.gmra.mrb[24].mxu0 %vm427_vm2, %v4933_v11 }
  0x45   :  { %4354 = vmatprep.mubr.msk.bf16.mxu0 %vm5091_vm0, %v7034_v0 }
  0x4c   :  { %4355 = vmatmul.mubr.msk.bf16.gmra.mrb[28].mxu0 %vm427_vm2, %v4934_v12 }
  0x4d   :  { %4358 = vmatprep.mubr.msk.bf16.mxu0 %vm5091_vm0, %v7034_v0 }
  0x54   :  { %4359 = vmatmul.mubr.msk.bf16.gmra.mrb[32].mxu0 %vm427_vm2, %v4935_v13  ;;  %v4958_v13 = vld [vmem:[%s7051_s19 + $0xf8] sm:$0xff]  }
  0x55   :  { %4362 = vmatprep.mubr.msk.bf16.mxu0 %vm5091_vm0, %v7034_v0 }
  0x5c   :  { %4363 = vmatmul.mubr.msk.bf16.gmra.mrb[36].mxu0 %vm427_vm2, %v4936_v14 }
  0x5d   :  { %4366 = vmatprep.mubr.msk.bf16.mxu0 %vm5091_vm0, %v7034_v0 }
  0x64   :  { %4367 = vmatmul.mubr.msk.bf16.gmra.mrb[40].mxu0 %vm427_vm2, %v4937_v15 }
  0x65   :  { %4370 = vmatprep.mubr.msk.bf16.mxu0 %vm5091_vm0, %v7034_v0 }
  0x6c   :  { %4371 = vmatmul.mubr.msk.bf16.gmra.mrb[44].mxu0 %vm427_vm2, %v4938_v16 }
  0x6d   :  { %4374 = vmatprep.mubr.msk.bf16.mxu0 %vm5091_vm0, %v7034_v0 }
  0x74   :  { %4375 = vmatmul.mubr.msk.bf16.gmra.mrb[48].mxu0 %vm427_vm2, %v4939_v17 }
  0x75   :  { %4378 = vmatprep.mubr.msk.bf16.mxu0 %vm5091_vm0, %v7034_v0 }
  0x7c   :  { %4379 = vmatmul.mubr.msk.bf16.gmra.mrb[52].mxu0 %vm427_vm2, %v4940_v18 }
  0x7d   :  { %4382 = vmatprep.mubr.msk.bf16.mxu0 %vm5091_vm0, %v7034_v0 }
  0x84   :  { %4383 = vmatmul.mubr.msk.bf16.gmra.mrb[56].mxu0 %vm427_vm2, %v4941_v19 }
  0x85   :  { %4386 = vmatprep.mubr.msk.bf16.mxu0 %vm5091_vm0, %v7034_v0 }
  0x8c   :  { %4387 = vmatmul.mubr.msk.bf16.gmra.mrb[60].mxu0 %vm427_vm2, %v4942_v20 }
  0x8d   :  { %4390 = vmatprep.mubr.msk.bf16.mxu0 %vm5091_vm0, %v7034_v0 }
  0x94   :  { %4391 = vmatmul.mubr.msk.bf16.gmra.mrb[64].mxu0 %vm427_vm2, %v4943_v21 }
  0x95   :  { %4394 = vmatprep.mubr.msk.bf16.mxu0 %vm5091_vm0, %v7034_v0 }
  0x9c   :  { %4395 = vmatmul.mubr.msk.bf16.gmra.mrb[68].mxu0 %vm427_vm2, %v4944_v22 }
  0x9d   :  { %4398 = vmatprep.mubr.msk.bf16.mxu0 %vm5091_vm0, %v7034_v0 }
  0xa4   :  { %4399 = vmatmul.mubr.msk.bf16.gmra.mrb[72].mxu0 %vm427_vm2, %v4945_v23  ;;  %v4959_v23 = vld [vmem:[%s7051_s19 + $0x100] sm:$0xff]  }
  0xa5   :  { %4402 = vmatprep.mubr.msk.bf16.mxu0 %vm5091_vm0, %v7034_v0 }
  0xac   :  { %4403 = vmatmul.mubr.msk.bf16.gmra.mrb[76].mxu0 %vm427_vm2, %v4946_v24 }
  0xad   :  { %4406 = vmatprep.mubr.msk.bf16.mxu0 %vm5091_vm0, %v7034_v0 }
  0xb4   :  { %4407 = vmatmul.mubr.msk.bf16.gmra.mrb[80].mxu0 %vm427_vm2, %v4947_v25 }
  0xb5   :  { %4410 = vmatprep.mubr.msk.bf16.mxu0 %vm5091_vm0, %v7034_v0 }
  0xbc   :  { %4411 = vmatmul.mubr.msk.bf16.gmra.mrb[84].mxu0 %vm427_vm2, %v4948_v26 }
  0xbd   :  { %4414 = vmatprep.mubr.msk.bf16.mxu0 %vm5091_vm0, %v7034_v0 }
  0xc4   :  { %4415 = vmatmul.mubr.msk.bf16.gmra.mrb[88].mxu0 %vm427_vm2, %v4949_v27 }
  0xc5   :  { %4418 = vmatprep.mubr.msk.bf16.mxu0 %vm5091_vm0, %v7034_v0 }
  0xcc   :  { %4419 = vmatmul.mubr.msk.bf16.gmra.mrb[92].mxu0 %vm427_vm2, %v4950_v28 }
  0xcd   :  { %4422 = vmatprep.mubr.msk.bf16.mxu0 %vm5091_vm0, %v7034_v0 }
  0xd4   :  { %4423 = vmatmul.mubr.msk.bf16.gmra.mrb[96].mxu0 %vm427_vm2, %v4951_v29 }
  0xd5   :  { %4426 = vmatprep.mubr.msk.bf16.mxu0 %vm5091_vm0, %v7034_v0 }
  0xdc   :  { %4427 = vmatmul.mubr.msk.bf16.gmra.mrb[100].mxu0 %vm427_vm2, %v4952_v30 }
  0xdd   :  { %4430 = vmatprep.mubr.msk.bf16.mxu0 %vm5091_vm0, %v7034_v0 }
  0xe4   :  { %4431 = vmatmul.mubr.msk.bf16.gmra.mrb[104].mxu0 %vm427_vm2, %v4953_v31 }
  0xe5   :  { %4434 = vmatprep.mubr.msk.bf16.mxu0 %vm5091_vm0, %v7034_v0 }
  0xe7   :  { %v613_v33 = vpop.f32.mrb[0].mxu0 }
  0xe8   :  { %v614_v34 = vadd.f32 %v5364_v32, %v613_v33  ;;  %v4328_v35 = vpop.f32.mrb[1].mxu0 }
  0xe9   :  { %v616_v37 = vpop.f32.mrb[2].mxu0 }
  0xea   :  { %v617_v38 = vadd.f32 %v5364_v32, %v616_v37  ;;  %v4329_v39 = vpop.f32.mrb[3].mxu0  ;;  %v1004_v40 = vmax.f32 %v614_v34, 0.0  ;;  %v4960_v34 = vld [vmem:[%s7051_s19 + $0x108] sm:$0xff]  }
  0xec   :  { %v1005_v41 = vmax.f32 %v617_v38, 0.0  ;;  %4435 = vmatmul.mubr.msk.bf16.gmra.mrb[108].mxu0 %vm427_vm2, %v4954_v36 }
  0xed   :  { %4438 = vmatprep.mubr.msk.bf16.mxu0 %vm5091_vm0, %v7034_v0 }
  0xee   :  { %v1102_v42 = vpack.c.bf16 %v1005_v41, %v1004_v40 }
  0xef   :  { %v621_v43 = vpop.f32.mrb[4].mxu0 }
  0xf0   :  { %1152 = vst.msk [vmem:[#allocation2] sm:$0xff] %vm1151_vm3, %v1102_v42  ;;  %v622_v44 = vadd.f32 %v5364_v32, %v621_v43  ;;  %v4332_v45 = vpop.f32.mrb[5].mxu0 }
  0xf1   :  { %v624_v47 = vpop.f32.mrb[6].mxu0  ;;  %v4961_v45 = vld [vmem:[%s7051_s19 + $0x110] sm:$0xff]  }
  0xf2   :  { %v625_v48 = vadd.f32 %v5364_v32, %v624_v47  ;;  %v4333_v49 = vpop.f32.mrb[7].mxu0  ;;  %v1006_v50 = vmax.f32 %v622_v44, 0.0 }
  0xf4   :  { %v1007_v51 = vmax.f32 %v625_v48, 0.0  ;;  %4439 = vmatmul.mubr.msk.bf16.gmra.mrb[112].mxu0 %vm427_vm2, %v4955_v46 }
  0xf5   :  { %4442 = vmatprep.mubr.msk.bf16.mxu0 %vm5091_vm0, %v7034_v0 }
  0xf6   :  { %v1103_v52 = vpack.c.bf16 %v1007_v51, %v1006_v50 }
  0xf7   :  { %v629_v53 = vpop.f32.mrb[8].mxu0 }
  0xf8   :  { %1153 = vst.msk [vmem:[#allocation2 + $0x8] sm:$0xff] %vm1151_vm3, %v1103_v52  ;;  %v630_v54 = vadd.f32 %v5364_v32, %v629_v53  ;;  %v4336_v55 = vpop.f32.mrb[9].mxu0 }
  0xf9   :  { %v632_v57 = vpop.f32.mrb[10].mxu0 }
  0xfa   :  { %v633_v58 = vadd.f32 %v5364_v32, %v632_v57  ;;  %v4337_v59 = vpop.f32.mrb[11].mxu0  ;;  %v1008_v60 = vmax.f32 %v630_v54, 0.0 }
  0xfc   :  { %v1009_v61 = vmax.f32 %v633_v58, 0.0  ;;  %4443 = vmatmul.mubr.msk.bf16.gmra.mrb[116].mxu0 %vm427_vm2, %v4956_v56  ;;  %v4962_v56 = vld [vmem:[%s7051_s19 + $0x118] sm:$0xff]  }
  0xfd   :  { %4446 = vmatprep.mubr.msk.bf16.mxu0 %vm5091_vm0, %v7034_v0 }
  0xfe   :  { %v1104_v62 = vpack.c.bf16 %v1009_v61, %v1008_v60 }
  0xff   :  { %v637_v63 = vpop.f32.mrb[12].mxu0 }
 0x100   :  { %1154 = vst.msk [vmem:[#allocation2 + $0x10] sm:$0xff] %vm1151_vm3, %v1104_v62  ;;  %v638_v1 = vadd.f32 %v5364_v32, %v637_v63  ;;  %v4340_v2 = vpop.f32.mrb[13].mxu0 }
 0x101   :  { %v640_v4 = vpop.f32.mrb[14].mxu0 }
 0x102   :  { %v641_v5 = vadd.f32 %v5364_v32, %v640_v4  ;;  %v4341_v6 = vpop.f32.mrb[15].mxu0  ;;  %v1010_v7 = vmax.f32 %v638_v1, 0.0  ;;  %v4963_v4 = vld [vmem:[%s7051_s19 + $0x120] sm:$0xff]  }
 0x104   :  { %v1011_v8 = vmax.f32 %v641_v5, 0.0  ;;  %4447 = vmatmul.mubr.msk.bf16.gmra.mrb[120].mxu0 %vm427_vm2, %v4957_v3 }
 0x105   :  { %4450 = vmatprep.mubr.msk.bf16.mxu0 %vm5091_vm0, %v7034_v0 }
 0x106   :  { %v1105_v9 = vpack.c.bf16 %v1011_v8, %v1010_v7 }
 0x107   :  { %v645_v10 = vpop.f32.mrb[16].mxu0 }
 0x108   :  { %1155 = vst.msk [vmem:[#allocation2 + $0x18] sm:$0xff] %vm1151_vm3, %v1105_v9  ;;  %v646_v11 = vadd.f32 %v5364_v32, %v645_v10  ;;  %v4344_v12 = vpop.f32.mrb[17].mxu0 }
 0x109   :  { %v648_v14 = vpop.f32.mrb[18].mxu0 }
 0x10a   :  { %v649_v15 = vadd.f32 %v5364_v32, %v648_v14  ;;  %v4345_v16 = vpop.f32.mrb[19].mxu0  ;;  %v1012_v17 = vmax.f32 %v646_v11, 0.0 }
 0x10c   :  { %v1013_v18 = vmax.f32 %v649_v15, 0.0  ;;  %4451 = vmatmul.mubr.msk.bf16.gmra.mrb[124].mxu0 %vm427_vm2, %v4958_v13  ;;  %v4964_v15 = vld [vmem:[%s7051_s19 + $0x128] sm:$0xff]  }
 0x10d   :  { %4454 = vmatprep.mubr.msk.bf16.mxu0 %vm5091_vm0, %v7034_v0 }
 0x10e   :  { %v1106_v19 = vpack.c.bf16 %v1013_v18, %v1012_v17 }
 0x10f   :  { %v653_v20 = vpop.f32.mrb[20].mxu0 }
 0x110   :  { %1156 = vst.msk [vmem:[#allocation2 + $0x20] sm:$0xff] %vm1151_vm3, %v1106_v19  ;;  %v654_v21 = vadd.f32 %v5364_v32, %v653_v20  ;;  %v4348_v22 = vpop.f32.mrb[21].mxu0 }
 0x111   :  { %v656_v24 = vpop.f32.mrb[22].mxu0 }
 0x112   :  { %v657_v25 = vadd.f32 %v5364_v32, %v656_v24  ;;  %v4349_v26 = vpop.f32.mrb[23].mxu0  ;;  %v1014_v27 = vmax.f32 %v654_v21, 0.0 }
 0x114   :  { %v1015_v28 = vmax.f32 %v657_v25, 0.0  ;;  %4455 = vmatmul.mubr.msk.bf16.gmra.mrb[128].mxu0 %vm427_vm2, %v4959_v23  ;;  %v4965_v25 = vld [vmem:[%s7051_s19 + $0x130] sm:$0xff]  }
 0x115   :  { %4458 = vmatprep.mubr.msk.bf16.mxu0 %vm5091_vm0, %v7034_v0 }
 0x116   :  { %v1107_v29 = vpack.c.bf16 %v1015_v28, %v1014_v27 }
 0x117   :  { %v661_v30 = vpop.f32.mrb[24].mxu0 }
 0x118   :  { %1157 = vst.msk [vmem:[#allocation2 + $0x28] sm:$0xff] %vm1151_vm3, %v1107_v29  ;;  %v662_v31 = vadd.f32 %v5364_v32, %v661_v30  ;;  %v4352_v33 = vpop.f32.mrb[25].mxu0 }
 0x119   :  { %v664_v35 = vpop.f32.mrb[26].mxu0  ;;  %v4975_v33 = vld [vmem:[%s7017_s4] sm:$0xff]  }
 0x11a   :  { %v665_v36 = vadd.f32 %v5364_v32, %v664_v35  ;;  %v4353_v37 = vpop.f32.mrb[27].mxu0  ;;  %v1016_v38 = vmax.f32 %v662_v31, 0.0  ;;  %v5094_v31 = vmov 0  }
 0x11b   :  { %4696 = vmatprep.subr.bf16.mxu1 %v5094_v31  ;;  %2185 = vmatprep.subr.bf16.mxu0 %v5094_v31 }
 0x11c   :  { %v1017_v39 = vmax.f32 %v665_v36, 0.0  ;;  %4459 = vmatmul.mubr.msk.bf16.gmra.mrb[132].mxu0 %vm427_vm2, %v4960_v34  ;;  %v4966_v36 = vld [vmem:[%s7051_s19 + $0x138] sm:$0xff]   ;;  %4712 = vmatpush1.bf16.msra.mxu1 %v4975_v33 }
 0x11d   :  { %4462 = vmatprep.mubr.msk.bf16.mxu0 %vm5091_vm0, %v7034_v0  ;;  %2186 = vmatpush1.bf16.msra.mxu0 %v4975_v33 }
 0x11e   :  { %v1108_v40 = vpack.c.bf16 %v1017_v39, %v1016_v38  ;;  %4697 = vmatprep.subr.bf16.mxu1 %v5094_v31  ;;  %v4976_v39 = vld [vmem:[%s7017_s4 + $0x8] sm:$0xff]   ;;  %2187 = vmatprep.subr.bf16.mxu0 %v5094_v31 }
 0x11f   :  { %v669_v41 = vpop.f32.mrb[28].mxu0  ;;  %v1206_v42 = vld [vmem:[#allocation2 + $0x28] sm:$0xff] }
 0x120   :  { %1158 = vst.msk [vmem:[#allocation2 + $0x30] sm:$0xff] %vm1151_vm3, %v1108_v40  ;;  %v670_v43 = vadd.f32 %v5364_v32, %v669_v41  ;;  %1291 = vrot.lane.b32.xlu0 %v1206_v42, %s5092_s30  ;;  %v4356_v44 = vpop.f32.mrb[29].mxu0  ;;  %4713 = vmatpush1.bf16.msra.mxu1 %v4976_v39 }
 0x121   :  { %v672_v46 = vpop.f32.mrb[30].mxu0  ;;  %2188 = vmatpush1.bf16.msra.mxu0 %v4976_v39  ;;  %4698 = vmatprep.subr.bf16.mxu1 %v5094_v31 }
 0x122   :  { %v673_v47 = vadd.f32 %v5364_v32, %v672_v46  ;;  %v4357_v48 = vpop.f32.mrb[31].mxu0  ;;  %v1018_v49 = vmax.f32 %v670_v43, 0.0  ;;  %2189 = vmatprep.subr.bf16.mxu0 %v5094_v31 }
 0x124   :  { %v1019_v50 = vmax.f32 %v673_v47, 0.0  ;;  %4463 = vmatmul.mubr.msk.bf16.gmra.mrb[136].mxu0 %vm427_vm2, %v4961_v45  ;;  %v4977_v45 = vld [vmem:[%s7017_s4 + $0x10] sm:$0xff]   ;;  %v4967_v47 = vld [vmem:[%s7051_s19 + $0x140] sm:$0xff]  }
 0x125   :  { %4466 = vmatprep.mubr.msk.bf16.mxu0 %vm5091_vm0, %v7034_v0  ;;  %4714 = vmatpush1.bf16.msra.mxu1 %v4977_v45 }
 0x126   :  { %v1109_v51 = vpack.c.bf16 %v1019_v50, %v1018_v49  ;;  %2190 = vmatpush1.bf16.msra.mxu0 %v4977_v45  ;;  %4699 = vmatprep.subr.bf16.mxu1 %v5094_v31 }
 0x127   :  { %v677_v52 = vpop.f32.mrb[32].mxu0  ;;  %v1207_v53 = vld [vmem:[#allocation2 + $0x30] sm:$0xff]  ;;  %2191 = vmatprep.subr.bf16.mxu0 %v5094_v31 }
 0x128   :  { %1159 = vst.msk [vmem:[#allocation2 + $0x38] sm:$0xff] %vm1151_vm3, %v1109_v51  ;;  %v678_v54 = vadd.f32 %v5364_v32, %v677_v52  ;;  %1358 = vrot.lane.b32.xlu1 %v1207_v53, %s5093_s20  ;;  %v4360_v55 = vpop.f32.mrb[33].mxu0  ;;  %v4978_v52 = vld [vmem:[%s7017_s4 + $0x18] sm:$0xff]  }
 0x129   :  { %v680_v57 = vpop.f32.mrb[34].mxu0  ;;  %4715 = vmatpush1.bf16.msra.mxu1 %v4978_v52 }
 0x12a   :  { %v681_v58 = vadd.f32 %v5364_v32, %v680_v57  ;;  %v4361_v59 = vpop.f32.mrb[35].mxu0  ;;  %v1020_v60 = vmax.f32 %v678_v54, 0.0  ;;  %2192 = vmatpush1.bf16.msra.mxu0 %v4978_v52  ;;  %4700 = vmatprep.subr.bf16.mxu1 %v5094_v31 }
 0x12b   :  { %2193 = vmatprep.subr.bf16.mxu0 %v5094_v31 }
 0x12c   :  { %v1021_v61 = vmax.f32 %v681_v58, 0.0  ;;  %4467 = vmatmul.mubr.msk.bf16.gmra.mrb[140].mxu0 %vm427_vm2, %v4962_v56  ;;  %1293 = vrot.lane.b32.xlu1 %v1207_v53, %s5092_s30  ;;  %v4979_v58 = vld [vmem:[%s7017_s4 + $0x20] sm:$0xff]  }
 0x12d   :  { %4470 = vmatprep.mubr.msk.bf16.mxu0 %vm5091_vm0, %v7034_v0  ;;  %4716 = vmatpush1.bf16.msra.mxu1 %v4979_v58 }
 0x12e   :  { %v1110_v62 = vpack.c.bf16 %v1021_v61, %v1020_v60  ;;  %2194 = vmatpush1.bf16.msra.mxu0 %v4979_v58  ;;  %4701 = vmatprep.subr.bf16.mxu1 %v5094_v31  ;;  %v4988_v58 = vld [vmem:[%s7017_s4 + $0x68] sm:$0xff]  }
 0x12f   :  { %v685_v63 = vpop.f32.mrb[36].mxu0  ;;  %v1208_v1 = vld [vmem:[#allocation2 + $0x38] sm:$0xff]  ;;  %2195 = vmatprep.subr.bf16.mxu0 %v5094_v31 }
 0x130   :  { %1160 = vst.msk [vmem:[#allocation2 + $0x40] sm:$0xff] %vm1151_vm3, %v1110_v62  ;;  %v686_v2 = vadd.f32 %v5364_v32, %v685_v63  ;;  %1360 = vrot.lane.b32.xlu1 %v1208_v1, %s5093_s20  ;;  %v4364_v3 = vpop.f32.mrb[37].mxu0 }
 0x131   :  { %v688_v5 = vpop.f32.mrb[38].mxu0 }
 0x132   :  { %v689_v6 = vadd.f32 %v5364_v32, %v688_v5  ;;  %v4365_v7 = vpop.f32.mrb[39].mxu0  ;;  %v1022_v8 = vmax.f32 %v686_v2, 0.0  ;;  %v4980_v2 = vld [vmem:[%s7017_s4 + $0x28] sm:$0xff]  }
 0x133   :  { %4717 = vmatpush1.bf16.msra.mxu1 %v4980_v2  ;;  %2196 = vmatpush1.bf16.msra.mxu0 %v4980_v2  ;;  %v4989_v2 = vld [vmem:[%s7017_s4 + $0x70] sm:$0xff]  }
 0x134   :  { %v1023_v9 = vmax.f32 %v689_v6, 0.0  ;;  %4471 = vmatmul.mubr.msk.bf16.gmra.mrb[144].mxu0 %vm427_vm2, %v4963_v4  ;;  %1295 = vrot.lane.b32.xlu1 %v1208_v1, %s5092_s30  ;;  %v4968_v1 = vld [vmem:[%s7051_s19 + $0x148] sm:$0xff]  }
 0x135   :  { %4474 = vmatprep.mubr.msk.bf16.mxu0 %vm5091_vm0, %v7034_v0  ;;  %4702 = vmatprep.subr.bf16.mxu1 %v5094_v31 }
 0x136   :  { %v1111_v10 = vpack.c.bf16 %v1023_v9, %v1022_v8  ;;  %v4981_v8 = vld [vmem:[%s7017_s4 + $0x30] sm:$0xff]   ;;  %2197 = vmatprep.subr.bf16.mxu0 %v5094_v31 }
 0x137   :  { %v693_v11 = vpop.f32.mrb[40].mxu0  ;;  %v5462_v12 = vld [vmem:[#allocation2 + $0x40] sm:$0xff]  ;;  %4718 = vmatpush1.bf16.msra.mxu1 %v4981_v8  ;;  %2198 = vmatpush1.bf16.msra.mxu0 %v4981_v8  ;;  %v4973_v8 = vld [vmem:[%s7051_s19 + $0x170] sm:$0xff]  }
 0x138   :  { %1161 = vst.msk [vmem:[#allocation2 + $0x48] sm:$0xff] %vm1151_vm3, %v1111_v10  ;;  %v694_v13 = vadd.f32 %v5364_v32, %v693_v11  ;;  %1362 = vrot.lane.b32.xlu1 %v5462_v12, %s5093_s20  ;;  %v4368_v14 = vpop.f32.mrb[41].mxu0  ;;  %4703 = vmatprep.subr.bf16.mxu1 %v5094_v31 }
 0x139   :  { %v696_v16 = vpop.f32.mrb[42].mxu0  ;;  %2199 = vmatprep.subr.bf16.mxu0 %v5094_v31 }
 0x13a   :  { %v697_v17 = vadd.f32 %v5364_v32, %v696_v16  ;;  %v4369_v18 = vpop.f32.mrb[43].mxu0  ;;  %v1024_v19 = vmax.f32 %v694_v13, 0.0  ;;  %v4982_v16 = vld [vmem:[%s7017_s4 + $0x38] sm:$0xff]  }
 0x13b   :  { %4719 = vmatpush1.bf16.msra.mxu1 %v4982_v16  ;;  %2200 = vmatpush1.bf16.msra.mxu0 %v4982_v16 }
 0x13c   :  { %v1025_v20 = vmax.f32 %v697_v17, 0.0  ;;  %4475 = vmatmul.mubr.msk.bf16.gmra.mrb[148].mxu0 %vm427_vm2, %v4964_v15  ;;  %v4969_v15 = vld [vmem:[%s7051_s19 + $0x150] sm:$0xff]   ;;  %4704 = vmatprep.subr.bf16.mxu1 %v5094_v31 }
 0x13d   :  { %4478 = vmatprep.mubr.msk.bf16.mxu0 %vm5091_vm0, %v7034_v0  ;;  %2201 = vmatprep.subr.bf16.mxu0 %v5094_v31 }
 0x13e   :  { %v1112_v21 = vpack.c.bf16 %v1025_v20, %v1024_v19 }
 0x13f   :  { %v701_v22 = vpop.f32.mrb[44].mxu0 }
 0x140   :  { %1162 = vst.msk [vmem:[#allocation2 + $0x50] sm:$0xff] %vm1151_vm3, %v1112_v21  ;;  %v702_v23 = vadd.f32 %v5364_v32, %v701_v22  ;;  %v4372_v24 = vpop.f32.mrb[45].mxu0  ;;  %v4983_v22 = vld [vmem:[%s7017_s4 + $0x40] sm:$0xff]  }
 0x141   :  { %v704_v26 = vpop.f32.mrb[46].mxu0  ;;  %4720 = vmatpush1.bf16.msra.mxu1 %v4983_v22  ;;  %2202 = vmatpush1.bf16.msra.mxu0 %v4983_v22 }
 0x142   :  { %v705_v27 = vadd.f32 %v5364_v32, %v704_v26  ;;  %v4373_v28 = vpop.f32.mrb[47].mxu0  ;;  %v1026_v29 = vmax.f32 %v702_v23, 0.0  ;;  %4705 = vmatprep.subr.bf16.mxu1 %v5094_v31  ;;  %2203 = vmatprep.subr.bf16.mxu0 %v5094_v31 }
 0x143   :  { %v4970_v28 = vld [vmem:[%s7051_s19 + $0x158] sm:$0xff]  }
 0x144   :  { %v1027_v30 = vmax.f32 %v705_v27, 0.0  ;;  %4479 = vmatmul.mubr.msk.bf16.gmra.mrb[152].mxu0 %vm427_vm2, %v4965_v25 }
 0x145   :  { %4482 = vmatprep.mubr.msk.bf16.mxu0 %vm5091_vm0, %v7034_v0 }
 0x146   :  { %v1113_v34 = vpack.c.bf16 %v1027_v30, %v1026_v29  ;;  %v4984_v29 = vld [vmem:[%s7017_s4 + $0x48] sm:$0xff]  }
 0x147   :  { %v709_v35 = vpop.f32.mrb[48].mxu0  ;;  %4721 = vmatpush1.bf16.msra.mxu1 %v4984_v29  ;;  %2204 = vmatpush1.bf16.msra.mxu0 %v4984_v29  ;;  %v5684_v29 = vld [vmem:[#allocation2 + $0x48] sm:$0xff] }
 0x148   :  { %1163 = vst.msk [vmem:[#allocation2 + $0x58] sm:$0xff] %vm1151_vm3, %v1113_v34  ;;  %v710_v37 = vadd.f32 %v5364_v32, %v709_v35  ;;  %v4376_v38 = vpop.f32.mrb[49].mxu0  ;;  %4706 = vmatprep.subr.bf16.mxu1 %v5094_v31  ;;  %2205 = vmatprep.subr.bf16.mxu0 %v5094_v31 }
 0x149   :  { %v712_v40 = vpop.f32.mrb[50].mxu0 }
 0x14a   :  { %v1028_v41 = vmax.f32 %v710_v37, 0.0  ;;  %v713_v42 = vadd.f32 %v5364_v32, %v712_v40  ;;  %v4377_v43 = vpop.f32.mrb[51].mxu0  ;;  %v4985_v37 = vld [vmem:[%s7017_s4 + $0x50] sm:$0xff]  }
 0x14b   :  { %4722 = vmatpush1.bf16.msra.mxu1 %v4985_v37  ;;  %2206 = vmatpush1.bf16.msra.mxu0 %v4985_v37  ;;  %v4971_v43 = vld [vmem:[%s7051_s19 + $0x160] sm:$0xff]  }
 0x14c   :  { %v1029_v44 = vmax.f32 %v713_v42, 0.0  ;;  %4483 = vmatmul.mubr.msk.bf16.gmra.mrb[156].mxu0 %vm427_vm2, %v4966_v36  ;;  %4707 = vmatprep.subr.bf16.mxu1 %v5094_v31 }
 0x14d   :  { %4486 = vmatprep.mubr.msk.bf16.mxu0 %vm5091_vm0, %v7034_v0  ;;  %2207 = vmatprep.subr.bf16.mxu0 %v5094_v31 }
 0x14e   :  { %v1114_v46 = vpack.c.bf16 %v1029_v44, %v1028_v41  ;;  %v4986_v44 = vld [vmem:[%s7017_s4 + $0x58] sm:$0xff]  }
 0x14f   :  { %v717_v48 = vpop.f32.mrb[52].mxu0  ;;  %v5511_v49 = vld [vmem:[#allocation2 + $0x58] sm:$0xff]  ;;  %4723 = vmatpush1.bf16.msra.mxu1 %v4986_v44  ;;  %2208 = vmatpush1.bf16.msra.mxu0 %v4986_v44 }
 0x150   :  { %1164 = vst.msk [vmem:[#allocation2 + $0x60] sm:$0xff] %vm1151_vm3, %v1114_v46  ;;  %v718_v50 = vadd.f32 %v5364_v32, %v717_v48  ;;  %1429 = vrot.lane.b32.xlu1 %v5511_v49, %s5095_s27  ;;  %v4380_v51 = vpop.f32.mrb[53].mxu0  ;;  %4708 = vmatprep.subr.bf16.mxu1 %v5094_v31 }
 0x151   :  { %v720_v53 = vpop.f32.mrb[54].mxu0  ;;  %v4987_v51 = vld [vmem:[%s7017_s4 + $0x60] sm:$0xff]   ;;  %2209 = vmatprep.subr.bf16.mxu0 %v5094_v31 }
 0x152   :  { %v721_v54 = vadd.f32 %v5364_v32, %v720_v53  ;;  %v4381_v55 = vpop.f32.mrb[55].mxu0  ;;  %v1030_v56 = vmax.f32 %v718_v50, 0.0 }
 0x153   :  { %4724 = vmatpush1.bf16.msra.mxu1 %v4987_v51  ;;  %2210 = vmatpush1.bf16.msra.mxu0 %v4987_v51 }
 0x154   :  { %v1031_v57 = vmax.f32 %v721_v54, 0.0  ;;  %4487 = vmatmul.mubr.msk.bf16.gmra.mrb[160].mxu0 %vm427_vm2, %v4967_v47  ;;  %4709 = vmatprep.subr.bf16.mxu1 %v5094_v31 }
 0x155   :  { %4490 = vmatprep.mubr.msk.bf16.mxu0 %vm5091_vm0, %v7034_v0  ;;  %2211 = vmatprep.subr.bf16.mxu0 %v5094_v31 }
 0x156   :  { %v1115_v59 = vpack.c.bf16 %v1031_v57, %v1030_v56  ;;  %v4972_v57 = vld [vmem:[%s7051_s19 + $0x168] sm:$0xff]  }
 0x157   :  { %v725_v60 = vpop.f32.mrb[56].mxu0  ;;  %v5531_v61 = vld [vmem:[#allocation2 + $0x60] sm:$0xff]  ;;  %4725 = vmatpush1.bf16.msra.mxu1 %v4988_v58  ;;  %2212 = vmatpush1.bf16.msra.mxu0 %v4988_v58 }
 0x158   :  { %1165 = vst.msk [vmem:[#allocation2 + $0x68] sm:$0xff] %vm1151_vm3, %v1115_v59  ;;  %v726_v62 = vadd.f32 %v5364_v32, %v725_v60  ;;  %1431 = vrot.lane.b32.xlu1 %v5531_v61, %s5095_s27  ;;  %v4384_v63 = vpop.f32.mrb[57].mxu0  ;;  %4710 = vmatprep.subr.bf16.mxu1 %v5094_v31 }
 0x159   :  { %v728_v3 = vpop.f32.mrb[58].mxu0  ;;  %2213 = vmatprep.subr.bf16.mxu0 %v5094_v31 }
 0x15a   :  { %v729_v4 = vadd.f32 %v5364_v32, %v728_v3  ;;  %v4385_v5 = vpop.f32.mrb[59].mxu0  ;;  %v1032_v6 = vmax.f32 %v726_v62, 0.0 }
 0x15b   :  { %4726 = vmatpush1.bf16.msra.mxu1 %v4989_v2  ;;  %2214 = vmatpush1.bf16.msra.mxu0 %v4989_v2 }
 0x15c   :  { %v1033_v7 = vmax.f32 %v729_v4, 0.0  ;;  %4491 = vmatmul.mubr.msk.bf16.gmra.mrb[164].mxu0 %vm427_vm2, %v4968_v1  ;;  %4711 = vmatprep.subr.bf16.mxu1 %v5094_v31 }
 0x15d   :  { %4494 = vmatprep.mubr.msk.bf16.mxu0 %vm5091_vm0, %v7034_v0  ;;  %2215 = vmatprep.subr.bf16.mxu0 %v5094_v31 }
 0x15e   :  { %v1116_v9 = vpack.c.bf16 %v1033_v7, %v1032_v6 }
 0x15f   :  { %v733_v10 = vpop.f32.mrb[60].mxu0  ;;  %v5554_v11 = vld [vmem:[#allocation2 + $0x68] sm:$0xff] }
 0x160   :  { %1166 = vst.msk [vmem:[#allocation2 + $0x70] sm:$0xff] %vm1151_vm3, %v1116_v9  ;;  %v734_v13 = vadd.f32 %v5364_v32, %v733_v10  ;;  %1433 = vrot.lane.b32.xlu1 %v5554_v11, %s5095_s27  ;;  %1307 = vrot.lane.b32.xlu0 %v5554_v11, %s5092_s30  ;;  %v4388_v14 = vpop.f32.mrb[61].mxu0  ;;  %v4990_v9 = vld [vmem:[%s7017_s4 + $0x78] sm:$0xff]  }
 0x161   :  { %v736_v17 = vpop.f32.mrb[62].mxu0  ;;  %4727 = vmatpush1.bf16.msra.mxu1 %v4990_v9  ;;  %2216 = vmatpush1.bf16.msra.mxu0 %v4990_v9 }
 0x162   :  { %v737_v18 = vadd.f32 %v5364_v32, %v736_v17  ;;  %v4389_v19 = vpop.f32.mrb[63].mxu0  ;;  %v1034_v20 = vmax.f32 %v734_v13, 0.0  ;;  %4522 = vmatprep.subr.bf16.mxu1 %v7034_v0 }
 0x164   :  { %v1035_v21 = vmax.f32 %v737_v18, 0.0  ;;  %4495 = vmatmul.mubr.msk.bf16.gmra.mrb[168].mxu0 %vm427_vm2, %v4969_v15 }
 0x165   :  { %4498 = vmatprep.mubr.msk.bf16.mxu0 %vm5091_vm0, %v7034_v0 }
 0x166   :  { %v1117_v23 = vpack.c.bf16 %v1035_v21, %v1034_v20  ;;  %v4974_v21 = vld [vmem:[%s7051_s19 + $0x178] sm:$0xff]  }
 0x167   :  { %v741_v24 = vpop.f32.mrb[64].mxu0  ;;  %v5579_v25 = vld [vmem:[#allocation2 + $0x70] sm:$0xff] }
 0x168   :  { %1167 = vst.msk [vmem:[#allocation2 + $0x78] sm:$0xff] %vm1151_vm3, %v1117_v23  ;;  %v742_v26 = vadd.f32 %v5364_v32, %v741_v24  ;;  %1309 = vrot.lane.b32.xlu0 %v5579_v25, %s5092_s30  ;;  %v4392_v27 = vpop.f32.mrb[65].mxu0 }
 0x169   :  { %v744_v30 = vpop.f32.mrb[66].mxu0 }
 0x16a   :  { %v745_v33 = vadd.f32 %v5364_v32, %v744_v30  ;;  %v4393_v34 = vpop.f32.mrb[67].mxu0  ;;  %v1036_v35 = vmax.f32 %v742_v26, 0.0 }
 0x16c   :  { %v1037_v36 = vmax.f32 %v745_v33, 0.0  ;;  %4499 = vmatmul.mubr.msk.bf16.gmra.mrb[172].mxu0 %vm427_vm2, %v4970_v28 }
 0x16d   :  { %4502 = vmatprep.mubr.msk.bf16.mxu0 %vm5091_vm0, %v7034_v0 }
 0x16e   :  { %v1118_v38 = vpack.c.bf16 %v1037_v36, %v1036_v35 }
 0x16f   :  { %v749_v39 = vpop.f32.mrb[68].mxu0  ;;  %v5602_v40 = vld [vmem:[#allocation2 + $0x78] sm:$0xff] }
 0x170   :  { %1168 = vst.msk [vmem:[#allocation2 + $0x80] sm:$0xff] %vm1151_vm3, %v1118_v38  ;;  %v750_v41 = vadd.f32 %v5364_v32, %v749_v39  ;;  %1311 = vrot.lane.b32.xlu0 %v5602_v40, %s5092_s30  ;;  %v4396_v42 = vpop.f32.mrb[69].mxu0 }
 0x171   :  { %v752_v45 = vpop.f32.mrb[70].mxu0 }
 0x172   :  { %v753_v46 = vadd.f32 %v5364_v32, %v752_v45  ;;  %v4397_v47 = vpop.f32.mrb[71].mxu0  ;;  %v1038_v48 = vmax.f32 %v750_v41, 0.0 }
 0x174   :  { %v1039_v50 = vmax.f32 %v753_v46, 0.0  ;;  %4503 = vmatmul.mubr.msk.bf16.gmra.mrb[176].mxu0 %vm427_vm2, %v4971_v43 }
 0x175   :  { %4506 = vmatprep.mubr.msk.bf16.mxu0 %vm5091_vm0, %v7034_v0 }
 0x176   :  { %v1119_v52 = vpack.c.bf16 %v1039_v50, %v1038_v48  ;;  %v5706_v50 = vld [vmem:[#allocation2 + $0x50] sm:$0xff] }
 0x177   :  { %v757_v53 = vpop.f32.mrb[72].mxu0  ;;  %v5625_v54 = vld [vmem:[#allocation2 + $0x80] sm:$0xff] }
 0x178   :  { %1169 = vst.msk [vmem:[#allocation2 + $0x88] sm:$0xff] %vm1151_vm3, %v1119_v52  ;;  %v758_v55 = vadd.f32 %v5364_v32, %v757_v53  ;;  %1313 = vrot.lane.b32.xlu0 %v5625_v54, %s5092_s30  ;;  %v4400_v56 = vpop.f32.mrb[73].mxu0 }
 0x179   :  { %v760_v59 = vpop.f32.mrb[74].mxu0 }
 0x17a   :  { %v761_v60 = vadd.f32 %v5364_v32, %v760_v59  ;;  %v4401_v62 = vpop.f32.mrb[75].mxu0  ;;  %v1040_v63 = vmax.f32 %v758_v55, 0.0 }
 0x17c   :  { %v1041_v1 = vmax.f32 %v761_v60, 0.0  ;;  %4507 = vmatmul.mubr.msk.bf16.gmra.mrb[180].mxu0 %vm427_vm2, %v4972_v57 }
 0x17d   :  { %4510 = vmatprep.mubr.msk.bf16.mxu0 %vm5091_vm0, %v7034_v0 }
 0x17e   :  { %v1120_v3 = vpack.c.bf16 %v1041_v1, %v1040_v63 }
 0x17f   :  { %v765_v4 = vpop.f32.mrb[76].mxu0  ;;  %v5648_v5 = vld [vmem:[#allocation2 + $0x88] sm:$0xff] }
 0x180   :  { %1170 = vst.msk [vmem:[#allocation2 + $0x90] sm:$0xff] %vm1151_vm3, %v1120_v3  ;;  %v766_v6 = vadd.f32 %v5364_v32, %v765_v4  ;;  %1315 = vrot.lane.b32.xlu0 %v5648_v5, %s5092_s30  ;;  %v4404_v7 = vpop.f32.mrb[77].mxu0 }
 0x181   :  { %v768_v10 = vpop.f32.mrb[78].mxu0 }
 0x182   :  { %v769_v13 = vadd.f32 %v5364_v32, %v768_v10  ;;  %v4405_v14 = vpop.f32.mrb[79].mxu0  ;;  %v1042_v15 = vmax.f32 %v766_v6, 0.0 }
 0x184   :  { %v1043_v16 = vmax.f32 %v769_v13, 0.0  ;;  %4511 = vmatmul.mubr.msk.bf16.gmra.mrb[184].mxu0 %vm427_vm2, %v4973_v8 }
 0x185   :  { %4514 = vmatprep.mubr.msk.bf16.mxu0 %vm5091_vm0, %v7034_v0 }
 0x186   :  { %v1121_v17 = vpack.c.bf16 %v1043_v16, %v1042_v15 }
 0x187   :  { %v5667_v18 = vld [vmem:[#allocation2 + $0x90] sm:$0xff]  ;;  %v773_v19 = vpop.f32.mrb[80].mxu0 }
 0x188   :  { %1171 = vst.msk [vmem:[#allocation2 + $0x98] sm:$0xff] %vm1151_vm3, %v1121_v17  ;;  %1317 = vrot.lane.b32.xlu0 %v5667_v18, %s5092_s30  ;;  %1382 = vrot.lane.b32.xlu1 %v5667_v18, %s5093_s20  ;;  %v774_v31 = vadd.f32 %v5364_v32, %v773_v19  ;;  %v4408_v20 = vpop.f32.mrb[81].mxu0 }
 0x189   :  { %v776_v22 = vpop.f32.mrb[82].mxu0 }
 0x18a   :  { %v1044_v23 = vmax.f32 %v774_v31, 0.0  ;;  %v777_v24 = vadd.f32 %v5364_v32, %v776_v22  ;;  %v4409_v26 = vpop.f32.mrb[83].mxu0 }
 0x18c   :  { %v1045_v27 = vmax.f32 %v777_v24, 0.0  ;;  %4515 = vmatmul.mubr.msk.bf16.gmra.mrb[188].mxu0 %vm427_vm2, %v4974_v21  ;;  %1297 = vrot.lane.b32.xlu1 %v5462_v12, %s5092_s30 }
 0x18d   :  { %4518 = vmatprep.mubr.msk.bf16.mxu0 %vm5091_vm0, %v7034_v0 }
 0x18e   :  { %v1122_v28 = vpack.c.bf16 %v1045_v27, %v1044_v23 }
 0x18f   :  { %v5686_v30 = vld [vmem:[#allocation2 + $0x98] sm:$0xff]  ;;  %v781_v33 = vpop.f32.mrb[84].mxu0 }
 0x190   :  { %1172 = vst.msk [vmem:[#allocation2 + $0xa0] sm:$0xff] %vm1151_vm3, %v1122_v28  ;;  %1364 = vrot.lane.b32.xlu1 %v5684_v29, %s5093_s20  ;;  %1445 = vrot.lane.b32.xlu0 %v5686_v30, %s5095_s27  ;;  %v782_v34 = vadd.f32 %v5364_v32, %v781_v33  ;;  %v4412_v12 = vpop.f32.mrb[85].mxu0 }
 0x191   :  { %v784_v35 = vpop.f32.mrb[86].mxu0 }
 0x192   :  { %v1046_v36 = vmax.f32 %v782_v34, 0.0  ;;  %v785_v37 = vadd.f32 %v5364_v32, %v784_v35  ;;  %v4413_v38 = vpop.f32.mrb[87].mxu0 }
 0x194   :  { %1435 = vrot.lane.b32.xlu1 %v5579_v25, %s5095_s27  ;;  %1384 = vrot.lane.b32.xlu0 %v5686_v30, %s5093_s20  ;;  %v1047_v39 = vmax.f32 %v785_v37, 0.0 }
 0x196   :  { %v1123_v41 = vpack.c.bf16 %v1047_v39, %v1046_v36 }
 0x197   :  { %v789_v42 = vpop.f32.mrb[88].mxu0  ;;  %v5708_v51 = vld [vmem:[#allocation2 + $0xa0] sm:$0xff] }
 0x198   :  { %1173 = vst.msk [vmem:[#allocation2 + $0xa8] sm:$0xff] %vm1151_vm3, %v1123_v41  ;;  %1299 = vrot.lane.b32.xlu1 %v5684_v29, %s5092_s30  ;;  %1319 = vrot.lane.b32.xlu0 %v5686_v30, %s5092_s30  ;;  %v790_v43 = vadd.f32 %v5364_v32, %v789_v42  ;;  %v4416_v44 = vpop.f32.mrb[89].mxu0  ;;  %v5770_v41 = vld [vmem:[%s7016_s3] ss:$0 sm:$0xff] }
 0x199   :  { %v792_v45 = vpop.f32.mrb[90].mxu0 }
 0x19a   :  { %v1048_v46 = vmax.f32 %v790_v43, 0.0  ;;  %v793_v47 = vadd.f32 %v5364_v32, %v792_v45  ;;  %v4417_v48 = vpop.f32.mrb[91].mxu0 }
 0x19c   :  { %1366 = vrot.lane.b32.xlu1 %v5706_v50, %s5093_s20  ;;  %1447 = vrot.lane.b32.xlu0 %v5708_v51, %s5095_s27  ;;  %v1049_v52 = vmax.f32 %v793_v47, 0.0 }
 0x19e   :  { %v1124_v53 = vpack.c.bf16 %v1049_v52, %v1048_v46 }
 0x19f   :  { %v797_v55 = vpop.f32.mrb[92].mxu0  ;;  %v5725_v2 = vld [vmem:[#allocation2 + $0xa8] sm:$0xff] }
 0x1a0   :  { %1174 = vst.msk [vmem:[#allocation2 + $0xb0] sm:$0xff] %vm1151_vm3, %v1124_v53  ;;  %1437 = vrot.lane.b32.xlu1 %v5602_v40, %s5095_s27  ;;  %1386 = vrot.lane.b32.xlu0 %v5708_v51, %s5093_s20  ;;  %v798_v56 = vadd.f32 %v5364_v32, %v797_v55  ;;  %v4420_v57 = vpop.f32.mrb[93].mxu0 }
 0x1a1   :  { %v800_v58 = vpop.f32.mrb[94].mxu0 }
 0x1a2   :  { %v1050_v59 = vmax.f32 %v798_v56, 0.0  ;;  %v801_v60 = vadd.f32 %v5364_v32, %v800_v58  ;;  %v4421_v62 = vpop.f32.mrb[95].mxu0 }
 0x1a4   :  { %1301 = vrot.lane.b32.xlu1 %v5706_v50, %s5092_s30  ;;  %1321 = vrot.lane.b32.xlu0 %v5708_v51, %s5092_s30  ;;  %v1051_v63 = vmax.f32 %v801_v60, 0.0 }
 0x1a6   :  { %v1125_v1 = vpack.c.bf16 %v1051_v63, %v1050_v59  ;;  %v4992_v63 = vld [vmem:[%s7051_s19 + $0x180] sm:$0xff]  }
 0x1a7   :  { %v805_v3 = vpop.f32.mrb[96].mxu0  ;;  %v5738_v15 = vld [vmem:[#allocation2 + $0xb0] sm:$0xff]  ;;  %4519 = vmatmul.mubr.msk.bf16.gmra.mrb[192].mxu0 %vm427_vm2, %v4992_v63 }
 0x1a8   :  { %1175 = vst.msk [vmem:[#allocation2 + $0xb8] sm:$0xff] %vm1151_vm3, %v1125_v1  ;;  %1368 = vrot.lane.b32.xlu1 %v5511_v49, %s5093_s20  ;;  %1449 = vrot.lane.b32.xlu0 %v5725_v2, %s5095_s27  ;;  %v806_v4 = vadd.f32 %v5364_v32, %v805_v3  ;;  %v4424_v6 = vpop.f32.mrb[97].mxu0 }
 0x1a9   :  { %v808_v7 = vpop.f32.mrb[98].mxu0 }
 0x1aa   :  { %v1052_v8 = vmax.f32 %v806_v4, 0.0  ;;  %v809_v9 = vadd.f32 %v5364_v32, %v808_v7  ;;  %v4425_v10 = vpop.f32.mrb[99].mxu0 }
 0x1ac   :  { %1439 = vrot.lane.b32.xlu1 %v5625_v54, %s5095_s27  ;;  %1388 = vrot.lane.b32.xlu0 %v5725_v2, %s5093_s20  ;;  %v1053_v13 = vmax.f32 %v809_v9, 0.0  ;;  %v5807_v9 = vpop.permute.xlu1 %1358 }
 0x1ae   :  { %v1126_v14 = vpack.c.bf16 %v1053_v13, %v1052_v8 }
 0x1af   :  { %v813_v16 = vpop.f32.mrb[100].mxu0 }
 0x1b0   :  { %1176 = vst.msk [vmem:[#allocation2 + $0xc0] sm:$0xff] %vm1151_vm3, %v1126_v14  ;;  %1303 = vrot.lane.b32.xlu1 %v5511_v49, %s5092_s30  ;;  %1451 = vrot.lane.b32.xlu0 %v5738_v15, %s5095_s27  ;;  %v814_v17 = vadd.f32 %v5364_v32, %v813_v16  ;;  %v4428_v19 = vpop.f32.mrb[101].mxu0  ;;  %v5751_v49 = vld [vmem:[#allocation2 + $0xb8] sm:$0xff] }
 0x1b1   :  { %v816_v31 = vpop.f32.mrb[102].mxu0 }
 0x1b2   :  { %v1054_v20 = vmax.f32 %v814_v17, 0.0  ;;  %v817_v21 = vadd.f32 %v5364_v32, %v816_v31  ;;  %v4429_v22 = vpop.f32.mrb[103].mxu0  ;;  %v5814_v31 = vpop.permute.xlu1 %1293 }
 0x1b4   :  { %1370 = vrot.lane.b32.xlu1 %v5531_v61, %s5093_s20  ;;  %1390 = vrot.lane.b32.xlu0 %v5738_v15, %s5093_s20  ;;  %v1055_v23 = vmax.f32 %v817_v21, 0.0 }
 0x1b6   :  { %v1127_v24 = vpack.c.bf16 %v1055_v23, %v1054_v20 }
 0x1b7   :  { %v821_v26 = vpop.f32.mrb[104].mxu0  ;;  %v5764_v39 = vld [vmem:[#allocation2 + $0xc0] sm:$0xff] }
 0x1b8   :  { %1177 = vst.msk [vmem:[#allocation2 + $0xc8] sm:$0xff] %vm1151_vm3, %v1127_v24  ;;  %1441 = vrot.lane.b32.xlu1 %v5648_v5, %s5095_s27  ;;  %1453 = vrot.lane.b32.xlu0 %v5751_v49, %s5095_s27  ;;  %v822_v27 = vadd.f32 %v5364_v32, %v821_v26  ;;  %v4432_v28 = vpop.f32.mrb[105].mxu0 }
 0x1b9   :  { %v824_v33 = vpop.f32.mrb[106].mxu0 }
 0x1ba   :  { %v1056_v34 = vmax.f32 %v822_v27, 0.0  ;;  %v825_v12 = vadd.f32 %v5364_v32, %v824_v33  ;;  %v4433_v35 = vpop.f32.mrb[107].mxu0 }
 0x1bc   :  { %1305 = vrot.lane.b32.xlu1 %v5531_v61, %s5092_s30  ;;  %1392 = vrot.lane.b32.xlu0 %v5751_v49, %s5093_s20  ;;  %v1057_v36 = vmax.f32 %v825_v12, 0.0 }
 0x1be   :  { %v1128_v37 = vpack.c.bf16 %v1057_v36, %v1056_v34  ;;  %v5829_v34 = vpop.permute.xlu1 %1360 }
 0x1bf   :  { %v829_v38 = vpop.f32.mrb[108].mxu0  ;;  %v5782_v53 = vld [vmem:[#allocation2 + $0xc8] sm:$0xff] }
 0x1c0   :  { %1178 = vst.msk [vmem:[#allocation2 + $0xd0] sm:$0xff] %vm1151_vm3, %v1128_v37  ;;  %v830_v32 = vadd.f32 %v5770_v41, %v829_v38  ;;  %1372 = vrot.lane.b32.xlu1 %v5554_v11, %s5093_s20  ;;  %1455 = vrot.lane.b32.xlu0 %v5764_v39, %s5095_s27  ;;  %v4436_v42 = vpop.f32.mrb[109].mxu0 }
 0x1c1   :  { %v832_v43 = vpop.f32.mrb[110].mxu0 }
 0x1c2   :  { %v1058_v44 = vmax.f32 %v830_v32, 0.0  ;;  %v833_v45 = vadd.f32 %v5770_v41, %v832_v43  ;;  %v4437_v46 = vpop.f32.mrb[111].mxu0 }
 0x1c4   :  { %v1059_v47 = vmax.f32 %v833_v45, 0.0  ;;  %1443 = vrot.lane.b32.xlu1 %v5667_v18, %s5095_s27  ;;  %1394 = vrot.lane.b32.xlu0 %v5764_v39, %s5093_s20  ;;  %v5840_v45 = vpop.permute.xlu1 %1295 }
 0x1c6   :  { %v1129_v48 = vpack.c.bf16 %v1059_v47, %v1058_v44  ;;  %v5846_v47 = vpop.permute.xlu0 %1291 }
 0x1c7   :  { %v837_v52 = vpop.f32.mrb[112].mxu0  ;;  %v5784_v55 = vld [vmem:[#allocation2 + $0xd0] sm:$0xff] }
 0x1c8   :  { %1179 = vst.msk [vmem:[#allocation2 + $0xd8] sm:$0xff] %vm1151_vm3, %v1129_v48  ;;  %v838_v56 = vadd.f32 %v5770_v41, %v837_v52  ;;  %1457 = vrot.lane.b32.xlu0 %v5782_v53, %s5095_s27  ;;  %v4440_v57 = vpop.f32.mrb[113].mxu0  ;;  %1398 = vrot.lane.b32.xlu1 %v5784_v55, %s5093_s20 }
 0x1c9   :  { %v840_v58 = vpop.f32.mrb[114].mxu0 }
 0x1ca   :  { %v1060_v59 = vmax.f32 %v838_v56, 0.0  ;;  %v841_v60 = vadd.f32 %v5770_v41, %v840_v58  ;;  %v4441_v62 = vpop.f32.mrb[115].mxu0 }
 0x1cc   :  { %v1061_v1 = vmax.f32 %v841_v60, 0.0  ;;  %1396 = vrot.lane.b32.xlu0 %v5782_v53, %s5093_s20 }
 0x1ce   :  { %v1130_v3 = vpack.c.bf16 %v1061_v1, %v1060_v59  ;;  %v5856_v59 = vpop.permute.xlu1 %1362 }
 0x1cf   :  { %v845_v4 = vpop.f32.mrb[116].mxu0  ;;  %v5799_v6 = vld [vmem:[#allocation2 + $0xd8] sm:$0xff] }
 0x1d0   :  { %1180 = vst.msk [vmem:[#allocation2 + $0xe0] sm:$0xff] %vm1151_vm3, %v1130_v3  ;;  %v846_v7 = vadd.f32 %v5770_v41, %v845_v4  ;;  %1459 = vrot.lane.b32.xlu0 %v5784_v55, %s5095_s27  ;;  %1461 = vrot.lane.b32.xlu1 %v5799_v6, %s5095_s27  ;;  %v4444_v8 = vpop.f32.mrb[117].mxu0 }
 0x1d1   :  { %v848_v10 = vpop.f32.mrb[118].mxu0 }
 0x1d2   :  { %v1062_v13 = vmax.f32 %v846_v7, 0.0  ;;  %v849_v14 = vadd.f32 %v5770_v41, %v848_v10  ;;  %v4445_v16 = vpop.f32.mrb[119].mxu0  ;;  %v1308_v62 = vpop.permute.xlu0 %1307 }
 0x1d3   :  { %v5863_v7 = vpop.permute.xlu1 %1429 }
 0x1d4   :  { %v1063_v17 = vmax.f32 %v849_v14, 0.0  ;;  %1323 = vrot.lane.b32.xlu0 %v5725_v2, %s5092_s30  ;;  %1400 = vrot.lane.b32.xlu1 %v5799_v6, %s5093_s20 }
 0x1d6   :  { %v1131_v19 = vpack.c.bf16 %v1063_v17, %v1062_v13 }
 0x1d7   :  { %v853_v20 = vpop.f32.mrb[120].mxu0  ;;  %v5816_v21 = vld [vmem:[#allocation2 + $0xe0] sm:$0xff]  ;;  %v5873_v17 = vpop.permute.xlu1 %1431 }
 0x1d8   :  { %1181 = vst.msk [vmem:[#allocation2 + $0xe8] sm:$0xff] %vm1151_vm3, %v1131_v19  ;;  %v854_v22 = vadd.f32 %v5770_v41, %v853_v20  ;;  %1374 = vrot.lane.b32.xlu0 %v5579_v25, %s5093_s20  ;;  %1463 = vrot.lane.b32.xlu1 %v5816_v21, %s5095_s27  ;;  %v4448_v23 = vpop.f32.mrb[121].mxu0 }
 0x1d9   :  { %v856_v24 = vpop.f32.mrb[122].mxu0 }
 0x1da   :  { %v1064_v26 = vmax.f32 %v854_v22, 0.0  ;;  %v857_v27 = vadd.f32 %v5770_v41, %v856_v24  ;;  %v4449_v28 = vpop.f32.mrb[123].mxu0  ;;  %v5865_v8 = vpop.permute.xlu0 %1309 }
 0x1dc   :  { %v1065_v33 = vmax.f32 %v857_v27, 0.0  ;;  %1325 = vrot.lane.b32.xlu0 %v5738_v15, %s5092_s30  ;;  %1402 = vrot.lane.b32.xlu1 %v5816_v21, %s5093_s20  ;;  %v5880_v27 = vpop.permute.xlu1 %1433 }
 0x1de   :  { %v1132_v12 = vpack.c.bf16 %v1065_v33, %v1064_v26 }
 0x1df   :  { %v5831_v35 = vld [vmem:[#allocation2 + $0xe8] sm:$0xff]  ;;  %v861_v36 = vpop.f32.mrb[124].mxu0 }
 0x1e0   :  { %7052 = vst [vmem:[#allocation4_spill] sm:$0xff] %v5831_v35  ;;  %1182 = vst.msk [vmem:[#allocation2 + $0xf0] sm:$0xff] %vm1151_vm3, %v1132_v12  ;;  %1376 = vrot.lane.b32.xlu0 %v5602_v40, %s5093_s20  ;;  %1465 = vrot.lane.b32.xlu1 %v5831_v35, %s5095_s27  ;;  %v862_v37 = vadd.f32 %v5770_v41, %v861_v36  ;;  %v4452_v38 = vpop.f32.mrb[125].mxu0 }
 0x1e1   :  { %v864_v32 = vpop.f32.mrb[126].mxu0 }
 0x1e2   :  { %v1066_v42 = vmax.f32 %v862_v37, 0.0  ;;  %v865_v43 = vadd.f32 %v5770_v41, %v864_v32  ;;  %v4453_v44 = vpop.f32.mrb[127].mxu0  ;;  %v5875_v20 = vpop.permute.xlu0 %1311 }
 0x1e4   :  { %1327 = vrot.lane.b32.xlu0 %v5751_v49, %s5092_s30  ;;  %1404 = vrot.lane.b32.xlu1 %v5831_v35, %s5093_s20  ;;  %v1067_v46 = vmax.f32 %v865_v43, 0.0 }
 0x1e6   :  { %v1133_v48 = vpack.c.bf16 %v1067_v46, %v1066_v42 }
 0x1e7   :  { %v869_v52 = vpop.f32.mrb[128].mxu0  ;;  %v5848_v56 = vld [vmem:[#allocation2 + $0xf0] sm:$0xff] }
 0x1e8   :  { %7053 = vst [vmem:[#allocation5_spill] sm:$0xff] %v5848_v56  ;;  %1183 = vst.msk [vmem:[#allocation2 + $0xf8] sm:$0xff] %vm1151_vm3, %v1133_v48  ;;  %v870_v57 = vadd.f32 %v5770_v41, %v869_v52  ;;  %1378 = vrot.lane.b32.xlu0 %v5625_v54, %s5093_s20  ;;  %1467 = vrot.lane.b32.xlu1 %v5848_v56, %s5095_s27  ;;  %v4456_v58 = vpop.f32.mrb[129].mxu0 }
 0x1e9   :  { %v872_v60 = vpop.f32.mrb[130].mxu0 }
 0x1ea   :  { %v1068_v63 = vmax.f32 %v870_v57, 0.0  ;;  %v873_v1 = vadd.f32 %v5770_v41, %v872_v60  ;;  %v4457_v3 = vpop.f32.mrb[131].mxu0  ;;  %v5882_v28 = vpop.permute.xlu0 %1313 }
 0x1ec   :  { %v1069_v4 = vmax.f32 %v873_v1, 0.0  ;;  %1329 = vrot.lane.b32.xlu0 %v5764_v39, %s5092_s30  ;;  %1406 = vrot.lane.b32.xlu1 %v5848_v56, %s5093_s20 }
 0x1ee   :  { %v1134_v10 = vpack.c.bf16 %v1069_v4, %v1068_v63 }
 0x1ef   :  { %v877_v13 = vpop.f32.mrb[132].mxu0  ;;  %v5884_v36 = vld [vmem:[#allocation2 + $0xf8] sm:$0xff] }
 0x1f0   :  { %1184 = vst.msk [vmem:[#allocation2 + $0x100] sm:$0xff] %vm1151_vm3, %v1134_v10  ;;  %1380 = vrot.lane.b32.xlu0 %v5648_v5, %s5093_s20  ;;  %1333 = vrot.lane.b32.xlu1 %v5784_v55, %s5092_s30  ;;  %v878_v14 = vadd.f32 %v5770_v41, %v877_v13  ;;  %v4460_v16 = vpop.f32.mrb[133].mxu0  ;;  %7054 = vst [vmem:[#allocation6_spill] sm:$0xff] %v5884_v36  ;;  %v5913_v10 = vld [vmem:[#allocation2 + $0x20] sm:$0xff]  ;;  %v5917_v13 = vsel %vm1151_vm3, %v5531_v61, %v1308_v62 }
 0x1f1   :  { %v880_v19 = vpop.f32.mrb[134].mxu0  ;;  %v4991_v62 = vld [vmem:[%s7017_s4 + $0x80] sm:$0xff]  }
 0x1f2   :  { %v1070_v22 = vmax.f32 %v878_v14, 0.0  ;;  %v881_v23 = vadd.f32 %v5770_v41, %v880_v19  ;;  %v4461_v24 = vpop.f32.mrb[135].mxu0  ;;  %v5894_v43 = vpop.permute.xlu0 %1315  ;;  %v1565_v19 = vsel %vm1151_vm3, %v5913_v10, %v5846_v47 }
 0x1f4   :  { %1331 = vrot.lane.b32.xlu0 %v5782_v53, %s5092_s30  ;;  %v1071_v26 = vmax.f32 %v881_v23, 0.0 }
 0x1f6   :  { %v1135_v33 = vpack.c.bf16 %v1071_v26, %v1070_v22 }
 0x1f7   :  { %v885_v12 = vpop.f32.mrb[136].mxu0  ;;  %v5886_v37 = vld [vmem:[#allocation2 + $0x100] sm:$0xff] }
 0x1f8   :  { %7055 = vst [vmem:[#allocation7_spill] sm:$0xff] %v5886_v37  ;;  %1185 = vst.msk [vmem:[#allocation2 + $0x108] sm:$0xff] %vm1151_vm3, %v1135_v33  ;;  %v886_v38 = vadd.f32 %v5770_v41, %v885_v12  ;;  %1469 = vrot.lane.b32.xlu0 %v5884_v36, %s5095_s27  ;;  %1471 = vrot.lane.b32.xlu1 %v5886_v37, %s5095_s27  ;;  %v4464_v32 = vpop.f32.mrb[137].mxu0  ;;  %v1660_v33 = vsel %vm1650_vm4, %v1565_v19, %v5807_v9  ;;  %v4993_v9 = vld [vmem:[%s7017_s4 + $0x88] sm:$0xff]  }
 0x1f9   :  { %v888_v42 = vpop.f32.mrb[138].mxu0  ;;  %v1731_v32 = vsel %vm1717_vm5, %v1660_v33, %v5863_v7 }
 0x1fa   :  { %v1072_v44 = vmax.f32 %v886_v38, 0.0  ;;  %v889_v46 = vadd.f32 %v5770_v41, %v888_v42  ;;  %v5897_v48 = vpop.permute.xlu1 %1382  ;;  %v4465_v52 = vpop.f32.mrb[139].mxu0 }
 0x1fb   :  { %v5903_v60 = vpop.permute.xlu0 %1317  ;;  %v1845_v61 = vsel %vm1650_vm4, %v5917_v13, %v5897_v48 }
 0x1fc   :  { %v1073_v57 = vmax.f32 %v889_v46, 0.0  ;;  %1408 = vrot.lane.b32.xlu0 %v5884_v36, %s5093_s20  ;;  %1410 = vrot.lane.b32.xlu1 %v5886_v37, %s5093_s20 }
 0x1fe   :  { %v1136_v58 = vpack.c.bf16 %v1073_v57, %v1072_v44  ;;  %v5905_v63 = vpop.permute.xlu1 %1297 }
 0x1ff   :  { %v893_v1 = vpop.f32.mrb[140].mxu0  ;;  %v5919_v16 = vld [vmem:[#allocation2 + $0x108] sm:$0xff] }
 0x200   :  { %1186 = vst.msk [vmem:[#allocation2 + $0x110] sm:$0xff] %vm1151_vm3, %v1136_v58  ;;  %v894_v3 = vadd.f32 %v5770_v41, %v893_v1  ;;  %1335 = vrot.lane.b32.xlu0 %v5799_v6, %s5092_s30  ;;  %1337 = vrot.lane.b32.xlu1 %v5816_v21, %s5092_s30  ;;  %v4468_v4 = vpop.f32.mrb[141].mxu0  ;;  %7056 = vst [vmem:[#allocation8_spill] sm:$0xff] %v5919_v16 }
 0x201   :  { %v896_v14 = vpop.f32.mrb[142].mxu0 }
 0x202   :  { %v1074_v22 = vmax.f32 %v894_v3, 0.0  ;;  %v897_v23 = vadd.f32 %v5770_v41, %v896_v14  ;;  %v5925_v24 = vpop.permute.xlu1 %1364  ;;  %v5927_v26 = vpop.permute.xlu0 %1445 }
 0x203   :  { %v1894_v47 = vsel %vm1717_vm5, %v1845_v61, %v5927_v26  ;;  %v4469_v12 = vpop.f32.mrb[143].mxu0  ;;  %v5971_v61 = vsel %vm1151_vm3, %v5554_v11, %v5865_v8 }
 0x204   :  { %v1075_v38 = vmax.f32 %v897_v23, 0.0  ;;  %2249 = vmatprep.mubr.bf16.mxu1 %v1894_v47  ;;  %1473 = vrot.lane.b32.xlu0 %v5919_v16, %s5095_s27 }
 0x205   :  { %2250 = vmatmul.mubr.bf16.vlgmr.msra.gmra.mrb[0].mxu1 %v1731_v32 }
 0x206   :  { %v1137_v42 = vpack.c.bf16 %v1075_v38, %v1074_v22  ;;  %v5943_v44 = vpop.permute.xlu1 %1435  ;;  %v5945_v46 = vpop.permute.xlu0 %1384  ;;  %4523 = vmatpush3.bf16.msra.mxu1 %v4991_v62  ;;  %v5973_v62 = vld [vmem:[#allocation2 + $0x28] sm:$0xff] }
 0x207   :  { %v901_v52 = vpop.f32.mrb[144].mxu0  ;;  %v5950_v57 = vld [vmem:[#allocation2 + $0x110] sm:$0xff]  ;;  %4524 = vmatprep.subr.bf16.mxu1 %v7034_v0  ;;  %7058 = vst [vmem:[#allocation10_spill] sm:$0xff] %v5973_v62  ;;  %v1568_v33 = vsel %vm1151_vm3, %v5973_v62, %v5814_v31  ;;  %v1846_v47 = vsel %vm1650_vm4, %v5971_v61, %v5945_v46 }
 0x208   :  { %7057 = vst [vmem:[#allocation9_spill] sm:$0xff] %v5950_v57  ;;  %1187 = vst.msk [vmem:[#allocation2 + $0x118] sm:$0xff] %vm1151_vm3, %v1137_v42  ;;  %v902_v7 = vadd.f32 %v5770_v41, %v901_v52  ;;  %1412 = vrot.lane.b32.xlu0 %v5919_v16, %s5093_s20  ;;  %1475 = vrot.lane.b32.xlu1 %v5950_v57, %s5095_s27  ;;  %v4472_v58 = vpop.f32.mrb[145].mxu0  ;;  %v1662_v42 = vsel %vm1650_vm4, %v1568_v33, %v5829_v34 }
 0x209   :  { %v904_v1 = vpop.f32.mrb[146].mxu0 }
 0x20a   :  { %v1076_v3 = vmax.f32 %v902_v7, 0.0  ;;  %v905_v4 = vadd.f32 %v5770_v41, %v904_v1  ;;  %v5960_v14 = vpop.permute.xlu1 %1299  ;;  %v5962_v19 = vpop.permute.xlu0 %1319  ;;  %4525 = vmatpush3.bf16.msra.mxu1 %v4993_v9  ;;  %v1734_v7 = vsel %vm1717_vm5, %v1662_v42, %v5873_v17 }
 0x20b   :  { %v4473_v22 = vpop.f32.mrb[147].mxu0 }
 0x20c   :  { %v1077_v23 = vmax.f32 %v905_v4, 0.0  ;;  %1339 = vrot.lane.b32.xlu0 %v5831_v35, %s5092_s30  ;;  %1414 = vrot.lane.b32.xlu1 %v5950_v57, %s5093_s20 }
 0x20e   :  { %v1138_v12 = vpack.c.bf16 %v1077_v23, %v1076_v3  ;;  %v5981_v38 = vpop.permute.xlu1 %1366  ;;  %v5983_v32 = vpop.permute.xlu0 %1447 }
 0x20f   :  { %v909_v11 = vpop.f32.mrb[148].mxu0  ;;  %v1896_v8 = vsel %vm1717_vm5, %v1846_v47, %v5983_v32  ;;  %v5989_v9 = vld [vmem:[#allocation2 + $0x118] sm:$0xff] }
 0x210   :  { %7059 = vst [vmem:[#allocation11_spill] sm:$0xff] %v5989_v9  ;;  %1188 = vst.msk [vmem:[#allocation2 + $0x120] sm:$0xff] %vm1151_vm3, %v1138_v12  ;;  %v910_v31 = vadd.f32 %v5770_v41, %v909_v11  ;;  %2257 = vmatprep.mubr.bf16.mxu1 %v1896_v8  ;;  %1341 = vrot.lane.b32.xlu1 %v5848_v56, %s5092_s30  ;;  %v4476_v52 = vpop.f32.mrb[149].mxu0 }
 0x211   :  { %1477 = vrot.lane.b32.xlu0 %v5989_v9, %s5095_s27  ;;  %v912_v34 = vpop.f32.mrb[150].mxu0  ;;  %2258 = vmatmul.mubr.bf16.gmra.mrb[4].mxu1 %v1734_v7  ;;  %v5061_v7 = vld [vmem:[#allocation2 + $0x30] sm:$0xff] }
 0x212   :  { %v1078_v58 = vmax.f32 %v910_v31, 0.0  ;;  %v913_v1 = vadd.f32 %v5770_v41, %v912_v34  ;;  %v6000_v3 = vpop.permute.xlu1 %1437  ;;  %v6002_v4 = vpop.permute.xlu0 %1386  ;;  %v6019_v31 = vsel %vm1151_vm3, %v5579_v25, %v5875_v20  ;;  %v1571_v34 = vsel %vm1151_vm3, %v5061_v7, %v5840_v45 }
 0x213   :  { %v4477_v22 = vpop.f32.mrb[151].mxu0  ;;  %v1664_v25 = vsel %vm1650_vm4, %v1571_v34, %v5856_v59 }
 0x214   :  { %v1079_v23 = vmax.f32 %v913_v1, 0.0  ;;  %v1737_v45 = vsel %vm1717_vm5, %v1664_v25, %v5880_v27 }
 0x215   :  { %1510 = vrot.lane.b32.xlu0 %v5989_v9, %s5093_s20 }
 0x216   :  { %v1139_v33 = vpack.c.bf16 %v1079_v23, %v1078_v58  ;;  %v6006_v47 = vpop.permute.xlu1 %1301  ;;  %v6008_v17 = vpop.permute.xlu0 %1321  ;;  %v1847_v58 = vsel %vm1650_vm4, %v6019_v31, %v6002_v4 }
 0x217   :  { %v917_v12 = vpop.f32.mrb[152].mxu0  ;;  %v6010_v42 = vld [vmem:[#allocation2 + $0x120] sm:$0xff] }
 0x218   :  { %7060 = vst [vmem:[#allocation12_spill] sm:$0xff] %v6010_v42  ;;  %1189 = vst.msk [vmem:[#allocation2 + $0x128] sm:$0xff] %vm1151_vm3, %v1139_v33  ;;  %v918_v11 = vadd.f32 %v5770_v41, %v917_v12  ;;  %1479 = vrot.lane.b32.xlu1 %v6010_v42, %s5095_s27  ;;  %v4480_v8 = vpop.f32.mrb[153].mxu0 }
 0x219   :  { %1343 = vrot.lane.b32.xlu0 %v5884_v36, %s5092_s30  ;;  %v920_v52 = vpop.f32.mrb[154].mxu0 }
 0x21a   :  { %v1080_v1 = vmax.f32 %v918_v11, 0.0  ;;  %v921_v22 = vadd.f32 %v5770_v41, %v920_v52  ;;  %v6029_v23 = vpop.permute.xlu1 %1368  ;;  %v6031_v33 = vpop.permute.xlu0 %1449 }
 0x21b   :  { %v1898_v20 = vsel %vm1717_vm5, %v1847_v58, %v6031_v33  ;;  %v4481_v12 = vpop.f32.mrb[155].mxu0  ;;  %v6056_v58 = vsel %vm1151_vm3, %v5602_v40, %v5882_v28 }
 0x21c   :  { %v1081_v8 = vmax.f32 %v921_v22, 0.0  ;;  %2265 = vmatprep.mubr.bf16.mxu1 %v1898_v20  ;;  %1512 = vrot.lane.b32.xlu1 %v6010_v42, %s5093_s20  ;;  %v6058_v22 = vld [vmem:[#allocation2 + $0x38] sm:$0xff] }
 0x21d   :  { %2266 = vmatmul.mubr.bf16.gmra.mrb[8].mxu1 %v1737_v45  ;;  %v1574_v25 = vsel %vm1151_vm3, %v6058_v22, %v5905_v63 }
 0x21e   :  { %v1140_v11 = vpack.c.bf16 %v1081_v8, %v1080_v1  ;;  %v6041_v52 = vpop.permute.xlu1 %1439  ;;  %v6043_v7 = vpop.permute.xlu0 %1388  ;;  %v1666_v40 = vsel %vm1650_vm4, %v1574_v25, %v5925_v24 }
 0x21f   :  { %7061 = vst [vmem:[#allocation13_spill] sm:$0xff] %v6041_v52  ;;  %v925_v0 = vpop.f32.mrb[156].mxu0  ;;  %v6045_v59 = vld [vmem:[#allocation2 + $0x128] sm:$0xff]  ;;  %v1740_v63 = vsel %vm1717_vm5, %v1666_v40, %v5943_v44 }
 0x220   :  { %1190 = vst.msk [vmem:[#allocation2 + $0x130] sm:$0xff] %vm1151_vm3, %v1140_v11  ;;  %v926_v34 = vadd.f32 %v5770_v41, %v925_v0  ;;  %1345 = vrot.lane.b32.xlu1 %v5886_v37, %s5092_s30  ;;  %1481 = vrot.lane.b32.xlu0 %v6045_v59, %s5095_s27  ;;  %v4484_v27 = vpop.f32.mrb[157].mxu0  ;;  %v1848_v0 = vsel %vm1650_vm4, %v6056_v58, %v6043_v7 }
 0x221   :  { %v928_v1 = vpop.f32.mrb[158].mxu0 }
 0x222   :  { %v1082_v20 = vmax.f32 %v926_v34, 0.0  ;;  %v929_v12 = vadd.f32 %v5770_v41, %v928_v1  ;;  %v6067_v8 = vpop.permute.xlu1 %1303  ;;  %v6069_v45 = vpop.permute.xlu0 %1451 }
 0x223   :  { %v1900_v28 = vsel %vm1717_vm5, %v1848_v0, %v6069_v45  ;;  %v4485_v11 = vpop.f32.mrb[159].mxu0  ;;  %v6094_v0 = vsel %vm1151_vm3, %v5625_v54, %v5894_v43 }
 0x224   :  { %v1083_v27 = vmax.f32 %v929_v12, 0.0  ;;  %2273 = vmatprep.mubr.bf16.mxu1 %v1900_v28  ;;  %1514 = vrot.lane.b32.xlu0 %v6045_v59, %s5093_s20  ;;  %v6096_v12 = vld [vmem:[#allocation2 + $0x40] sm:$0xff] }
 0x225   :  { %2274 = vmatmul.mubr.bf16.gmra.mrb[12].mxu1 %v1740_v63  ;;  %v6101_v40 = vsel %vm1151_vm3, %v6096_v12, %v5960_v14 }
 0x226   :  { %v1141_v34 = vpack.c.bf16 %v1083_v27, %v1082_v20  ;;  %v6079_v1 = vpop.permute.xlu1 %1370  ;;  %v6081_v37 = vpop.permute.xlu0 %1390  ;;  %v1668_v54 = vsel %vm1650_vm4, %v6101_v40, %v5981_v38 }
 0x227   :  { %v933_v36 = vpop.f32.mrb[160].mxu0  ;;  %v6083_v24 = vld [vmem:[#allocation2 + $0x130] sm:$0xff] }
 0x228   :  { %1191 = vst.msk [vmem:[#allocation2 + $0x138] sm:$0xff] %vm1151_vm3, %v1141_v34  ;;  %v934_v25 = vadd.f32 %v5770_v41, %v933_v36  ;;  %1347 = vrot.lane.b32.xlu0 %v5919_v16, %s5092_s30  ;;  %1483 = vrot.lane.b32.xlu1 %v6083_v24, %s5095_s27  ;;  %v4488_v44 = vpop.f32.mrb[161].mxu0  ;;  %v1849_v36 = vsel %vm1650_vm4, %v6094_v0, %v6081_v37 }
 0x229   :  { %v936_v20 = vpop.f32.mrb[162].mxu0 }
 0x22a   :  { %v1084_v28 = vmax.f32 %v934_v25, 0.0  ;;  %v937_v11 = vadd.f32 %v5770_v41, %v936_v20  ;;  %v6107_v27 = vpop.permute.xlu1 %1441  ;;  %v6109_v63 = vpop.permute.xlu0 %1453  ;;  %v1743_v25 = vsel %vm1717_vm5, %v1668_v54, %v6000_v3 }
 0x22b   :  { %7062 = vst [vmem:[#allocation14_spill] sm:$0xff] %v6107_v27  ;;  %v1902_v43 = vsel %vm1717_vm5, %v1849_v36, %v6109_v63  ;;  %v4489_v14 = vpop.f32.mrb[163].mxu0 }
 0x22c   :  { %v1085_v34 = vmax.f32 %v937_v11, 0.0  ;;  %2281 = vmatprep.mubr.bf16.mxu1 %v1902_v43  ;;  %1516 = vrot.lane.b32.xlu1 %v6083_v24, %s5093_s20  ;;  %v6140_v43 = vsel %vm1151_vm3, %v5684_v29, %v6006_v47 }
 0x22d   :  { %2282 = vmatmul.mubr.bf16.gmra.mrb[16].mxu1 %v1743_v25 }
 0x22e   :  { %v1142_v44 = vpack.c.bf16 %v1085_v34, %v1084_v28  ;;  %v6120_v20 = vpop.permute.xlu1 %1305  ;;  %v6122_v16 = vpop.permute.xlu0 %1392  ;;  %v6135_v28 = vsel %vm1151_vm3, %v5648_v5, %v5903_v60  ;;  %v1670_v5 = vsel %vm1650_vm4, %v6140_v43, %v6029_v23 }
 0x22f   :  { %v941_v56 = vpop.f32.mrb[164].mxu0  ;;  %v6124_v38 = vld [vmem:[#allocation2 + $0x138] sm:$0xff]  ;;  %v1746_v47 = vsel %vm1717_vm5, %v1670_v5, %v6041_v52 }
 0x230   :  { %1192 = vst.msk [vmem:[#allocation2 + $0x140] sm:$0xff] %vm1151_vm3, %v1142_v44  ;;  %v942_v36 = vadd.f32 %v5770_v41, %v941_v56  ;;  %1489 = vrot.lane.b32.xlu1 %v5950_v57, %s5092_s30  ;;  %1485 = vrot.lane.b32.xlu0 %v6124_v38, %s5095_s27  ;;  %v4492_v11 = vpop.f32.mrb[165].mxu0  ;;  %v1850_v56 = vsel %vm1650_vm4, %v6135_v28, %v6122_v16 }
 0x231   :  { %v944_v54 = vpop.f32.mrb[166].mxu0 }
 0x232   :  { %v1086_v14 = vmax.f32 %v942_v36, 0.0  ;;  %v945_v34 = vadd.f32 %v5770_v41, %v944_v54  ;;  %v1373_v25 = vpop.permute.xlu1 %1372  ;;  %v6146_v44 = vpop.permute.xlu0 %1455 }
 0x233   :  { %v1904_v60 = vsel %vm1717_vm5, %v1850_v56, %v6146_v44  ;;  %v4493_v11 = vpop.f32.mrb[167].mxu0 }
 0x234   :  { %v1087_v29 = vmax.f32 %v945_v34, 0.0  ;;  %2289 = vmatprep.mubr.bf16.mxu1 %v1904_v60  ;;  %1518 = vrot.lane.b32.xlu0 %v6124_v38, %s5093_s20  ;;  %v6177_v60 = vsel %vm1151_vm3, %v5706_v50, %v6067_v8 }
 0x235   :  { %2290 = vmatmul.mubr.bf16.gmra.mrb[20].mxu1 %v1746_v47 }
 0x236   :  { %v1143_v36 = vpack.c.bf16 %v1087_v29, %v1086_v14  ;;  %v6157_v54 = vpop.permute.xlu0 %1394  ;;  %v6162_v23 = vpop.permute.xlu1 %1443  ;;  %v6172_v14 = vsel %vm1151_vm3, %v5667_v18, %v5962_v19  ;;  %v1672_v18 = vsel %vm1650_vm4, %v6177_v60, %v6079_v1 }
 0x237   :  { %v949_v57 = vpop.f32.mrb[168].mxu0  ;;  %v6159_v62 = vld [vmem:[#allocation2 + $0x140] sm:$0xff]  ;;  %7063 = vst [vmem:[#allocation15_spill] sm:$0xff] %v6162_v23  ;;  %v1749_v50 = vsel %vm1717_vm5, %v1672_v18, %v6107_v27 }
 0x238   :  { %1193 = vst.msk [vmem:[#allocation2 + $0x148] sm:$0xff] %vm1151_vm3, %v1143_v36  ;;  %v950_v56 = vadd.f32 %v5770_v41, %v949_v57  ;;  %1491 = vrot.lane.b32.xlu0 %v5989_v9, %s5092_s30  ;;  %1535 = vrot.lane.b32.xlu1 %v6159_v62, %s5095_s27  ;;  %v4496_v34 = vpop.f32.mrb[169].mxu0  ;;  %v1851_v57 = vsel %vm1650_vm4, %v6172_v14, %v6157_v54 }
 0x239   :  { %v952_v5 = vpop.f32.mrb[170].mxu0 }
 0x23a   :  { %v1088_v11 = vmax.f32 %v950_v56, 0.0  ;;  %v953_v29 = vadd.f32 %v5770_v41, %v952_v5  ;;  %v6183_v47 = vpop.permute.xlu0 %1457  ;;  %v4497_v36 = vpop.f32.mrb[171].mxu0 }
 0x23b   :  { %v1906_v19 = vsel %vm1717_vm5, %v1851_v57, %v6183_v47  ;;  %v6194_v8 = vpop.permute.xlu1 %1398 }
 0x23c   :  { %v1089_v34 = vmax.f32 %v953_v29, 0.0  ;;  %2297 = vmatprep.mubr.bf16.mxu1 %v1906_v19  ;;  %1520 = vrot.lane.b32.xlu1 %v6159_v62, %s5093_s20  ;;  %v5064_v19 = vld [vmem:[#allocation2 + $0x58] sm:$0xff] }
 0x23d   :  { %2298 = vmatmul.mubr.bf16.gmra.mrb[24].mxu1 %v1749_v50  ;;  %v6213_v36 = vsel %vm1151_vm3, %v5064_v19, %v6120_v20 }
 0x23e   :  { %v1144_v56 = vpack.c.bf16 %v1089_v34, %v1088_v11  ;;  %v6196_v5 = vpop.permute.xlu0 %1396  ;;  %v6209_v11 = vsel %vm1151_vm3, %v5686_v30, %v6008_v17  ;;  %v1674_v30 = vsel %vm1650_vm4, %v6213_v36, %v1373_v25 }
 0x23f   :  { %v957_v52 = vpop.f32.mrb[172].mxu0  ;;  %v6198_v1 = vld [vmem:[#allocation2 + $0x148] sm:$0xff]  ;;  %v1752_v20 = vsel %vm1717_vm5, %v1674_v30, %v6162_v23 }
 0x240   :  { %1194 = vst.msk [vmem:[#allocation2 + $0x150] sm:$0xff] %vm1151_vm3, %v1144_v56  ;;  %v958_v57 = vadd.f32 %v5770_v41, %v957_v52  ;;  %1493 = vrot.lane.b32.xlu1 %v6010_v42, %s5092_s30  ;;  %1537 = vrot.lane.b32.xlu0 %v6198_v1, %s5095_s27  ;;  %v4500_v29 = vpop.f32.mrb[173].mxu0  ;;  %v1852_v52 = vsel %vm1650_vm4, %v6209_v11, %v6196_v5 }
 0x241   :  { %v960_v18 = vpop.f32.mrb[174].mxu0 }
 0x242   :  { %v1090_v34 = vmax.f32 %v958_v57, 0.0  ;;  %v961_v50 = vadd.f32 %v5770_v41, %v960_v18  ;;  %v6219_v56 = vpop.permute.xlu0 %1459  ;;  %v1462_v29 = vpop.permute.xlu1 %1461 }
 0x243   :  { %v1908_v17 = vsel %vm1717_vm5, %v1852_v52, %v6219_v56  ;;  %v4501_v27 = vpop.f32.mrb[175].mxu0 }
 0x244   :  { %v1091_v42 = vmax.f32 %v961_v50, 0.0  ;;  %2305 = vmatprep.mubr.bf16.mxu1 %v1908_v17  ;;  %1522 = vrot.lane.b32.xlu0 %v6198_v1, %s5093_s20 }
 0x245   :  { %2306 = vmatmul.mubr.bf16.gmra.mrb[28].mxu1 %v1752_v20 }
 0x246   :  { %v1145_v57 = vpack.c.bf16 %v1091_v42, %v1090_v34  ;;  %v1324_v18 = vpop.permute.xlu0 %1323  ;;  %v6229_v19 = vpop.permute.xlu1 %1400 }
 0x247   :  { %v1613_v25 = vsel %vm1151_vm3, %v5708_v51, %v1324_v18  ;;  %v965_v9 = vpop.f32.mrb[176].mxu0  ;;  %v6233_v35 = vld [vmem:[#allocation2 + $0x150] sm:$0xff] }
 0x248   :  { %1195 = vst.msk [vmem:[#allocation2 + $0x158] sm:$0xff] %vm1151_vm3, %v1145_v57  ;;  %v966_v27 = vadd.f32 %v5770_v41, %v965_v9  ;;  %1495 = vrot.lane.b32.xlu0 %v6045_v59, %s5092_s30  ;;  %1539 = vrot.lane.b32.xlu1 %v6233_v35, %s5095_s27  ;;  %v4504_v42 = vpop.f32.mrb[177].mxu0  ;;  %v1853_v52 = vsel %vm1650_vm4, %v1613_v25, %v6194_v8 }
 0x249   :  { %v1692_v51 = vsel %vm1650_vm4, %v1613_v25, %v6081_v37  ;;  %v968_v34 = vpop.f32.mrb[178].mxu0  ;;  %v1910_v50 = vsel %vm1717_vm5, %v1853_v52, %v1462_v29 }
 0x24a   :  { %v6247_v30 = vsel %vm1717_vm5, %v1692_v51, %v1462_v29  ;;  %v1092_v9 = vmax.f32 %v966_v27, 0.0  ;;  %v969_v17 = vadd.f32 %v5770_v41, %v968_v34  ;;  %v1375_v20 = vpop.permute.xlu0 %1374  ;;  %2313 = vmatprep.mubr.bf16.mxu1 %v1910_v50  ;;  %v1464_v57 = vpop.permute.xlu1 %1463 }
 0x24b   :  { %v1676_v18 = vsel %vm1650_vm4, %v5917_v13, %v1375_v20  ;;  %v1841_v42 = vsel %vm1650_vm4, %v6101_v40, %v1375_v20  ;;  %v4505_v23 = vpop.f32.mrb[179].mxu0 }
 0x24c   :  { %v1093_v37 = vmax.f32 %v969_v17, 0.0  ;;  %1524 = vrot.lane.b32.xlu1 %v6233_v35, %s5093_s20  ;;  %v1886_v29 = vsel %vm1717_vm5, %v1841_v42, %v6000_v3  ;;  %v1755_v25 = vsel %vm1717_vm5, %v1676_v18, %v5927_v26 }
 0x24d   :  { %2217 = vmatprep.mubr.bf16.mxu0 %v1886_v29  ;;  %2314 = vmatmul.mubr.bf16.gmra.mrb[32].mxu1 %v1755_v25 }
 0x24e   :  { %v1146_v27 = vpack.c.bf16 %v1093_v37, %v1092_v9  ;;  %v1326_v52 = vpop.permute.xlu0 %1325  ;;  %v6260_v51 = vpop.permute.xlu1 %1402 }
 0x24f   :  { %v1616_v13 = vsel %vm1151_vm3, %v5725_v2, %v1326_v52  ;;  %v973_v40 = vpop.f32.mrb[180].mxu0  ;;  %v6264_v23 = vld [vmem:[#allocation2 + $0x158] sm:$0xff] }
 0x250   :  { %1196 = vst.msk [vmem:[#allocation2 + $0x160] sm:$0xff] %vm1151_vm3, %v1146_v27  ;;  %v974_v34 = vadd.f32 %v5770_v41, %v973_v40  ;;  %1497 = vrot.lane.b32.xlu1 %v6083_v24, %s5092_s30  ;;  %1541 = vrot.lane.b32.xlu0 %v6264_v23, %s5095_s27  ;;  %v4508_v26 = vpop.f32.mrb[181].mxu0  ;;  %v1854_v3 = vsel %vm1650_vm4, %v1616_v13, %v6229_v19 }
 0x251   :  { %v1694_v2 = vsel %vm1650_vm4, %v1616_v13, %v6122_v16  ;;  %v976_v50 = vpop.f32.mrb[182].mxu0  ;;  %v1912_v9 = vsel %vm1717_vm5, %v1854_v3, %v1464_v57 }
 0x252   :  { %v6278_v17 = vsel %vm1717_vm5, %v1694_v2, %v1464_v57  ;;  %v1094_v20 = vmax.f32 %v974_v34, 0.0  ;;  %v977_v18 = vadd.f32 %v5770_v41, %v976_v50  ;;  %v1377_v42 = vpop.permute.xlu0 %1376  ;;  %2321 = vmatprep.mubr.bf16.mxu1 %v1912_v9  ;;  %v1466_v37 = vpop.permute.xlu1 %1465 }
 0x253   :  { %v1678_v29 = vsel %vm1650_vm4, %v5971_v61, %v1377_v42  ;;  %v6285_v25 = vsel %vm1650_vm4, %v6140_v43, %v1377_v42  ;;  %v4509_v16 = vpop.f32.mrb[183].mxu0 }
 0x254   :  { %v1095_v27 = vmax.f32 %v977_v18, 0.0  ;;  %1526 = vrot.lane.b32.xlu0 %v6264_v23, %s5093_s20  ;;  %v1758_v57 = vsel %vm1717_vm5, %v1678_v29, %v5983_v32 }
 0x255   :  { %2322 = vmatmul.mubr.bf16.gmra.mrb[36].mxu1 %v1758_v57 }
 0x256   :  { %v1147_v52 = vpack.c.bf16 %v1095_v27, %v1094_v20  ;;  %v1328_v13 = vpop.permute.xlu0 %1327  ;;  %v6291_v40 = vpop.permute.xlu1 %1404 }
 0x257   :  { %v1619_v61 = vsel %vm1151_vm3, %v5738_v15, %v1328_v13  ;;  %v981_v34 = vpop.f32.mrb[184].mxu0  ;;  %v6295_v26 = vld [vmem:[#allocation2 + $0x160] sm:$0xff] }
 0x258   :  { %1197 = vst.msk [vmem:[#allocation2 + $0x168] sm:$0xff] %vm1151_vm3, %v1147_v52  ;;  %v982_v43 = vadd.f32 %v5770_v41, %v981_v34  ;;  %1499 = vrot.lane.b32.xlu0 %v6124_v38, %s5092_s30  ;;  %1543 = vrot.lane.b32.xlu1 %v6295_v26, %s5095_s27  ;;  %v4512_v32 = vpop.f32.mrb[185].mxu0  ;;  %v1855_v3 = vsel %vm1650_vm4, %v1619_v61, %v6260_v51 }
 0x259   :  { %v1696_v15 = vsel %vm1650_vm4, %v1619_v61, %v6157_v54  ;;  %v984_v2 = vpop.f32.mrb[186].mxu0  ;;  %v1914_v50 = vsel %vm1717_vm5, %v1855_v3, %v1466_v37 }
 0x25a   :  { %v6309_v9 = vsel %vm1717_vm5, %v1696_v15, %v1466_v37  ;;  %v1096_v20 = vmax.f32 %v982_v43, 0.0  ;;  %v985_v18 = vadd.f32 %v5770_v41, %v984_v2  ;;  %v1379_v42 = vpop.permute.xlu0 %1378  ;;  %2329 = vmatprep.mubr.bf16.mxu1 %v1914_v50  ;;  %v1468_v29 = vpop.permute.xlu1 %1467 }
 0x25b   :  { %v1680_v16 = vsel %vm1650_vm4, %v6019_v31, %v1379_v42  ;;  %v6316_v27 = vsel %vm1650_vm4, %v6177_v60, %v1379_v42  ;;  %v4513_v54 = vpop.f32.mrb[187].mxu0 }
 0x25c   :  { %v1097_v57 = vmax.f32 %v985_v18, 0.0  ;;  %1528 = vrot.lane.b32.xlu1 %v6295_v26, %s5093_s20  ;;  %v1761_v37 = vsel %vm1717_vm5, %v1680_v16, %v6031_v33 }
 0x25d   :  { %2330 = vmatmul.mubr.bf16.gmra.mrb[40].mxu1 %v1761_v37 }
 0x25e   :  { %v1148_v52 = vpack.c.bf16 %v1097_v57, %v1096_v20  ;;  %v1330_v13 = vpop.permute.xlu0 %1329  ;;  %v6322_v61 = vpop.permute.xlu1 %1406 }
 0x25f   :  { %v1622_v31 = vsel %vm1151_vm3, %v5751_v49, %v1330_v13  ;;  %v989_v34 = vpop.f32.mrb[188].mxu0  ;;  %v6326_v43 = vld [vmem:[#allocation2 + $0x168] sm:$0xff] }
 0x260   :  { %1198 = vst.msk [vmem:[#allocation2 + $0x170] sm:$0xff] %vm1151_vm3, %v1148_v52  ;;  %v990_v60 = vadd.f32 %v5770_v41, %v989_v34  ;;  %1501 = vrot.lane.b32.xlu1 %v6159_v62, %s5092_s30  ;;  %1545 = vrot.lane.b32.xlu0 %v6326_v43, %s5095_s27  ;;  %v4516_v33 = vpop.f32.mrb[189].mxu0  ;;  %v1856_v32 = vsel %vm1650_vm4, %v1622_v31, %v6291_v40 }
 0x261   :  { %v1698_v49 = vsel %vm1650_vm4, %v1622_v31, %v6196_v5  ;;  %v992_v3 = vpop.f32.mrb[190].mxu0  ;;  %v1916_v15 = vsel %vm1717_vm5, %v1856_v32, %v1468_v29 }
 0x262   :  { %v6340_v2 = vsel %vm1717_vm5, %v1698_v49, %v1468_v29  ;;  %v1098_v50 = vmax.f32 %v990_v60, 0.0  ;;  %v993_v20 = vadd.f32 %v5770_v41, %v992_v3  ;;  %v1381_v18 = vpop.permute.xlu0 %1380  ;;  %2337 = vmatprep.mubr.bf16.mxu1 %v1916_v15  ;;  %v1334_v42 = vpop.permute.xlu1 %1333 }
 0x263   :  { %v1682_v16 = vsel %vm1650_vm4, %v6056_v58, %v1381_v18  ;;  %v6347_v54 = vsel %vm1650_vm4, %v6213_v36, %v1381_v18  ;;  %v1628_v5 = vsel %vm1151_vm3, %v5782_v53, %v1334_v42  ;;  %v4517_v57 = vpop.f32.mrb[191].mxu0 }
 0x264   :  { %v1099_v37 = vmax.f32 %v993_v20, 0.0  ;;  %1530 = vrot.lane.b32.xlu0 %v6326_v43, %s5093_s20  ;;  %v1764_v41 = vsel %vm1717_vm5, %v1682_v16, %v6069_v45  ;;  %v1702_v29 = vsel %vm1650_vm4, %v1628_v5, %v6229_v19  ;;  %v1686_v20 = vsel %vm1650_vm4, %v6135_v28, %v5945_v46  ;;  %v6403_v16 = vld [vmem:[#allocation2 + $0x10] sm:$0xff] }
 0x265   :  { %2338 = vmatmul.mubr.bf16.gmra.mrb[44].mxu1 %v1764_v41 }
 0x266   :  { %v1149_v58 = vpack.c.bf16 %v1099_v37, %v1098_v50  ;;  %v1332_v52 = vpop.permute.xlu0 %1331 }
 0x267   :  { %v1625_v36 = vsel %vm1151_vm3, %v5764_v39, %v1332_v52  ;;  %v6359_v13 = vld [vmem:[#allocation2 + $0x170] sm:$0xff]  ;;  %v1684_v39 = vsel %vm1650_vm4, %v6094_v0, %v5897_v48  ;;  %v6387_v0 = vld [vmem:[#allocation2 + $0x8] sm:$0xff] }
 0x268   :  { %1199 = vst.msk [vmem:[#allocation2 + $0x178] sm:$0xff] %vm1151_vm3, %v1149_v58  ;;  %1503 = vrot.lane.b32.xlu0 %v6198_v1, %s5092_s30  ;;  %1547 = vrot.lane.b32.xlu1 %v6359_v13, %s5095_s27  ;;  %v1857_v19 = vsel %vm1650_vm4, %v1625_v36, %v6322_v61  ;;  %v1700_v31 = vsel %vm1650_vm4, %v1625_v36, %v6194_v8 }
 0x269   :  { %v1767_v32 = vsel %vm1717_vm5, %v1684_v39, %v6109_v63 }
 0x26a   :  { %v1470_v53 = vpop.permute.xlu0 %1469  ;;  %v1472_v45 = vpop.permute.xlu1 %1471 }
 0x26b   :  { %v1918_v34 = vsel %vm1717_vm5, %v1857_v19, %v1470_v53  ;;  %v6375_v60 = vsel %vm1717_vm5, %v1700_v31, %v1470_v53  ;;  %v6378_v33 = vsel %vm1717_vm5, %v1702_v29, %v1472_v45  ;;  %v5065_v53 = vld [vmem:[#allocation2 + $0x48] sm:$0xff]  ;;  %v7064_v19 = vld [vmem:[#allocation4_spill] sm:$0xff] }
 0x26c   :  { %2345 = vmatprep.mubr.bf16.mxu1 %v1918_v34  ;;  %1532 = vrot.lane.b32.xlu1 %v6359_v13, %s5093_s20  ;;  %v7065_v34 = vld [vmem:[#allocation10_spill] sm:$0xff] }
 0x26d   :  { %2346 = vmatmul.mubr.bf16.gmra.mrb[48].mxu1 %v1767_v32 }
 0x26e   :  { %v1409_v8 = vpop.permute.xlu0 %1408  ;;  %v6384_v49 = vpop.permute.xlu1 %1410 }
 0x26f   :  { %v1858_v48 = vsel %vm1650_vm4, %v1628_v5, %v1409_v8  ;;  %v6389_v3 = vld [vmem:[#allocation2 + $0x178] sm:$0xff]  ;;  %v1770_v5 = vsel %vm1717_vm5, %v1686_v20, %v6146_v44 }
 0x270   :  { %1283 = vrot.lane.b32.xlu1 %v6387_v0, %s5092_s30  ;;  %1549 = vrot.lane.b32.xlu0 %v6389_v3, %s5095_s27  ;;  %v1920_v15 = vsel %vm1717_vm5, %v1858_v48, %v1472_v45 }
 0x271   :  { %2353 = vmatprep.mubr.bf16.mxu1 %v1920_v15  ;;  %v5066_v15 = vld [vmem:[#allocation2 + $0x50] sm:$0xff] }
 0x272   :  { %v1336_v63 = vpop.permute.xlu0 %1335  ;;  %v1338_v50 = vpop.permute.xlu1 %1337 }
 0x273   :  { %v1631_v18 = vsel %vm1151_vm3, %v5784_v55, %v1336_v63  ;;  %v1634_v42 = vsel %vm1151_vm3, %v5799_v6, %v1338_v50 }
 0x274   :  { %1421 = vrot.lane.b32.xlu1 %v6058_v22, %s5095_s27  ;;  %1350 = vrot.lane.b32.xlu0 %v6403_v16, %s5093_s20  ;;  %v1704_v46 = vsel %vm1650_vm4, %v1631_v18, %v6260_v51  ;;  %v1706_v55 = vsel %vm1650_vm4, %v1634_v42, %v6291_v40  ;;  %v1859_v6 = vsel %vm1650_vm4, %v1631_v18, %v6384_v49  ;;  %v6418_v22 = vld [vmem:[#allocation2 + $0x18] sm:$0xff] }
 0x275   :  { %2354 = vmatmul.mubr.bf16.gmra.mrb[52].mxu1 %v1770_v5  ;;  %v1688_v40 = vsel %vm1650_vm4, %v6172_v14, %v6002_v4  ;;  %v7066_v18 = vld [vmem:[#allocation5_spill] sm:$0xff] }
 0x276   :  { %v1474_v28 = vpop.permute.xlu0 %1473  ;;  %v1773_v58 = vsel %vm1717_vm5, %v1688_v40, %v6183_v47 }
 0x277   :  { %v1922_v57 = vsel %vm1717_vm5, %v1859_v6, %v1474_v28  ;;  %v6421_v37 = vsel %vm1717_vm5, %v1704_v46, %v1474_v28  ;;  %v7067_v28 = vld [vmem:[#allocation6_spill] sm:$0xff] }
 0x278   :  { %2361 = vmatprep.mubr.bf16.mxu1 %v1922_v57  ;;  %1352 = vrot.lane.b32.xlu1 %v6418_v22, %s5093_s20 }
 0x279   :  { %1285 = vrot.lane.b32.xlu0 %v6403_v16, %s5092_s30 }
 0x27a   :  { %v1413_v44 = vpop.permute.xlu0 %1412  ;;  %v1476_v51 = vpop.permute.xlu1 %1475 }
 0x27b   :  { %v1860_v41 = vsel %vm1650_vm4, %v1634_v42, %v1413_v44  ;;  %v6432_v29 = vsel %vm1717_vm5, %v1706_v55, %v1476_v51 }
 0x27c   :  { %1287 = vrot.lane.b32.xlu1 %v6418_v22, %s5092_s30  ;;  %v1924_v52 = vsel %vm1717_vm5, %v1860_v41, %v1476_v51 }
 0x27d   :  { %1423 = vrot.lane.b32.xlu0 %v6096_v12, %s5095_s27  ;;  %2362 = vmatmul.mubr.bf16.gmra.mrb[56].mxu1 %v1773_v58  ;;  %v1690_v12 = vsel %vm1650_vm4, %v6209_v11, %v6043_v7 }
 0x27e   :  { %v1340_v36 = vpop.permute.xlu0 %1339  ;;  %2369 = vmatprep.mubr.bf16.mxu1 %v1924_v52  ;;  %v1415_v4 = vpop.permute.xlu1 %1414  ;;  %v7068_v52 = vld [vmem:[#allocation7_spill] sm:$0xff] }
 0x27f   :  { %v1637_v14 = vsel %vm1151_vm3, %v5816_v21, %v1340_v36 }
 0x280   :  { %1425 = vrot.lane.b32.xlu1 %v5065_v53, %s5095_s27  ;;  %v1708_v45 = vsel %vm1650_vm4, %v1637_v14, %v6322_v61  ;;  %v1861_v21 = vsel %vm1650_vm4, %v1637_v14, %v1415_v4  ;;  %v1776_v61 = vsel %vm1717_vm5, %v1690_v12, %v6219_v56 }
 0x281   :  { %1354 = vrot.lane.b32.xlu0 %v5913_v10, %s5093_s20 }
 0x282   :  { %v1342_v47 = vpop.permute.xlu1 %1341 }
 0x283   :  { %v1640_v31 = vsel %vm1151_vm3, %v7064_v19, %v1342_v47  ;;  %v1478_v39 = vpop.permute.xlu0 %1477 }
 0x284   :  { %1356 = vrot.lane.b32.xlu1 %v7065_v34, %s5093_s20  ;;  %v6459_v32 = vsel %vm1717_vm5, %v1708_v45, %v1478_v39  ;;  %v1710_v48 = vsel %vm1650_vm4, %v1640_v31, %v1409_v8  ;;  %v1926_v7 = vsel %vm1717_vm5, %v1861_v21, %v1478_v39  ;;  %v7069_v34 = vld [vmem:[#allocation8_spill] sm:$0xff] }
 0x285   :  { %1289 = vrot.lane.b32.xlu0 %v5913_v10, %s5092_s30  ;;  %2370 = vmatmul.mubr.bf16.gmra.mrb[60].mxu1 %v1776_v61 }
 0x286   :  { %2377 = vmatprep.mubr.bf16.mxu1 %v1926_v7 }
 0x287   :  { %v1511_v11 = vpop.permute.xlu0 %1510 }
 0x288   :  { %v1863_v20 = vsel %vm1650_vm4, %v1640_v31, %v1511_v11 }
 0x289   :  { %1427 = vrot.lane.b32.xlu0 %v5066_v15, %s5095_s27 }
 0x28a   :  { %v1480_v63 = vpop.permute.xlu1 %1479 }
 0x28b   :  { %v1344_v50 = vpop.permute.xlu0 %1343  ;;  %v6467_v56 = vsel %vm1717_vm5, %v1710_v48, %v1480_v63  ;;  %v1928_v10 = vsel %vm1717_vm5, %v1863_v20, %v1480_v63 }
 0x28c   :  { %v1643_v8 = vsel %vm1151_vm3, %v7066_v18, %v1344_v50 }
 0x28d   :  { %2378 = vmatmul.mubr.bf16.gmra.mrb[64].mxu1 %v6247_v30  ;;  %v1712_v42 = vsel %vm1650_vm4, %v1643_v8, %v6384_v49 }
 0x28e   :  { %2385 = vmatprep.mubr.bf16.mxu1 %v1928_v10  ;;  %v1513_v5 = vpop.permute.xlu1 %1512 }
 0x28f   :  { %v1865_v51 = vsel %vm1650_vm4, %v1643_v8, %v1513_v5 }
 0x292   :  { %v1346_v46 = vpop.permute.xlu1 %1345  ;;  %v1482_v55 = vpop.permute.xlu0 %1481 }
 0x293   :  { %v1646_v6 = vsel %vm1151_vm3, %v7067_v28, %v1346_v46  ;;  %v6479_v57 = vsel %vm1717_vm5, %v1712_v42, %v1482_v55  ;;  %v1930_v30 = vsel %vm1717_vm5, %v1865_v51, %v1482_v55 }
 0x294   :  { %v1714_v40 = vsel %vm1650_vm4, %v1646_v6, %v1413_v44 }
 0x295   :  { %2386 = vmatmul.mubr.bf16.gmra.mrb[68].mxu1 %v6278_v17 }
 0x296   :  { %2393 = vmatprep.mubr.bf16.mxu1 %v1930_v30  ;;  %v1515_v49 = vpop.permute.xlu0 %1514 }
 0x297   :  { %v1867_v53 = vsel %vm1650_vm4, %v1646_v6, %v1515_v49 }
 0x29a   :  { %v1348_v41 = vpop.permute.xlu0 %1347  ;;  %v1484_v58 = vpop.permute.xlu1 %1483 }
 0x29b   :  { %v1649_v36 = vsel %vm1151_vm3, %v7068_v52, %v1348_v41  ;;  %v6488_v14 = vsel %vm1717_vm5, %v1714_v40, %v1484_v58  ;;  %v1932_v17 = vsel %vm1717_vm5, %v1867_v53, %v1484_v58 }
 0x29c   :  { %v1716_v45 = vsel %vm1650_vm4, %v1649_v36, %v1415_v4 }
 0x29d   :  { %2394 = vmatmul.mubr.bf16.gmra.mrb[72].mxu1 %v6309_v9 }
 0x29e   :  { %2401 = vmatprep.mubr.bf16.mxu1 %v1932_v17  ;;  %v1517_v44 = vpop.permute.xlu1 %1516 }
 0x29f   :  { %v1869_v19 = vsel %vm1650_vm4, %v1649_v36, %v1517_v44 }
 0x2a2   :  { %v1486_v47 = vpop.permute.xlu0 %1485  ;;  %v1490_v39 = vpop.permute.xlu1 %1489 }
 0x2a3   :  { %v6495_v12 = vsel %vm1717_vm5, %v1716_v45, %v1486_v47  ;;  %v1934_v31 = vsel %vm1717_vm5, %v1869_v19, %v1486_v47  ;;  %v1819_v9 = vsel %vm1151_vm3, %v7069_v34, %v1490_v39 }
 0x2a5   :  { %2402 = vmatmul.mubr.bf16.gmra.mrb[76].mxu1 %v6340_v2  ;;  %v7070_v2 = vld [vmem:[#allocation9_spill] sm:$0xff] }
 0x2a6   :  { %2409 = vmatprep.mubr.bf16.mxu1 %v1934_v31  ;;  %v1519_v21 = vpop.permute.xlu0 %1518 }
 0x2a7   :  { %v1871_v61 = vsel %vm1650_vm4, %v1819_v9, %v1519_v21 }
 0x2aa   :  { %v1536_v4 = vpop.permute.xlu1 %1535  ;;  %v1492_v7 = vpop.permute.xlu0 %1491 }
 0x2ab   :  { %v1937_v48 = vsel %vm1717_vm5, %v1871_v61, %v1536_v4  ;;  %v1822_v63 = vsel %vm1151_vm3, %v7070_v2, %v1492_v7 }
 0x2ad   :  { %2410 = vmatmul.mubr.bf16.gmra.mrb[80].mxu1 %v6375_v60  ;;  %v7071_v60 = vld [vmem:[#allocation11_spill] sm:$0xff] }
 0x2ae   :  { %2417 = vmatprep.mubr.bf16.mxu1 %v1937_v48  ;;  %v1521_v11 = vpop.permute.xlu1 %1520 }
 0x2af   :  { %v1873_v50 = vsel %vm1650_vm4, %v1822_v63, %v1521_v11  ;;  %v1201_v11 = vld [vmem:[#allocation2] sm:$0xff] }
 0x2b2   :  { %v1538_v15 = vpop.permute.xlu0 %1537  ;;  %v1494_v18 = vpop.permute.xlu1 %1493 }
 0x2b3   :  { %v1940_v20 = vsel %vm1717_vm5, %v1873_v50, %v1538_v15  ;;  %v1825_v42 = vsel %vm1151_vm3, %v7071_v60, %v1494_v18  ;;  %v7073_v18 = vld [vmem:[#allocation13_spill] sm:$0xff] }
 0x2b5   :  { %2418 = vmatmul.mubr.bf16.gmra.mrb[84].mxu1 %v6378_v33  ;;  %v7072_v33 = vld [vmem:[#allocation12_spill] sm:$0xff] }
 0x2b6   :  { %2425 = vmatprep.mubr.bf16.mxu1 %v1940_v20  ;;  %v1523_v8 = vpop.permute.xlu0 %1522 }
 0x2b7   :  { %v1875_v5 = vsel %vm1650_vm4, %v1825_v42, %v1523_v8  ;;  %v1888_v8 = vsel %vm1717_vm5, %v6285_v25, %v7073_v18  ;;  %v7074_v42 = vmov 0.0   ;;  %v5086_v18 = vld [vmem:[#allocation2 + $0x110] sm:$0xff] }
 0x2ba   :  { %v1540_v10 = vpop.permute.xlu1 %1539  ;;  %v1496_v55 = vpop.permute.xlu0 %1495 }
 0x2bb   :  { %v1943_v46 = vsel %vm1717_vm5, %v1875_v5, %v1540_v10  ;;  %v1828_v51 = vsel %vm1151_vm3, %v7072_v33, %v1496_v55 }
 0x2bd   :  { %2426 = vmatmul.mubr.bf16.gmra.mrb[88].mxu1 %v6421_v37 }
 0x2be   :  { %2433 = vmatprep.mubr.bf16.mxu1 %v1943_v46  ;;  %v1525_v28 = vpop.permute.xlu1 %1524 }
 0x2bf   :  { %v1877_v40 = vsel %vm1650_vm4, %v1828_v51, %v1525_v28 }
 0x2c2   :  { %v1542_v6 = vpop.permute.xlu0 %1541  ;;  %v1498_v49 = vpop.permute.xlu1 %1497 }
 0x2c3   :  { %v1946_v30 = vsel %vm1717_vm5, %v1877_v40, %v1542_v6  ;;  %v1831_v37 = vsel %vm1151_vm3, %v6045_v59, %v1498_v49  ;;  %v7075_v6 = vld [vmem:[#allocation14_spill] sm:$0xff] }
 0x2c4   :  { %v1890_v25 = vsel %vm1717_vm5, %v6316_v27, %v7075_v6  ;;  %v5067_v40 = vld [vmem:[#allocation2 + $0x80] sm:$0xff] }
 0x2c5   :  { %2434 = vmatmul.mubr.bf16.gmra.mrb[92].mxu1 %v6432_v29 }
 0x2c6   :  { %2441 = vmatprep.mubr.bf16.mxu1 %v1946_v30  ;;  %v1527_v41 = vpop.permute.xlu0 %1526 }
 0x2c7   :  { %v1879_v52 = vsel %vm1650_vm4, %v1831_v37, %v1527_v41  ;;  %v7076_v41 = vld [vmem:[#allocation15_spill] sm:$0xff] }
 0x2c8   :  { %v1892_v27 = vsel %vm1717_vm5, %v6347_v54, %v7076_v41  ;;  %v5070_v54 = vld [vmem:[#allocation2 + $0x98] sm:$0xff] }
 0x2ca   :  { %v1544_v58 = vpop.permute.xlu1 %1543  ;;  %v1500_v53 = vpop.permute.xlu0 %1499 }
 0x2cb   :  { %v1949_v36 = vsel %vm1717_vm5, %v1879_v52, %v1544_v58  ;;  %v1834_v29 = vsel %vm1151_vm3, %v6083_v24, %v1500_v53  ;;  %v5068_v52 = vld [vmem:[#allocation2 + $0x88] sm:$0xff] }
 0x2cd   :  { %2442 = vmatmul.mubr.bf16.gmra.mrb[96].mxu1 %v6459_v32 }
 0x2ce   :  { %2449 = vmatprep.mubr.bf16.mxu1 %v1949_v36  ;;  %v1529_v45 = vpop.permute.xlu1 %1528 }
 0x2cf   :  { %v1881_v44 = vsel %vm1650_vm4, %v1834_v29, %v1529_v45  ;;  %v5069_v45 = vld [vmem:[#allocation2 + $0x90] sm:$0xff] }
 0x2d0   :  { %v5073_v29 = vld [vmem:[#allocation2 + $0xb0] sm:$0xff] }
 0x2d2   :  { %v1546_v17 = vpop.permute.xlu0 %1545  ;;  %v1502_v19 = vpop.permute.xlu1 %1501 }
 0x2d3   :  { %v1952_v47 = vsel %vm1717_vm5, %v1881_v44, %v1546_v17  ;;  %v1837_v32 = vsel %vm1151_vm3, %v6124_v38, %v1502_v19  ;;  %v5072_v17 = vld [vmem:[#allocation2 + $0xa8] sm:$0xff]  ;;  %v5074_v44 = vld [vmem:[#allocation2 + $0xb8] sm:$0xff]  ;;  %v997_v19 = vpop.f32.mrb[192].mxu0 }
 0x2d5   :  { %2450 = vmatmul.mubr.bf16.gmra.mrb[100].mxu1 %v6467_v56 }
 0x2d6   :  { %2457 = vmatprep.mubr.bf16.mxu1 %v1952_v47  ;;  %v1531_v31 = vpop.permute.xlu0 %1530  ;;  %v5075_v47 = vld [vmem:[#allocation2 + $0xc0] sm:$0xff] }
 0x2d7   :  { %v1883_v21 = vsel %vm1650_vm4, %v1837_v32, %v1531_v31  ;;  %v5076_v31 = vld [vmem:[%s7016_s3] ss:$0 sm:$0xff]  ;;  %v4520_v32 = vpop.f32.mrb[193].mxu0 }
 0x2da   :  { %v1548_v39 = vpop.permute.xlu1 %1547  ;;  %v1504_v34 = vpop.permute.xlu0 %1503 }
 0x2db   :  { %v1955_v4 = vsel %vm1717_vm5, %v1883_v21, %v1548_v39  ;;  %v1840_v48 = vsel %vm1151_vm3, %v6159_v62, %v1504_v34  ;;  %v998_v39 = vadd.f32 %v5076_v31, %v997_v19  ;;  %v1000_v21 = vpop.f32.mrb[194].mxu0 }
 0x2dc   :  { %v1001_v34 = vadd.f32 %v5076_v31, %v1000_v21 }
 0x2dd   :  { %2458 = vmatmul.mubr.bf16.gmra.mrb[104].mxu1 %v6479_v57 }
 0x2de   :  { %2465 = vmatprep.mubr.bf16.mxu1 %v1955_v4  ;;  %v1533_v9 = vpop.permute.xlu1 %1532  ;;  %v1100_v4 = vmax.f32 %v998_v39, 0.0 }
 0x2df   :  { %v1885_v7 = vsel %vm1650_vm4, %v1840_v48, %v1533_v9  ;;  %v4521_v9 = vpop.f32.mrb[195].mxu0  ;;  %v5077_v48 = vld [vmem:[#allocation2 + $0xc8] sm:$0xff] }
 0x2e2   :  { %v1284_v61 = vpop.permute.xlu1 %1283  ;;  %v1550_v56 = vpop.permute.xlu0 %1549 }
 0x2e3   :  { %v1958_v15 = vsel %vm1717_vm5, %v1885_v7, %v1550_v56  ;;  %v1553_v2 = vsel %vm1151_vm3, %v1201_v11, %v1284_v61  ;;  %v1101_v61 = vmax.f32 %v1001_v34, 0.0  ;;  %v5078_v7 = vld [vmem:[#allocation2 + $0xd0] sm:$0xff]  ;;  %v5079_v11 = vld [vmem:[#allocation2 + $0xd8] sm:$0xff] }
 0x2e5   :  { %2466 = vmatmul.mubr.bf16.gmra.mrb[108].mxu1 %v6488_v14  ;;  %v1150_v56 = vpack.c.bf16 %v1101_v61, %v1100_v4 }
 0x2e6   :  { %v1422_v57 = vpop.permute.xlu1 %1421  ;;  %2473 = vmatprep.mubr.bf16.mxu1 %v1958_v15  ;;  %v1351_v63 = vpop.permute.xlu0 %1350  ;;  %v5080_v15 = vld [vmem:[#allocation2 + $0xe0] sm:$0xff] }
 0x2e7   :  { %v1652_v50 = vsel %vm1650_vm4, %v1553_v2, %v1351_v63  ;;  %1200 = vst.msk [vmem:[#allocation2 + $0x180] sm:$0xff] %vm1151_vm3, %v1150_v56  ;;  %v5081_v2 = vld [vmem:[#allocation2 + $0xe8] sm:$0xff]  ;;  %v5083_v63 = vld [vmem:[#allocation2 + $0xf8] sm:$0xff] }
 0x2e8   :  { %v1719_v20 = vsel %vm1717_vm5, %v1652_v50, %v1422_v57  ;;  %v5082_v57 = vld [vmem:[#allocation2 + $0xf0] sm:$0xff]  ;;  %v5084_v50 = vld [vmem:[#allocation2 + $0x100] sm:$0xff] }
 0x2e9   :  { %2218 = vmatmul.mubr.bf16.vlgmr.msra.gmra.mrb[196].mxu0 %v1719_v20  ;;  %v5085_v20 = vld [vmem:[#allocation2 + $0x108] sm:$0xff] }
 0x2ea   :  { %v1353_v10 = vpop.permute.xlu1 %1352  ;;  %2225 = vmatprep.mubr.bf16.mxu0 %v1888_v8  ;;  %v5087_v8 = vld [vmem:[#allocation2 + $0x118] sm:$0xff] }
 0x2eb   :  { %v1286_v60 = vpop.permute.xlu0 %1285 }
 0x2ec   :  { %v1556_v14 = vsel %vm1151_vm3, %v6387_v0, %v1286_v60 }
 0x2ed   :  { %2474 = vmatmul.mubr.bf16.gmra.mrb[112].mxu1 %v6495_v12  ;;  %v1654_v55 = vsel %vm1650_vm4, %v1556_v14, %v1353_v10  ;;  %v5088_v10 = vld [vmem:[#allocation2 + $0x120] sm:$0xff] }
 0x2ee   :  { %4526 = vmatprep.mubr.msk.bf16.mxu1 %vm5091_vm0, %v7074_v42  ;;  %v1288_v5 = vpop.permute.xlu1 %1287 }
 0x2ef   :  { %v1424_v46 = vpop.permute.xlu0 %1423  ;;  %v1559_v0 = vsel %vm1151_vm3, %v6403_v16, %v1288_v5 }
 0x2f0   :  { %v1722_v28 = vsel %vm1717_vm5, %v1654_v55, %v1424_v46 }
 0x2f1   :  { %2226 = vmatmul.mubr.bf16.gmra.mrb[200].mxu0 %v1722_v28 }
 0x2f2   :  { %2233 = vmatprep.mubr.bf16.mxu0 %v1890_v25  ;;  %v1426_v12 = vpop.permute.xlu1 %1425 }
 0x2f3   :  { %v1355_v33 = vpop.permute.xlu0 %1354 }
 0x2f4   :  { %v1656_v51 = vsel %vm1650_vm4, %v1559_v0, %v1355_v33 }
 0x2f5   :  { %4527 = vmatmul.mubr.msk.bf16.vlgmr.msra.gmra.mrb[116].mxu1 %vm1151_vm3, %v5067_v40  ;;  %v1725_v49 = vsel %vm1717_vm5, %v1656_v51, %v1426_v12 }
 0x2f6   :  { %4530 = vmatprep.mubr.msk.bf16.mxu1 %vm5091_vm0, %v7074_v42  ;;  %v1357_v58 = vpop.permute.xlu1 %1356 }
 0x2f7   :  { %v1290_v30 = vpop.permute.xlu0 %1289 }
 0x2f8   :  { %v1562_v16 = vsel %vm1151_vm3, %v6418_v22, %v1290_v30  ;;  %v5071_v22 = vld [vmem:[#allocation2 + $0xa0] sm:$0xff] }
 0x2f9   :  { %2234 = vmatmul.mubr.bf16.gmra.mrb[204].mxu0 %v1725_v49  ;;  %v1658_v36 = vsel %vm1650_vm4, %v1562_v16, %v1357_v58 }
 0x2fa   :  { %2241 = vmatprep.mubr.bf16.mxu0 %v1892_v27 }
 0x2fb   :  { %v1428_v37 = vpop.permute.xlu0 %1427 }
 0x2fc   :  { %v1728_v53 = vsel %vm1717_vm5, %v1658_v36, %v1428_v37 }
 0x2fd   :  { %4531 = vmatmul.mubr.msk.bf16.gmra.mrb[120].mxu1 %vm1151_vm3, %v5068_v52 }
 0x2fe   :  { %4534 = vmatprep.mubr.msk.bf16.mxu1 %vm5091_vm0, %v7074_v42 }
 0x301   :  { %2242 = vmatmul.mubr.bf16.gmra.mrb[208].mxu0 %v1728_v53 }
 0x305   :  { %4535 = vmatmul.mubr.msk.bf16.gmra.mrb[124].mxu1 %vm1151_vm3, %v5069_v45 }
 0x306   :  { %4538 = vmatprep.mubr.msk.bf16.mxu1 %vm5091_vm0, %v7074_v42 }
 0x30d   :  { %4539 = vmatmul.mubr.msk.bf16.gmra.mrb[128].mxu1 %vm1151_vm3, %v5070_v54 }
 0x30e   :  { %4542 = vmatprep.mubr.msk.bf16.mxu1 %vm5091_vm0, %v7074_v42 }
 0x315   :  { %4543 = vmatmul.mubr.msk.bf16.gmra.mrb[0].mxu1 %vm1151_vm3, %v5071_v22 }
 0x316   :  { %4546 = vmatprep.mubr.msk.bf16.mxu1 %vm5091_vm0, %v7074_v42 }
 0x31d   :  { %4547 = vmatmul.mubr.msk.bf16.gmra.mrb[4].mxu1 %vm1151_vm3, %v5072_v17 }
 0x31e   :  { %4550 = vmatprep.mubr.msk.bf16.mxu1 %vm5091_vm0, %v7074_v42 }
 0x325   :  { %4551 = vmatmul.mubr.msk.bf16.gmra.mrb[8].mxu1 %vm1151_vm3, %v5073_v29 }
 0x326   :  { %4554 = vmatprep.mubr.msk.bf16.mxu1 %vm5091_vm0, %v7074_v42 }
 0x32d   :  { %4555 = vmatmul.mubr.msk.bf16.gmra.mrb[12].mxu1 %vm1151_vm3, %v5074_v44 }
 0x32e   :  { %4558 = vmatprep.mubr.msk.bf16.mxu1 %vm5091_vm0, %v7074_v42 }
 0x335   :  { %4559 = vmatmul.mubr.msk.bf16.gmra.mrb[16].mxu1 %vm1151_vm3, %v5075_v47 }
 0x336   :  { %4562 = vmatprep.mubr.msk.bf16.mxu1 %vm5091_vm0, %v7074_v42 }
 0x33d   :  { %4563 = vmatmul.mubr.msk.bf16.gmra.mrb[20].mxu1 %vm1151_vm3, %v5077_v48 }
 0x33e   :  { %4566 = vmatprep.mubr.msk.bf16.mxu1 %vm5091_vm0, %v7074_v42 }
 0x345   :  { %4567 = vmatmul.mubr.msk.bf16.gmra.mrb[24].mxu1 %vm1151_vm3, %v5078_v7 }
 0x346   :  { %4570 = vmatprep.mubr.msk.bf16.mxu1 %vm5091_vm0, %v7074_v42 }
 0x34d   :  { %4571 = vmatmul.mubr.msk.bf16.gmra.mrb[28].mxu1 %vm1151_vm3, %v5079_v11 }
 0x34e   :  { %4574 = vmatprep.mubr.msk.bf16.mxu1 %vm5091_vm0, %v7074_v42 }
 0x355   :  { %4575 = vmatmul.mubr.msk.bf16.gmra.mrb[32].mxu1 %vm1151_vm3, %v5080_v15 }
 0x356   :  { %4578 = vmatprep.mubr.msk.bf16.mxu1 %vm5091_vm0, %v7074_v42 }
 0x35d   :  { %4579 = vmatmul.mubr.msk.bf16.gmra.mrb[36].mxu1 %vm1151_vm3, %v5081_v2 }
 0x35e   :  { %4582 = vmatprep.mubr.msk.bf16.mxu1 %vm5091_vm0, %v7074_v42 }
 0x365   :  { %4583 = vmatmul.mubr.msk.bf16.gmra.mrb[40].mxu1 %vm1151_vm3, %v5082_v57 }
 0x366   :  { %4586 = vmatprep.mubr.msk.bf16.mxu1 %vm5091_vm0, %v7074_v42 }
 0x36d   :  { %4587 = vmatmul.mubr.msk.bf16.gmra.mrb[44].mxu1 %vm1151_vm3, %v5083_v63 }
 0x36e   :  { %4590 = vmatprep.mubr.msk.bf16.mxu1 %vm5091_vm0, %v7074_v42 }
 0x375   :  { %4591 = vmatmul.mubr.msk.bf16.gmra.mrb[48].mxu1 %vm1151_vm3, %v5084_v50 }
 0x376   :  { %4594 = vmatprep.mubr.msk.bf16.mxu1 %vm5091_vm0, %v7074_v42 }
 0x37d   :  { %4595 = vmatmul.mubr.msk.bf16.gmra.mrb[52].mxu1 %vm1151_vm3, %v5085_v20 }
 0x37e   :  { %4598 = vmatprep.mubr.msk.bf16.mxu1 %vm5091_vm0, %v7074_v42 }
 0x385   :  { %4599 = vmatmul.mubr.msk.bf16.gmra.mrb[56].mxu1 %vm1151_vm3, %v5086_v18 }
 0x386   :  { %4602 = vmatprep.mubr.msk.bf16.mxu1 %vm5091_vm0, %v7074_v42 }
 0x38d   :  { %4603 = vmatmul.mubr.msk.bf16.gmra.mrb[60].mxu1 %vm1151_vm3, %v5087_v8 }
 0x38e   :  { %4606 = vmatprep.mubr.msk.bf16.mxu1 %vm5091_vm0, %v7074_v42 }
 0x395   :  { %4607 = vmatmul.mubr.msk.bf16.gmra.mrb[64].mxu1 %vm1151_vm3, %v5088_v10 }
 0x396   :  { %4610 = vmatprep.mubr.msk.bf16.mxu1 %vm5091_vm0, %v7074_v42 }
 0x39d   :  { %4611 = vmatmul.mubr.msk.bf16.gmra.mrb[68].mxu1 %vm1151_vm3, %v6045_v59 }
 0x39e   :  { %4614 = vmatprep.mubr.msk.bf16.mxu1 %vm5091_vm0, %v7074_v42 }
 0x3a5   :  { %4615 = vmatmul.mubr.msk.bf16.gmra.mrb[72].mxu1 %vm1151_vm3, %v6083_v24 }
 0x3a6   :  { %4618 = vmatprep.mubr.msk.bf16.mxu1 %vm5091_vm0, %v7074_v42 }
 0x3ad   :  { %4619 = vmatmul.mubr.msk.bf16.gmra.mrb[76].mxu1 %vm1151_vm3, %v6124_v38  ;;  %v6657_v38 = vld [vmem:[%s7018_s5] ss:$0 sm:$0xff] }
 0x3ae   :  { %4622 = vmatprep.mubr.msk.bf16.mxu1 %vm5091_vm0, %v7074_v42 }
 0x3b5   :  { %4623 = vmatmul.mubr.msk.bf16.gmra.mrb[80].mxu1 %vm1151_vm3, %v6159_v62 }
 0x3b6   :  { %4626 = vmatprep.mubr.msk.bf16.mxu1 %vm5091_vm0, %v7074_v42 }
 0x3bc   :  { %v2219_v59 = vpop.f32.mrb[196].mxu0 }
 0x3bd   :  { %v2221_v60 = vpop.f32.mrb[197].mxu0  ;;  %4627 = vmatmul.mubr.msk.bf16.gmra.mrb[84].mxu1 %vm1151_vm3, %v6198_v1  ;;  %v2220_v1 = vadd.f32 %v6657_v38, %v2219_v59 }
 0x3be   :  { %v2222_v24 = vpop.f32.mrb[198].mxu0  ;;  %4630 = vmatprep.mubr.msk.bf16.mxu1 %vm5091_vm0, %v7074_v42 }
 0x3bf   :  { %v2224_v14 = vpop.f32.mrb[199].mxu0  ;;  %v2223_v6 = vadd.f32 %v6657_v38, %v2222_v24 }
 0x3c4   :  { %v2227_v5 = vpop.f32.mrb[200].mxu0 }
 0x3c5   :  { %v2229_v62 = vpop.f32.mrb[201].mxu0  ;;  %4631 = vmatmul.mubr.msk.bf16.gmra.mrb[88].mxu1 %vm1151_vm3, %v6233_v35  ;;  %v2228_v27 = vadd.f32 %v6657_v38, %v2227_v5 }
 0x3c6   :  { %v2230_v46 = vpop.f32.mrb[202].mxu0  ;;  %4634 = vmatprep.mubr.msk.bf16.mxu1 %vm5091_vm0, %v7074_v42 }
 0x3c7   :  { %v2232_v55 = vpop.f32.mrb[203].mxu0  ;;  %v2231_v52 = vadd.f32 %v6657_v38, %v2230_v46 }
 0x3c8   :  { %v2516_v28 = vpop.f32.mrb[116].mxu1 }
 0x3c9   :  { %v2517_v25 = vadd.f32 %v2516_v28, %v2220_v1  ;;  %v4528_v33 = vpop.f32.mrb[117].mxu1 }
 0x3ca   :  { %v2519_v0 = vpop.f32.mrb[118].mxu1 }
 0x3cb   :  { %v2520_v12 = vadd.f32 %v2519_v0, %v2223_v6  ;;  %v4529_v51 = vpop.f32.mrb[119].mxu1  ;;  %v2779_v30 = vmax.f32 %v2517_v25, 0.0 }
 0x3cc   :  { %v2235_v40 = vpop.f32.mrb[204].mxu0 }
 0x3cd   :  { %v2780_v49 = vmax.f32 %v2520_v12, 0.0  ;;  %v2237_v41 = vpop.f32.mrb[205].mxu0  ;;  %4635 = vmatmul.mubr.msk.bf16.gmra.mrb[92].mxu1 %vm1151_vm3, %v6264_v23  ;;  %v2236_v19 = vadd.f32 %v6657_v38, %v2235_v40  ;;  %v1249_v12 = vld [vmem:[#allocation2 + $0x180] sm:$0xff] }
 0x3ce   :  { %v2238_v35 = vpop.f32.mrb[206].mxu0  ;;  %4638 = vmatprep.mubr.msk.bf16.mxu1 %vm5091_vm0, %v7074_v42  ;;  %v4995_v40 = vld [vmem:[%s7019_s6] sm:$0xff]   ;;  %v4996_v41 = vld [vmem:[%s7019_s6 + $0x48] sm:$0xff]  }
 0x3cf   :  { %v2845_v58 = vpack.c.bf16 %v2780_v49, %v2779_v30  ;;  %v2240_v16 = vpop.f32.mrb[207].mxu0  ;;  %v2239_v21 = vadd.f32 %v6657_v38, %v2238_v35 }
 0x3d0   :  { %v2524_v37 = vpop.f32.mrb[120].mxu1  ;;  %v4998_v16 = vld [vmem:[%s7019_s6 + $0x50] sm:$0xff]  }
 0x3d1   :  { %2878 = vst.msk [vmem:[#allocation3] sm:$0xff] %vm1151_vm3, %v2845_v58  ;;  %v2525_v36 = vadd.f32 %v2524_v37, %v2228_v27  ;;  %v4532_v53 = vpop.f32.mrb[121].mxu1  ;;  %v4997_v27 = vld [vmem:[%s7019_s6 + $0x8] sm:$0xff]   ;;  %v4999_v37 = vld [vmem:[%s7019_s6 + $0x10] sm:$0xff]  }
 0x3d2   :  { %v2527_v45 = vpop.f32.mrb[122].mxu1 }
 0x3d3   :  { %v2528_v54 = vadd.f32 %v2527_v45, %v2231_v52  ;;  %v4533_v22 = vpop.f32.mrb[123].mxu1  ;;  %v2781_v23 = vmax.f32 %v2525_v36, 0.0  ;;  %v5000_v45 = vld [vmem:[%s7019_s6 + $0x58] sm:$0xff]  }
 0x3d4   :  { %v2243_v17 = vpop.f32.mrb[208].mxu0  ;;  %v5001_v22 = vld [vmem:[%s7019_s6 + $0x18] sm:$0xff]  }
 0x3d5   :  { %v2782_v29 = vmax.f32 %v2528_v54, 0.0  ;;  %v2245_v44 = vpop.f32.mrb[209].mxu0  ;;  %4639 = vmatmul.mubr.msk.bf16.gmra.mrb[96].mxu1 %vm1151_vm3, %v6295_v26  ;;  %v2244_v7 = vadd.f32 %v6657_v38, %v2243_v17 }
 0x3d6   :  { %v2246_v47 = vpop.f32.mrb[210].mxu0  ;;  %4642 = vmatprep.mubr.msk.bf16.mxu1 %vm5091_vm0, %v7074_v42 }
 0x3d7   :  { %v2846_v31 = vpack.c.bf16 %v2782_v29, %v2781_v23  ;;  %v2248_v39 = vpop.f32.mrb[211].mxu0  ;;  %v2247_v57 = vadd.f32 %v6657_v38, %v2246_v47  ;;  %v5002_v47 = vld [vmem:[%s7019_s6 + $0x60] sm:$0xff]  }
 0x3d8   :  { %v2532_v32 = vpop.f32.mrb[124].mxu1 }
 0x3d9   :  { %2879 = vst.msk [vmem:[#allocation3 + $0x8] sm:$0xff] %vm1151_vm3, %v2846_v31  ;;  %v2533_v4 = vadd.f32 %v2532_v32, %v2236_v19  ;;  %v4536_v34 = vpop.f32.mrb[125].mxu1  ;;  %v5003_v19 = vld [vmem:[%s7019_s6 + $0x20] sm:$0xff]  }
 0x3da   :  { %v2535_v9 = vpop.f32.mrb[126].mxu1 }
 0x3db   :  { %v2536_v61 = vadd.f32 %v2535_v9, %v2239_v21  ;;  %v4537_v56 = vpop.f32.mrb[127].mxu1  ;;  %v2783_v48 = vmax.f32 %v2533_v4, 0.0  ;;  %v5004_v4 = vld [vmem:[%s7019_s6 + $0x68] sm:$0xff]  }
 0x3dc   :  { %v5005_v9 = vld [vmem:[%s7019_s6 + $0x28] sm:$0xff]  }
 0x3dd   :  { %v2784_v26 = vmax.f32 %v2536_v61, 0.0  ;;  %4643 = vmatmul.mubr.msk.bf16.gmra.mrb[100].mxu1 %vm1151_vm3, %v6326_v43 }
 0x3de   :  { %4646 = vmatprep.mubr.msk.bf16.mxu1 %vm5091_vm0, %v7074_v42 }
 0x3df   :  { %v2847_v11 = vpack.c.bf16 %v2784_v26, %v2783_v48 }
 0x3e0   :  { %v2540_v15 = vpop.f32.mrb[128].mxu1  ;;  %v2912_v2 = vld [vmem:[#allocation3 + $0x8] sm:$0xff] }
 0x3e1   :  { %2880 = vst.msk [vmem:[#allocation3 + $0x10] sm:$0xff] %vm1151_vm3, %v2847_v11  ;;  %v2541_v63 = vadd.f32 %v2540_v15, %v2244_v7  ;;  %v4540_v50 = vpop.f32.mrb[129].mxu1  ;;  %2937 = vrot.lane.b32.xlu0 %v2912_v2, %s5092_s30  ;;  %v5006_v7 = vld [vmem:[%s7019_s6 + $0x70] sm:$0xff]  }
 0x3e2   :  { %v2543_v20 = vpop.f32.mrb[130].mxu1  ;;  %v5007_v11 = vld [vmem:[%s7019_s6 + $0x30] sm:$0xff]  }
 0x3e3   :  { %v2544_v18 = vadd.f32 %v2543_v20, %v2247_v57  ;;  %v4541_v8 = vpop.f32.mrb[131].mxu1  ;;  %v2785_v43 = vmax.f32 %v2541_v63, 0.0  ;;  %v5008_v20 = vld [vmem:[%s7019_s6 + $0x78] sm:$0xff]  }
 0x3e4   :  { %v5009_v8 = vld [vmem:[%s7019_s6 + $0x38] sm:$0xff]  }
 0x3e5   :  { %v2786_v10 = vmax.f32 %v2544_v18, 0.0  ;;  %4647 = vmatmul.mubr.msk.bf16.gmra.mrb[104].mxu1 %vm1151_vm3, %v6359_v13 }
 0x3e6   :  { %4650 = vmatprep.mubr.msk.bf16.mxu1 %vm5091_vm0, %v7074_v42 }
 0x3e7   :  { %v2848_v59 = vpack.c.bf16 %v2786_v10, %v2785_v43 }
 0x3e8   :  { %v2548_v60 = vpop.f32.mrb[0].mxu1  ;;  %v2913_v24 = vld [vmem:[#allocation3 + $0x10] sm:$0xff] }
 0x3e9   :  { %2881 = vst.msk [vmem:[#allocation3 + $0x18] sm:$0xff] %vm1151_vm3, %v2848_v59  ;;  %v4744_v14 = vadd.f32 %v6657_v38, %v2548_v60  ;;  %v4544_v5 = vpop.f32.mrb[1].mxu1  ;;  %2940 = vrot.lane.b32.xlu0 %v2913_v24, %s5093_s20 }
 0x3ea   :  { %v2551_v62 = vpop.f32.mrb[2].mxu1 }
 0x3eb   :  { %v4745_v46 = vadd.f32 %v6657_v38, %v2551_v62  ;;  %v4545_v1 = vpop.f32.mrb[3].mxu1  ;;  %v2787_v55 = vmax.f32 %v4744_v14, 0.0 }
 0x3ed   :  { %v2788_v28 = vmax.f32 %v4745_v46, 0.0  ;;  %4651 = vmatmul.mubr.msk.bf16.gmra.mrb[108].mxu1 %vm1151_vm3, %v6389_v3  ;;  %v4994_v3 = vld [vmem:[%s7019_s6 + $0x40] sm:$0xff]  }
 0x3ee   :  { %4654 = vmatprep.mubr.msk.bf16.mxu1 %vm5091_vm0, %v7074_v42  ;;  %4240 = vmatprep.subr.bf16.mxu0 %v4994_v3 }
 0x3ef   :  { %v2849_v13 = vpack.c.bf16 %v2788_v28, %v2787_v55  ;;  %4241 = vmatpush3.bf16.msra.mxu0 %v4995_v40 }
 0x3f0   :  { %v2556_v6 = vpop.f32.mrb[4].mxu1  ;;  %v2914_v25 = vld [vmem:[#allocation3 + $0x18] sm:$0xff]  ;;  %4242 = vmatprep.subr.bf16.mxu0 %v4996_v41 }
 0x3f1   :  { %2882 = vst.msk [vmem:[#allocation3 + $0x20] sm:$0xff] %vm1151_vm3, %v2849_v13  ;;  %v4548_v33 = vpop.f32.mrb[5].mxu1  ;;  %2943 = vrot.lane.b32.xlu0 %v2914_v25, %s5095_s27 }
 0x3f2   :  { %v2559_v0 = vpop.f32.mrb[6].mxu1 }
 0x3f3   :  { %v4549_v51 = vpop.f32.mrb[7].mxu1  ;;  %4243 = vmatpush3.bf16.msra.mxu0 %v4997_v27 }
 0x3f4   :  { %4244 = vmatprep.subr.bf16.mxu0 %v4998_v16 }
 0x3f5   :  { %4655 = vmatmul.mubr.msk.bf16.gmra.mrb[112].mxu1 %vm1151_vm3, %v1249_v12 }
 0x3f7   :  { %4245 = vmatpush3.bf16.msra.mxu0 %v4999_v37 }
 0x3f8   :  { %v2564_v30 = vpop.f32.mrb[8].mxu1  ;;  %4246 = vmatprep.subr.bf16.mxu0 %v5000_v45 }
 0x3f9   :  { %v4552_v49 = vpop.f32.mrb[9].mxu1 }
 0x3fa   :  { %v2567_v35 = vpop.f32.mrb[10].mxu1 }
 0x3fb   :  { %v4553_v58 = vpop.f32.mrb[11].mxu1  ;;  %4247 = vmatpush3.bf16.msra.mxu0 %v5001_v22 }
 0x3fc   :  { %4248 = vmatprep.subr.bf16.mxu0 %v5002_v47 }
 0x3ff   :  { %4249 = vmatpush3.bf16.msra.mxu0 %v5003_v19 }
 0x400   :  { %v2572_v52 = vpop.f32.mrb[12].mxu1  ;;  %4250 = vmatprep.subr.bf16.mxu0 %v5004_v4 }
 0x401   :  { %v4750_v36 = vadd.f32 %v6657_v38, %v2572_v52  ;;  %v4556_v53 = vpop.f32.mrb[13].mxu1 }
 0x402   :  { %v2575_v54 = vpop.f32.mrb[14].mxu1 }
 0x403   :  { %v2793_v17 = vmax.f32 %v4750_v36, 0.0  ;;  %v4751_v23 = vadd.f32 %v6657_v38, %v2575_v54  ;;  %v4557_v29 = vpop.f32.mrb[15].mxu1  ;;  %4251 = vmatpush3.bf16.msra.mxu0 %v5005_v9 }
 0x404   :  { %4252 = vmatprep.subr.bf16.mxu0 %v5006_v7 }
 0x405   :  { %v2794_v44 = vmax.f32 %v4751_v23, 0.0 }
 0x407   :  { %v2852_v31 = vpack.c.bf16 %v2794_v44, %v2793_v17  ;;  %4253 = vmatpush3.bf16.msra.mxu0 %v5007_v11 }
 0x408   :  { %v2580_v39 = vpop.f32.mrb[16].mxu1  ;;  %4254 = vmatprep.subr.bf16.mxu0 %v5008_v20 }
 0x409   :  { %2885 = vst.msk [vmem:[#allocation3 + $0x38] sm:$0xff] %vm1151_vm3, %v2852_v31  ;;  %v4752_v32 = vadd.f32 %v6657_v38, %v2580_v39  ;;  %v4560_v21 = vpop.f32.mrb[17].mxu1 }
 0x40a   :  { %v2583_v34 = vpop.f32.mrb[18].mxu1 }
 0x40b   :  { %v2795_v61 = vmax.f32 %v4752_v32, 0.0  ;;  %v4753_v56 = vadd.f32 %v6657_v38, %v2583_v34  ;;  %v4561_v48 = vpop.f32.mrb[19].mxu1  ;;  %4255 = vmatpush3.bf16.msra.mxu0 %v5009_v8 }
 0x40d   :  { %v2796_v26 = vmax.f32 %v4753_v56, 0.0 }
 0x40f   :  { %v2853_v15 = vpack.c.bf16 %v2796_v26, %v2795_v61 }
 0x410   :  { %v2588_v2 = vpop.f32.mrb[20].mxu1  ;;  %v2916_v57 = vld [vmem:[#allocation3 + $0x38] sm:$0xff] }
 0x411   :  { %2886 = vst.msk [vmem:[#allocation3 + $0x40] sm:$0xff] %vm1151_vm3, %v2853_v15  ;;  %v4754_v63 = vadd.f32 %v6657_v38, %v2588_v2  ;;  %2946 = vrot.lane.b32.xlu1 %v2916_v57, %s5092_s30  ;;  %v4564_v50 = vpop.f32.mrb[21].mxu1 }
 0x412   :  { %v2591_v18 = vpop.f32.mrb[22].mxu1 }
 0x413   :  { %v4755_v43 = vadd.f32 %v6657_v38, %v2591_v18  ;;  %v4565_v10 = vpop.f32.mrb[23].mxu1  ;;  %v2797_v59 = vmax.f32 %v4754_v63, 0.0 }
 0x415   :  { %v2798_v60 = vmax.f32 %v4755_v43, 0.0 }
 0x417   :  { %v2854_v24 = vpack.c.bf16 %v2798_v60, %v2797_v59 }
 0x418   :  { %v2596_v14 = vpop.f32.mrb[24].mxu1  ;;  %v2917_v5 = vld [vmem:[#allocation3 + $0x40] sm:$0xff] }
 0x419   :  { %2887 = vst.msk [vmem:[#allocation3 + $0x48] sm:$0xff] %vm1151_vm3, %v2854_v24  ;;  %v4756_v62 = vadd.f32 %v6657_v38, %v2596_v14  ;;  %2949 = vrot.lane.b32.xlu1 %v2917_v5, %s5093_s20  ;;  %v4568_v46 = vpop.f32.mrb[25].mxu1 }
 0x41a   :  { %v2599_v1 = vpop.f32.mrb[26].mxu1 }
 0x41b   :  { %v4757_v55 = vadd.f32 %v6657_v38, %v2599_v1  ;;  %v4569_v28 = vpop.f32.mrb[27].mxu1  ;;  %v2799_v13 = vmax.f32 %v4756_v62, 0.0  ;;  %v5010_v62 = vld [vmem:[%s7019_s6 + $0xc0] sm:$0xff]  }
 0x41c   :  { %4262 = vmatprep.subr.bf16.mxu0 %v5010_v62 }
 0x41d   :  { %v2800_v6 = vmax.f32 %v4757_v55, 0.0 }
 0x41f   :  { %v2855_v25 = vpack.c.bf16 %v2800_v6, %v2799_v13 }
 0x420   :  { %v2604_v33 = vpop.f32.mrb[28].mxu1  ;;  %v2918_v0 = vld [vmem:[#allocation3 + $0x48] sm:$0xff] }
 0x421   :  { %2888 = vst.msk [vmem:[#allocation3 + $0x50] sm:$0xff] %vm1151_vm3, %v2855_v25  ;;  %v4758_v12 = vadd.f32 %v6657_v38, %v2604_v33  ;;  %2952 = vrot.lane.b32.xlu1 %v2918_v0, %s5095_s27  ;;  %v4572_v51 = vpop.f32.mrb[29].mxu1 }
 0x422   :  { %v2607_v3 = vpop.f32.mrb[30].mxu1 }
 0x423   :  { %v4759_v40 = vadd.f32 %v6657_v38, %v2607_v3  ;;  %v4573_v30 = vpop.f32.mrb[31].mxu1  ;;  %v2801_v49 = vmax.f32 %v4758_v12, 0.0 }
 0x425   :  { %v2802_v41 = vmax.f32 %v4759_v40, 0.0 }
 0x427   :  { %v2856_v35 = vpack.c.bf16 %v2802_v41, %v2801_v49 }
 0x428   :  { %v2612_v27 = vpop.f32.mrb[32].mxu1 }
 0x429   :  { %2889 = vst.msk [vmem:[#allocation3 + $0x58] sm:$0xff] %vm1151_vm3, %v2856_v35  ;;  %v4576_v58 = vpop.f32.mrb[33].mxu1 }
 0x42a   :  { %v2615_v16 = vpop.f32.mrb[34].mxu1 }
 0x42b   :  { %v4577_v37 = vpop.f32.mrb[35].mxu1 }
 0x430   :  { %v2620_v52 = vpop.f32.mrb[36].mxu1  ;;  %v2920_v36 = vld [vmem:[#allocation3 + $0x58] sm:$0xff] }
 0x431   :  { %v4580_v53 = vpop.f32.mrb[37].mxu1  ;;  %2955 = vrot.lane.b32.xlu0 %v2920_v36, %s5092_s30 }
 0x432   :  { %v2623_v45 = vpop.f32.mrb[38].mxu1 }
 0x433   :  { %v4581_v54 = vpop.f32.mrb[39].mxu1 }
 0x438   :  { %v2628_v22 = vpop.f32.mrb[40].mxu1 }
 0x439   :  { %v4764_v17 = vadd.f32 %v6657_v38, %v2628_v22  ;;  %v4584_v23 = vpop.f32.mrb[41].mxu1 }
 0x43a   :  { %v2631_v29 = vpop.f32.mrb[42].mxu1 }
 0x43b   :  { %v4765_v44 = vadd.f32 %v6657_v38, %v2631_v29  ;;  %v4585_v47 = vpop.f32.mrb[43].mxu1  ;;  %v2807_v19 = vmax.f32 %v4764_v17, 0.0 }
 0x43d   :  { %v2808_v31 = vmax.f32 %v4765_v44, 0.0 }
 0x43f   :  { %v2859_v39 = vpack.c.bf16 %v2808_v31, %v2807_v19 }
 0x440   :  { %v2636_v32 = vpop.f32.mrb[44].mxu1 }
 0x441   :  { %2892 = vst.msk [vmem:[#allocation3 + $0x70] sm:$0xff] %vm1151_vm3, %v2859_v39  ;;  %v4766_v21 = vadd.f32 %v6657_v38, %v2636_v32  ;;  %v4588_v4 = vpop.f32.mrb[45].mxu1 }
 0x442   :  { %v2639_v34 = vpop.f32.mrb[46].mxu1 }
 0x443   :  { %v4767_v9 = vadd.f32 %v6657_v38, %v2639_v34  ;;  %v4589_v61 = vpop.f32.mrb[47].mxu1  ;;  %v2809_v56 = vmax.f32 %v4766_v21, 0.0 }
 0x445   :  { %v2810_v48 = vmax.f32 %v4767_v9, 0.0 }
 0x447   :  { %v2860_v26 = vpack.c.bf16 %v2810_v48, %v2809_v56 }
 0x448   :  { %v2644_v7 = vpop.f32.mrb[48].mxu1  ;;  %v2921_v11 = vld [vmem:[#allocation3 + $0x70] sm:$0xff] }
 0x449   :  { %2893 = vst.msk [vmem:[#allocation3 + $0x78] sm:$0xff] %vm1151_vm3, %v2860_v26  ;;  %v4768_v15 = vadd.f32 %v6657_v38, %v2644_v7  ;;  %v4592_v2 = vpop.f32.mrb[49].mxu1  ;;  %2958 = vrot.lane.b32.xlu0 %v2921_v11, %s5093_s20 }
 0x44a   :  { %v2647_v57 = vpop.f32.mrb[50].mxu1 }
 0x44b   :  { %v4769_v63 = vadd.f32 %v6657_v38, %v2647_v57  ;;  %v4593_v50 = vpop.f32.mrb[51].mxu1  ;;  %v2811_v20 = vmax.f32 %v4768_v15, 0.0 }
 0x44d   :  { %v2812_v18 = vmax.f32 %v4769_v63, 0.0 }
 0x44f   :  { %v2861_v8 = vpack.c.bf16 %v2812_v18, %v2811_v20 }
 0x450   :  { %v2652_v43 = vpop.f32.mrb[52].mxu1  ;;  %v2922_v10 = vld [vmem:[#allocation3 + $0x78] sm:$0xff] }
 0x451   :  { %2894 = vst.msk [vmem:[#allocation3 + $0x80] sm:$0xff] %vm1151_vm3, %v2861_v8  ;;  %v4770_v59 = vadd.f32 %v6657_v38, %v2652_v43  ;;  %v4596_v60 = vpop.f32.mrb[53].mxu1  ;;  %2961 = vrot.lane.b32.xlu0 %v2922_v10, %s5095_s27 }
 0x452   :  { %v2655_v24 = vpop.f32.mrb[54].mxu1 }
 0x453   :  { %v4771_v14 = vadd.f32 %v6657_v38, %v2655_v24  ;;  %v4597_v5 = vpop.f32.mrb[55].mxu1  ;;  %v2813_v46 = vmax.f32 %v4770_v59, 0.0  ;;  %v2938_v8 = vpop.permute.xlu0 %2937 }
 0x455   :  { %v2814_v1 = vmax.f32 %v4771_v14, 0.0 }
 0x457   :  { %v2862_v55 = vpack.c.bf16 %v2814_v1, %v2813_v46 }
 0x458   :  { %v2660_v28 = vpop.f32.mrb[56].mxu1 }
 0x459   :  { %2895 = vst.msk [vmem:[#allocation3 + $0x88] sm:$0xff] %vm1151_vm3, %v2862_v55  ;;  %v4772_v13 = vadd.f32 %v6657_v38, %v2660_v28  ;;  %v4600_v6 = vpop.f32.mrb[57].mxu1  ;;  %v2915_v28 = vld [vmem:[#allocation3 + $0x20] sm:$0xff] }
 0x45a   :  { %v2663_v25 = vpop.f32.mrb[58].mxu1 }
 0x45b   :  { %v4773_v33 = vadd.f32 %v6657_v38, %v2663_v25  ;;  %v4601_v0 = vpop.f32.mrb[59].mxu1  ;;  %v2815_v12 = vmax.f32 %v4772_v13, 0.0  ;;  %v2941_v5 = vpop.permute.xlu0 %2940  ;;  %v2911_v25 = vld [vmem:[#allocation3] sm:$0xff] }
 0x45d   :  { %v2816_v51 = vmax.f32 %v4773_v33, 0.0 }
 0x45f   :  { %v2863_v3 = vpack.c.bf16 %v2816_v51, %v2815_v12  ;;  %v2974_v51 = vsel %vm1151_vm3, %v2911_v25, %v2938_v8 }
 0x460   :  { %v2668_v40 = vpop.f32.mrb[60].mxu1  ;;  %v2924_v30 = vld [vmem:[#allocation3 + $0x88] sm:$0xff] }
 0x461   :  { %2896 = vst.msk [vmem:[#allocation3 + $0x90] sm:$0xff] %vm1151_vm3, %v2863_v3  ;;  %2964 = vrot.lane.b32.xlu1 %v2924_v30, %s5092_s30  ;;  %v4604_v49 = vpop.f32.mrb[61].mxu1 }
 0x462   :  { %v2671_v41 = vpop.f32.mrb[62].mxu1 }
 0x463   :  { %v4605_v35 = vpop.f32.mrb[63].mxu1  ;;  %v2944_v33 = vpop.permute.xlu0 %2943  ;;  %v5011_v41 = vld [vmem:[%s7019_s6 + $0x80] sm:$0xff]  }
 0x464   :  { %v2976_v35 = vsel %vm1650_vm4, %v2974_v51, %v2941_v5 }
 0x468   :  { %v2676_v27 = vpop.f32.mrb[64].mxu1  ;;  %v2925_v58 = vld [vmem:[#allocation3 + $0x90] sm:$0xff] }
 0x469   :  { %2967 = vrot.lane.b32.xlu1 %v2925_v58, %s5093_s20  ;;  %v4608_v16 = vpop.f32.mrb[65].mxu1  ;;  %v5012_v58 = vld [vmem:[%s7019_s6 + $0xc8] sm:$0xff]  }
 0x46a   :  { %v2679_v37 = vpop.f32.mrb[66].mxu1  ;;  %v2978_v16 = vsel %vm1717_vm5, %v2976_v35, %v2944_v33 }
 0x46b   :  { %v4609_v52 = vpop.f32.mrb[67].mxu1 }
 0x470   :  { %v2684_v36 = vpop.f32.mrb[68].mxu1 }
 0x471   :  { %v4778_v53 = vadd.f32 %v6657_v38, %v2684_v36  ;;  %v4612_v45 = vpop.f32.mrb[69].mxu1  ;;  %v5013_v36 = vld [vmem:[%s7019_s6 + $0x88] sm:$0xff]  }
 0x472   :  { %v2687_v54 = vpop.f32.mrb[70].mxu1 }
 0x473   :  { %v4779_v22 = vadd.f32 %v6657_v38, %v2687_v54  ;;  %v4613_v17 = vpop.f32.mrb[71].mxu1  ;;  %v2821_v23 = vmax.f32 %v4778_v53, 0.0  ;;  %v5014_v54 = vld [vmem:[%s7019_s6 + $0xd0] sm:$0xff]  }
 0x475   :  { %v2822_v29 = vmax.f32 %v4779_v22, 0.0 }
 0x477   :  { %v2866_v44 = vpack.c.bf16 %v2822_v29, %v2821_v23  ;;  %v5015_v29 = vld [vmem:[%s7019_s6 + $0x90] sm:$0xff]  }
 0x478   :  { %v2692_v47 = vpop.f32.mrb[72].mxu1 }
 0x479   :  { %2899 = vst.msk [vmem:[#allocation3 + $0xa8] sm:$0xff] %vm1151_vm3, %v2866_v44  ;;  %v4780_v19 = vadd.f32 %v6657_v38, %v2692_v47  ;;  %v4616_v31 = vpop.f32.mrb[73].mxu1  ;;  %v5016_v44 = vld [vmem:[%s7019_s6 + $0xd8] sm:$0xff]  }
 0x47a   :  { %v2695_v39 = vpop.f32.mrb[74].mxu1  ;;  %v5017_v47 = vld [vmem:[%s7019_s6 + $0x98] sm:$0xff]  }
 0x47b   :  { %v4781_v32 = vadd.f32 %v6657_v38, %v2695_v39  ;;  %v4617_v21 = vpop.f32.mrb[75].mxu1  ;;  %v2823_v4 = vmax.f32 %v4780_v19, 0.0  ;;  %v5018_v39 = vld [vmem:[%s7019_s6 + $0xe0] sm:$0xff]  }
 0x47d   :  { %v2824_v34 = vmax.f32 %v4781_v32, 0.0 }
 0x47f   :  { %v2867_v9 = vpack.c.bf16 %v2824_v34, %v2823_v4  ;;  %v5019_v34 = vld [vmem:[%s7019_s6 + $0xa0] sm:$0xff]  }
 0x480   :  { %v2700_v61 = vpop.f32.mrb[76].mxu1  ;;  %v2926_v56 = vld [vmem:[#allocation3 + $0xa8] sm:$0xff] }
 0x481   :  { %2900 = vst.msk [vmem:[#allocation3 + $0xb0] sm:$0xff] %vm1151_vm3, %v2867_v9  ;;  %v4782_v48 = vadd.f32 %v6657_v38, %v2700_v61  ;;  %2970 = vrot.lane.b32.xlu1 %v2926_v56, %s5095_s27  ;;  %v4620_v26 = vpop.f32.mrb[77].mxu1  ;;  %v5020_v9 = vld [vmem:[%s7019_s6 + $0xe8] sm:$0xff]  }
 0x482   :  { %v2703_v7 = vpop.f32.mrb[78].mxu1  ;;  %v5021_v61 = vld [vmem:[%s7019_s6 + $0xa8] sm:$0xff]   ;;  %v5089_v26 = vld [vmem:[%s7018_s5] ss:$0 sm:$0xff] }
 0x483   :  { %v4783_v11 = vadd.f32 %v6657_v38, %v2703_v7  ;;  %v4621_v15 = vpop.f32.mrb[79].mxu1  ;;  %v2825_v2 = vmax.f32 %v4782_v48, 0.0  ;;  %v2947_v10 = vpop.permute.xlu1 %2946  ;;  %v5022_v48 = vld [vmem:[%s7019_s6 + $0xf0] sm:$0xff]  }
 0x484   :  { %v2982_v0 = vsel %vm1151_vm3, %v2915_v28, %v2947_v10 }
 0x485   :  { %v2826_v57 = vmax.f32 %v4783_v11, 0.0 }
 0x487   :  { %v2868_v63 = vpack.c.bf16 %v2826_v57, %v2825_v2 }
 0x488   :  { %v2708_v50 = vpop.f32.mrb[80].mxu1 }
 0x489   :  { %2901 = vst.msk [vmem:[#allocation3 + $0xb8] sm:$0xff] %vm1151_vm3, %v2868_v63  ;;  %v4784_v20 = vadd.f32 %v6657_v38, %v2708_v50  ;;  %v4624_v18 = vpop.f32.mrb[81].mxu1  ;;  %v5023_v63 = vld [vmem:[%s7019_s6 + $0xb0] sm:$0xff]   ;;  %v5024_v50 = vld [vmem:[%s7019_s6 + $0xf8] sm:$0xff]  }
 0x48a   :  { %v2711_v43 = vpop.f32.mrb[82].mxu1 }
 0x48b   :  { %v4785_v59 = vadd.f32 %v6657_v38, %v2711_v43  ;;  %v4625_v60 = vpop.f32.mrb[83].mxu1  ;;  %v2827_v24 = vmax.f32 %v4784_v20, 0.0  ;;  %v2950_v46 = vpop.permute.xlu1 %2949  ;;  %v5025_v43 = vld [vmem:[%s7019_s6 + $0xb8] sm:$0xff]  }
 0x48c   :  { %v2984_v3 = vsel %vm1650_vm4, %v2982_v0, %v2950_v46 }
 0x48d   :  { %v2828_v14 = vmax.f32 %v4785_v59, 0.0  ;;  %v5026_v59 = vld [vmem:[%s7019_s6 + $0x140] sm:$0xff]  }
 0x48f   :  { %v2869_v62 = vpack.c.bf16 %v2828_v14, %v2827_v24 }
 0x490   :  { %v2716_v1 = vpop.f32.mrb[84].mxu1  ;;  %v2928_v55 = vld [vmem:[#allocation3 + $0xb8] sm:$0xff] }
 0x491   :  { %2902 = vst.msk [vmem:[#allocation3 + $0xc0] sm:$0xff] %vm1151_vm3, %v2869_v62  ;;  %v4786_v13 = vadd.f32 %v6657_v38, %v2716_v1  ;;  %v4628_v6 = vpop.f32.mrb[85].mxu1  ;;  %3005 = vrot.lane.b32.xlu0 %v2928_v55, %s5092_s30 }
 0x492   :  { %v2719_v12 = vpop.f32.mrb[86].mxu1 }
 0x493   :  { %v4787_v40 = vadd.f32 %v6657_v38, %v2719_v12  ;;  %v2953_v30 = vpop.permute.xlu1 %2952  ;;  %v4629_v49 = vpop.f32.mrb[87].mxu1  ;;  %v2829_v37 = vmax.f32 %v4786_v13, 0.0 }
 0x494   :  { %v2986_v27 = vsel %vm1717_vm5, %v2984_v3, %v2953_v30 }
 0x495   :  { %v2830_v52 = vmax.f32 %v4787_v40, 0.0  ;;  %3480 = vmatprep.mubr.bf16.mxu0 %v2986_v27 }
 0x496   :  { %3481 = vmatmul.mubr.bf16.vlgmr.msra.gmra.mrb[212].mxu0 %v2978_v16 }
 0x497   :  { %v2870_v38 = vpack.c.bf16 %v2830_v52, %v2829_v37  ;;  %4263 = vmatpush3.bf16.msra.mxu0 %v5011_v41 }
 0x498   :  { %v2724_v53 = vpop.f32.mrb[88].mxu1  ;;  %v2929_v45 = vld [vmem:[#allocation3 + $0xc0] sm:$0xff]  ;;  %4264 = vmatprep.subr.bf16.mxu0 %v5012_v58 }
 0x499   :  { %2903 = vst.msk [vmem:[#allocation3 + $0xc8] sm:$0xff] %vm1151_vm3, %v2870_v38  ;;  %v4632_v22 = vpop.f32.mrb[89].mxu1  ;;  %3008 = vrot.lane.b32.xlu0 %v2929_v45, %s5093_s20 }
 0x49a   :  { %v2727_v17 = vpop.f32.mrb[90].mxu1 }
 0x49b   :  { %v4633_v23 = vpop.f32.mrb[91].mxu1  ;;  %4265 = vmatpush3.bf16.msra.mxu0 %v5013_v36 }
 0x49c   :  { %4266 = vmatprep.subr.bf16.mxu0 %v5014_v54 }
 0x49f   :  { %4267 = vmatpush3.bf16.msra.mxu0 %v5015_v29 }
 0x4a0   :  { %v2732_v19 = vpop.f32.mrb[92].mxu1  ;;  %v2930_v31 = vld [vmem:[#allocation3 + $0xc8] sm:$0xff]  ;;  %4268 = vmatprep.subr.bf16.mxu0 %v5016_v44 }
 0x4a1   :  { %v4636_v32 = vpop.f32.mrb[93].mxu1  ;;  %3011 = vrot.lane.b32.xlu0 %v2930_v31, %s5095_s27 }
 0x4a2   :  { %v2735_v21 = vpop.f32.mrb[94].mxu1 }
 0x4a3   :  { %v4637_v4 = vpop.f32.mrb[95].mxu1  ;;  %4269 = vmatpush3.bf16.msra.mxu0 %v5017_v47  ;;  %v2956_v19 = vpop.permute.xlu0 %2955  ;;  %v2923_v21 = vld [vmem:[#allocation3 + $0x80] sm:$0xff] }
 0x4a4   :  { %4270 = vmatprep.subr.bf16.mxu0 %v5018_v39  ;;  %v2919_v4 = vld [vmem:[#allocation3 + $0x50] sm:$0xff] }
 0x4a7   :  { %4271 = vmatpush3.bf16.msra.mxu0 %v5019_v34 }
 0x4a8   :  { %v2740_v56 = vpop.f32.mrb[96].mxu1  ;;  %4272 = vmatprep.subr.bf16.mxu0 %v5020_v9 }
 0x4a9   :  { %v4792_v7 = vadd.f32 %v5089_v26, %v2740_v56  ;;  %v4640_v11 = vpop.f32.mrb[97].mxu1 }
 0x4aa   :  { %v2743_v15 = vpop.f32.mrb[98].mxu1 }
 0x4ab   :  { %v4793_v2 = vadd.f32 %v5089_v26, %v2743_v15  ;;  %v4641_v57 = vpop.f32.mrb[99].mxu1  ;;  %4273 = vmatpush3.bf16.msra.mxu0 %v5021_v61  ;;  %v2835_v20 = vmax.f32 %v4792_v7, 0.0  ;;  %v2990_v61 = vsel %vm1151_vm3, %v2919_v4, %v2956_v19  ;;  %v5028_v15 = vld [vmem:[%s7019_s6 + $0x148] sm:$0xff]  }
 0x4ac   :  { %4274 = vmatprep.subr.bf16.mxu0 %v5022_v48  ;;  %v5029_v57 = vld [vmem:[%s7019_s6 + $0x108] sm:$0xff]  }
 0x4ad   :  { %v2836_v18 = vmax.f32 %v4793_v2, 0.0 }
 0x4af   :  { %v2873_v8 = vpack.c.bf16 %v2836_v18, %v2835_v20  ;;  %4275 = vmatpush3.bf16.msra.mxu0 %v5023_v63  ;;  %v5030_v63 = vld [vmem:[%s7019_s6 + $0x150] sm:$0xff]   ;;  %v5032_v20 = vld [vmem:[%s7019_s6 + $0x158] sm:$0xff]  }
 0x4b0   :  { %v2748_v10 = vpop.f32.mrb[100].mxu1  ;;  %4276 = vmatprep.subr.bf16.mxu0 %v5024_v50  ;;  %v5031_v50 = vld [vmem:[%s7019_s6 + $0x110] sm:$0xff]   ;;  %v5033_v18 = vld [vmem:[%s7019_s6 + $0x118] sm:$0xff]  }
 0x4b1   :  { %2906 = vst.msk [vmem:[#allocation3 + $0xe0] sm:$0xff] %vm1151_vm3, %v2873_v8  ;;  %v4794_v60 = vadd.f32 %v5089_v26, %v2748_v10  ;;  %v4644_v24 = vpop.f32.mrb[101].mxu1  ;;  %v5034_v8 = vld [vmem:[%s7019_s6 + $0x160] sm:$0xff]   ;;  %v5036_v10 = vld [vmem:[%s7019_s6 + $0x168] sm:$0xff]  }
 0x4b2   :  { %v2751_v14 = vpop.f32.mrb[102].mxu1  ;;  %v5039_v24 = vld [vmem:[%s7019_s6 + $0x130] sm:$0xff]  }
 0x4b3   :  { %v4795_v5 = vadd.f32 %v5089_v26, %v2751_v14  ;;  %v4645_v62 = vpop.f32.mrb[103].mxu1  ;;  %4277 = vmatpush3.bf16.msra.mxu0 %v5025_v43  ;;  %v2837_v46 = vmax.f32 %v4794_v60, 0.0  ;;  %v5035_v43 = vld [vmem:[%s7019_s6 + $0x120] sm:$0xff]   ;;  %v5038_v60 = vld [vmem:[%s7019_s6 + $0x170] sm:$0xff]   ;;  %v5040_v14 = vld [vmem:[%s7019_s6 + $0x178] sm:$0xff]  }
 0x4b4   :  { %4284 = vmatprep.subr.bf16.mxu0 %v5026_v59  ;;  %v5037_v59 = vld [vmem:[%s7019_s6 + $0x128] sm:$0xff]  }
 0x4b5   :  { %v2838_v1 = vmax.f32 %v4795_v5, 0.0  ;;  %v5041_v5 = vld [vmem:[%s7019_s6 + $0x138] sm:$0xff]  }
 0x4b7   :  { %v2874_v55 = vpack.c.bf16 %v2838_v1, %v2837_v46 }
 0x4b8   :  { %v2756_v28 = vpop.f32.mrb[104].mxu1 }
 0x4b9   :  { %2907 = vst.msk [vmem:[#allocation3 + $0xe8] sm:$0xff] %vm1151_vm3, %v2874_v55  ;;  %v4796_v13 = vadd.f32 %v5089_v26, %v2756_v28  ;;  %v4648_v6 = vpop.f32.mrb[105].mxu1  ;;  %v2931_v28 = vld [vmem:[#allocation3 + $0xe0] sm:$0xff] }
 0x4ba   :  { %v2759_v25 = vpop.f32.mrb[106].mxu1 }
 0x4bb   :  { %v4797_v33 = vadd.f32 %v5089_v26, %v2759_v25  ;;  %v4649_v0 = vpop.f32.mrb[107].mxu1  ;;  %v2839_v12 = vmax.f32 %v4796_v13, 0.0  ;;  %v2959_v39 = vpop.permute.xlu0 %2958  ;;  %v2927_v13 = vld [vmem:[#allocation3 + $0xb0] sm:$0xff] }
 0x4bc   :  { %v2992_v7 = vsel %vm1650_vm4, %v2990_v61, %v2959_v39 }
 0x4bd   :  { %v2840_v51 = vmax.f32 %v4797_v33, 0.0 }
 0x4bf   :  { %v2875_v3 = vpack.c.bf16 %v2840_v51, %v2839_v12  ;;  %v5042_v51 = vld [vmem:[%s7019_s6 + $0x180] sm:$0xff]  }
 0x4c0   :  { %v2764_v40 = vpop.f32.mrb[108].mxu1  ;;  %v2932_v30 = vld [vmem:[#allocation3 + $0xe8] sm:$0xff] }
 0x4c1   :  { %2908 = vst.msk [vmem:[#allocation3 + $0xf0] sm:$0xff] %vm1151_vm3, %v2875_v3  ;;  %v4798_v49 = vadd.f32 %v5089_v26, %v2764_v40  ;;  %3014 = vrot.lane.b32.xlu1 %v2932_v30, %s5092_s30  ;;  %v4652_v41 = vpop.f32.mrb[109].mxu1 }
 0x4c2   :  { %v2767_v35 = vpop.f32.mrb[110].mxu1 }
 0x4c3   :  { %v4799_v27 = vadd.f32 %v5089_v26, %v2767_v35  ;;  %v4653_v58 = vpop.f32.mrb[111].mxu1  ;;  %v2841_v16 = vmax.f32 %v4798_v49, 0.0  ;;  %v2962_v34 = vpop.permute.xlu0 %2961  ;;  %v5043_v49 = vld [vmem:[%s7019_s6 + $0x188] sm:$0xff]  }
 0x4c4   :  { %v2994_v2 = vsel %vm1717_vm5, %v2992_v7, %v2962_v34 }
 0x4c5   :  { %v2842_v37 = vmax.f32 %v4799_v27, 0.0 }
 0x4c7   :  { %v2876_v52 = vpack.c.bf16 %v2842_v37, %v2841_v16 }
 0x4c8   :  { %v2772_v38 = vpop.f32.mrb[112].mxu1  ;;  %v2933_v36 = vld [vmem:[#allocation3 + $0xf0] sm:$0xff] }
 0x4c9   :  { %2909 = vst.msk [vmem:[#allocation3 + $0xf8] sm:$0xff] %vm1151_vm3, %v2876_v52  ;;  %v4800_v53 = vadd.f32 %v5089_v26, %v2772_v38  ;;  %3017 = vrot.lane.b32.xlu1 %v2933_v36, %s5093_s20  ;;  %v4656_v45 = vpop.f32.mrb[113].mxu1  ;;  %v4085_v38 = vld [vmem:[%s7020_s7] ss:$0 sm:$0xff] }
 0x4ca   :  { %v2775_v54 = vpop.f32.mrb[114].mxu1 }
 0x4cb   :  { %v4801_v22 = vadd.f32 %v5089_v26, %v2775_v54  ;;  %v4657_v17 = vpop.f32.mrb[115].mxu1  ;;  %v2843_v23 = vmax.f32 %v4800_v53, 0.0  ;;  %v5027_v26 = vld [vmem:[%s7019_s6 + $0x100] sm:$0xff]  }
 0x4cd   :  { %v2844_v29 = vmax.f32 %v4801_v22, 0.0 }
 0x4cf   :  { %v2877_v44 = vpack.c.bf16 %v2844_v29, %v2843_v23 }
 0x4d0   :  { %v2934_v47 = vld [vmem:[#allocation3 + $0xf8] sm:$0xff] }
 0x4d1   :  { %2910 = vst.msk [vmem:[#allocation3 + $0x100] sm:$0xff] %vm1151_vm3, %v2877_v44  ;;  %3020 = vrot.lane.b32.xlu1 %v2934_v47, %s5095_s27 }
 0x4d3   :  { %v2965_v31 = vpop.permute.xlu1 %2964 }
 0x4d4   :  { %v2998_v9 = vsel %vm1151_vm3, %v2923_v21, %v2965_v31 }
 0x4d8   :  { %v2935_v41 = vld [vmem:[#allocation3 + $0x100] sm:$0xff] }
 0x4db   :  { %v2968_v32 = vpop.permute.xlu1 %2967 }
 0x4dc   :  { %v3000_v56 = vsel %vm1650_vm4, %v2998_v9, %v2968_v32 }
 0x4f3   :  { %v2971_v48 = vpop.permute.xlu1 %2970 }
 0x4f4   :  { %v3002_v11 = vsel %vm1717_vm5, %v3000_v56, %v2971_v48 }
 0x4f5   :  { %3521 = vmatprep.mubr.bf16.mxu0 %v3002_v11 }
 0x4f6   :  { %3522 = vmatmul.mubr.bf16.vlgmr.msra.gmra.mrb[216].mxu0 %v2994_v2 }
 0x4f7   :  { %4285 = vmatpush3.bf16.msra.mxu0 %v5027_v26 }
 0x4f8   :  { %4286 = vmatprep.subr.bf16.mxu0 %v5028_v15 }
 0x4fb   :  { %4287 = vmatpush3.bf16.msra.mxu0 %v5029_v57 }
 0x4fc   :  { %4288 = vmatprep.subr.bf16.mxu0 %v5030_v63 }
 0x4ff   :  { %4289 = vmatpush3.bf16.msra.mxu0 %v5031_v50 }
 0x500   :  { %4290 = vmatprep.subr.bf16.mxu0 %v5032_v20 }
 0x503   :  { %4291 = vmatpush3.bf16.msra.mxu0 %v5033_v18  ;;  %v3006_v62 = vpop.permute.xlu0 %3005 }
 0x504   :  { %4292 = vmatprep.subr.bf16.mxu0 %v5034_v8  ;;  %v3024_v33 = vsel %vm1151_vm3, %v2927_v13, %v3006_v62  ;;  %v5045_v62 = vld [vmem:[%s7023_s10] sm:$0xff]  }
 0x507   :  { %4293 = vmatpush3.bf16.msra.mxu0 %v5035_v43 }
 0x508   :  { %4294 = vmatprep.subr.bf16.mxu0 %v5036_v10 }
 0x50b   :  { %4295 = vmatpush3.bf16.msra.mxu0 %v5037_v59  ;;  %v3009_v1 = vpop.permute.xlu0 %3008 }
 0x50c   :  { %4296 = vmatprep.subr.bf16.mxu0 %v5038_v60  ;;  %v3026_v3 = vsel %vm1650_vm4, %v3024_v33, %v3009_v1 }
 0x50f   :  { %4297 = vmatpush3.bf16.msra.mxu0 %v5039_v24  ;;  %v3666_v24 = vld [vmem:[%s7021_s11] sm:$0x3] }
 0x510   :  { %4298 = vmatprep.subr.bf16.mxu0 %v5040_v14  ;;  %v3677_v14 = vsel %vm575_vm1, %v3666_v24, 0 }
 0x513   :  { %4299 = vmatpush3.bf16.msra.mxu0 %v5041_v5  ;;  %v3012_v6 = vpop.permute.xlu0 %3011  ;;  %v5044_v5 = vld [vmem:[%s7022_s1] sm:$0xff]  }
 0x514   :  { %4658 = vmatprep.subr.bf16.mxu0 %v7074_v42  ;;  %v3028_v30 = vsel %vm1717_vm5, %v3026_v3, %v3012_v6  ;;  %v4138_v3 = vld [vmem:[%s7025_s9] ss:$0 sm:$0xff] }
 0x533   :  { %v3015_v46 = vpop.permute.xlu1 %3014 }
 0x534   :  { %v3032_v25 = vsel %vm1151_vm3, %v2931_v28, %v3015_v46  ;;  %v5046_v46 = vld [vmem:[%s7023_s10 + $0x8] sm:$0xff]  }
 0x53b   :  { %v3018_v55 = vpop.permute.xlu1 %3017 }
 0x53c   :  { %v3034_v0 = vsel %vm1650_vm4, %v3032_v25, %v3018_v55 }
 0x543   :  { %v3021_v12 = vpop.permute.xlu1 %3020 }
 0x544   :  { %v3036_v40 = vsel %vm1717_vm5, %v3034_v0, %v3021_v12  ;;  %v4137_v0 = vld [vmem:[%s7024_s8] ss:$0 sm:$0xff] }
 0x545   :  { %3562 = vmatprep.mubr.bf16.mxu0 %v3036_v40 }
 0x546   :  { %3563 = vmatmul.mubr.bf16.vlgmr.msra.gmra.mrb[220].mxu0 %v3028_v30 }
 0x547   :  { %4659 = vmatpush3.bf16.msra.mxu0 %v5042_v51  ;;  %4662 = vmatprep.mubr.msk.bf16.mxu0 %vm5091_vm0, %v7074_v42 }
 0x548   :  { %4660 = vmatprep.subr.bf16.mxu0 %v7074_v42 }
 0x54b   :  { %4661 = vmatpush3.bf16.msra.mxu0 %v5043_v49 }
 0x54c   :  { %4666 = vmatprep.subr.bf16.mxu0 %v7074_v42 }
 0x54e   :  { %4663 = vmatmul.mubr.msk.bf16.vlgmr.msra.gmra.mrb[224].mxu0 %vm1151_vm3, %v2935_v41 }
 0x54f   :  { %4668 = vmatprep.mubr.msk.bf16.mxu0 %vm5091_vm0, %v7074_v42  ;;  %4667 = vmatpush3.bf16.msra.mxu0 %v3677_v14 }
 0x550   :  { %4672 = vmatprep.subr.bf16.mxu0 %v7074_v42 }
 0x556   :  { %4669 = vmatmul.mubr.msk.bf16.vlgmr.msra.gmra.mrb[228].mxu0 %vm3672_vm6, %v5044_v5 }
 0x557   :  { %4673 = vmatpush3.bf16.msra.mxu0 %v5045_v62  ;;  %4676 = vmatprep.mubr.msk.bf16.mxu0 %vm5091_vm0, %v7074_v42 }
 0x558   :  { %4674 = vmatprep.subr.bf16.mxu0 %v7074_v42 }
 0x55b   :  { %4675 = vmatpush3.bf16.msra.mxu0 %v5046_v46 }
 0x55c   :  { %4680 = vmatprep.subr.bf16.mxu0 %v7074_v42 }
 0x569   :  { %v4256_v35 = vpop.f32.mrb[212].mxu0 }
 0x56a   :  { %v4257_v27 = vpop.f32.mrb[213].mxu0 }
 0x56b   :  { %v4258_v58 = vadd.f32 %v4257_v27, %v4256_v35  ;;  %v4259_v16 = vpop.f32.mrb[214].mxu0 }
 0x56c   :  { %v4260_v37 = vpop.f32.mrb[215].mxu0 }
 0x56d   :  { %v4261_v52 = vadd.f32 %v4260_v37, %v4259_v16  ;;  %v3483_v45 = vadd.f32 %v4258_v58, %v4085_v38 }
 0x56f   :  { %v3486_v23 = vadd.f32 %v4261_v52, %v4085_v38 }
 0x5c9   :  { %v4278_v36 = vpop.f32.mrb[216].mxu0 }
 0x5ca   :  { %v4279_v53 = vpop.f32.mrb[217].mxu0 }
 0x5cb   :  { %v4280_v54 = vadd.f32 %v4279_v53, %v4278_v36  ;;  %v4281_v22 = vpop.f32.mrb[218].mxu0  ;;  %v5047_v53 = vld [vmem:[%s7026_s13] sm:$0xff]  }
 0x5cc   :  { %v4282_v17 = vpop.f32.mrb[219].mxu0 }
 0x5cd   :  { %v3524_v29 = vadd.f32 %v4280_v54, %v3483_v45  ;;  %v4283_v44 = vadd.f32 %v4282_v17, %v4281_v22  ;;  %v5048_v45 = vld [vmem:[%s7026_s13 + $0x8] sm:$0xff]   ;;  %v4144_v22 = vld [vmem:[%s7027_s12] ss:$0 sm:$0xff] }
 0x5cf   :  { %v3527_v47 = vadd.f32 %v4283_v44, %v3486_v23 }
 0x619   :  { %v4300_v19 = vpop.f32.mrb[220].mxu0 }
 0x61a   :  { %v4301_v31 = vpop.f32.mrb[221].mxu0 }
 0x61b   :  { %v4302_v39 = vadd.f32 %v4301_v31, %v4300_v19  ;;  %v4303_v32 = vpop.f32.mrb[222].mxu0 }
 0x61c   :  { %v4304_v21 = vpop.f32.mrb[223].mxu0 }
 0x61d   :  { %v4305_v4 = vadd.f32 %v4304_v21, %v4303_v32  ;;  %v3565_v34 = vadd.f32 %v4302_v39, %v3524_v29 }
 0x61f   :  { %v3568_v9 = vadd.f32 %v4305_v4, %v3527_v47  ;;  %v5049_v4 = vld [vmem:[%s7028_s15] sm:$0xff]  }
 0x621   :  { %v3605_v61 = vpop.f32.mrb[224].mxu0 }
 0x622   :  { %v3606_v56 = vadd.f32 %v3605_v61, %v3565_v34  ;;  %v4664_v48 = vpop.f32.mrb[225].mxu0  ;;  %v5050_v34 = vld [vmem:[%s7028_s15 + $0x8] sm:$0xff]  }
 0x623   :  { %v3608_v26 = vpop.f32.mrb[226].mxu0 }
 0x624   :  { %v3609_v7 = vadd.f32 %v3608_v26, %v3568_v9  ;;  %v4665_v11 = vpop.f32.mrb[227].mxu0  ;;  %v3612_v15 = vsel %vm1151_vm3, %v3606_v56, 0.0  ;;  %v4145_v9 = vld [vmem:[%s7029_s14] ss:$0 sm:$0xff] }
 0x625   :  { %3613 = vadd.xlane.f32.xlu1 %v3612_v15 }
 0x626   :  { %v3615_v2 = vsel %vm1151_vm3, %v3609_v7, 0.0 }
 0x627   :  { %3616 = vadd.xlane.f32.xlu0 %v3615_v2 }
 0x629   :  { %v3713_v37 = vpop.f32.mrb[228].mxu0 }
 0x62a   :  { %v4670_v52 = vpop.f32.mrb[229].mxu0 }
 0x62b   :  { %v3716_v38 = vpop.f32.mrb[230].mxu0 }
 0x62c   :  { %v4671_v36 = vpop.f32.mrb[231].mxu0 }
 0x6b2   :  { %v3614_v57 = vpop.xlane.xlu1 %3613 }
 0x6b3   :  { %v3619_v63 = vmul.f32 0.03125, %v3614_v57 }
 0x6b4   :  { %v3617_v50 = vpop.xlane.xlu0 %3616 }
 0x6b5   :  { %v3621_v20 = vsub.f32 %v3606_v56, %v3619_v63  ;;  %v3620_v18 = vmul.f32 0.03125, %v3617_v50 }
 0x6b7   :  { %v3622_v8 = vsub.f32 %v3609_v7, %v3620_v18  ;;  %v3623_v43 = vmul.f32 %v3621_v20, %v3621_v20 }
 0x6b9   :  { %v3625_v10 = vsel %vm1151_vm3, %v3623_v43, 0.0  ;;  %v3624_v59 = vmul.f32 %v3622_v8, %v3622_v8 }
 0x6ba   :  { %3626 = vadd.xlane.f32.xlu0 %v3625_v10 }
 0x6bb   :  { %v3628_v60 = vsel %vm1151_vm3, %v3624_v59, 0.0 }
 0x6bc   :  { %3629 = vadd.xlane.f32.xlu1 %v3628_v60 }
 0x747   :  { %v3627_v1 = vpop.xlane.xlu0 %3626 }
 0x748   :  { %v3631_v55 = vmul.f32 0.03125, %v3627_v1 }
 0x749   :  { %v3630_v28 = vpop.xlane.xlu1 %3629 }
 0x74a   :  { %v3633_v13 = vadd.f32 1e-05, %v3631_v55  ;;  %v3632_v6 = vmul.f32 0.03125, %v3630_v28 }
 0x74c   :  { %5051 = vrsqrt.f32 %v3633_v13  ;;  %v3634_v25 = vadd.f32 1e-05, %v3632_v6 }
 0x74e   :  { %5053 = vrsqrt.f32 %v3634_v25 }
 0x756   :  { %v5052_v33 = vpop.eup %5051 }
 0x757   :  { %v3637_v12 = vmul.f32 %v5052_v33, %v3621_v20 }
 0x758   :  { %v5054_v51 = vpop.eup %5053 }
 0x759   :  { %v3646_v40 = vmul.f32 %v4137_v0, %v3637_v12  ;;  %v3638_v30 = vmul.f32 %v5054_v51, %v3622_v8 }
 0x75b   :  { %v3655_v49 = vadd.f32 %v4138_v3, %v3646_v40  ;;  %v3647_v41 = vmul.f32 %v4137_v0, %v3638_v30 }
 0x75d   :  { %v3656_v35 = vadd.f32 %v4138_v3, %v3647_v41  ;;  %5055 = vtanh.f32 %v3655_v49 }
 0x75f   :  { %5057 = vtanh.f32 %v3656_v35 }
 0x767   :  { %v5056_v27 = vpop.eup %5055 }
 0x769   :  { %v5058_v58 = vpop.eup %5057 }
 0x76a   :  { %v3659_v16 = vpack.c.bf16 %v5058_v58, %v5056_v27 }
 0x76c   :  { %4677 = vmatmul.mubr.msk.bf16.vlgmr.msra.gmra.mrb[232].mxu0 %vm1151_vm3, %v3659_v16 }
 0x76d   :  { %4684 = vmatprep.mubr.msk.bf16.mxu0 %vm5091_vm0, %v7074_v42  ;;  %4681 = vmatpush3.bf16.msra.mxu0 %v5047_v53 }
 0x76e   :  { %4682 = vmatprep.subr.bf16.mxu0 %v7074_v42 }
 0x771   :  { %4683 = vmatpush3.bf16.msra.mxu0 %v5048_v45 }
 0x772   :  { %4688 = vmatprep.subr.bf16.mxu0 %v7074_v42 }
 0x83f   :  { %v3769_v54 = vpop.f32.mrb[232].mxu0 }
 0x840   :  { %v3770_v17 = vadd.f32 %v3769_v54, %v3713_v37  ;;  %v4678_v23 = vpop.f32.mrb[233].mxu0 }
 0x841   :  { %v3772_v29 = vpop.f32.mrb[234].mxu0 }
 0x842   :  { %v3783_v44 = vadd.f32 %v4144_v22, %v3770_v17  ;;  %v3773_v47 = vadd.f32 %v3772_v29, %v3716_v38  ;;  %v4679_v19 = vpop.f32.mrb[235].mxu0 }
 0x844   :  { %v3784_v31 = vadd.f32 %v4144_v22, %v3773_v47  ;;  %v3785_v39 = vmax.f32 %v3783_v44, 0.0 }
 0x846   :  { %v3786_v32 = vmax.f32 %v3784_v31, 0.0 }
 0x848   :  { %v3787_v21 = vpack.c.bf16 %v3786_v32, %v3785_v39 }
 0x84a   :  { %4685 = vmatmul.mubr.msk.bf16.vlgmr.msra.gmra.mrb[236].mxu0 %vm1151_vm3, %v3787_v21 }
 0x84b   :  { %4692 = vmatprep.mubr.msk.bf16.mxu0 %vm5091_vm0, %v7074_v42  ;;  %4689 = vmatpush3.bf16.msra.mxu0 %v5049_v4 }
 0x84c   :  { %4690 = vmatprep.subr.bf16.mxu0 %v7074_v42  ;;  %v4149_v42 = vld [vmem:[%s7030_s16] ss:$0 sm:$0xff] }
 0x84f   :  { %4691 = vmatpush3.bf16.msra.mxu0 %v5050_v34 }
 0x91d   :  { %v3848_v61 = vpop.f32.mrb[236].mxu0 }
 0x91e   :  { %v3849_v56 = vadd.f32 %v4145_v9, %v3848_v61  ;;  %v4686_v48 = vpop.f32.mrb[237].mxu0 }
 0x91f   :  { %v3851_v26 = vpop.f32.mrb[238].mxu0 }
 0x920   :  { %v3852_v7 = vadd.f32 %v4145_v9, %v3851_v26  ;;  %v4687_v11 = vpop.f32.mrb[239].mxu0  ;;  %v3855_v15 = vmax.f32 %v3849_v56, 0.0 }
 0x922   :  { %v3856_v2 = vmax.f32 %v3852_v7, 0.0 }
 0x924   :  { %v3857_v57 = vpack.c.bf16 %v3856_v2, %v3855_v15 }
 0x926   :  { %4693 = vmatmul.mubr.msk.bf16.vlgmr.msra.gmra.mrb[240].mxu0 %vm1151_vm3, %v3857_v57 }
 0x9f9   :  { %v3918_v63 = vpop.f32.mrb[240].mxu0 }
 0x9fa   :  { %v3919_v50 = vadd.f32 %v4149_v42, %v3918_v63  ;;  %v4694_v20 = vpop.f32.mrb[241].mxu0 }
 0x9fb   :  { %v3921_v18 = vpop.f32.mrb[242].mxu0 }
 0x9fc   :  { %3925 = vst [vmem:[%s7031_s17] sm:$0xff] %v3919_v50  ;;  %v3922_v8 = vadd.f32 %v4149_v42, %v3921_v18  ;;  %v4695_v43 = vpop.f32.mrb[243].mxu0 }
 0x9fe   :  { %3926 = vst [vmem:[%s7031_s17 + $0x8] sm:$0xff] %v3922_v8 }

</bundles_post_ra>
